<compile_context>
chip_gen: v7x
topology: tpu7x:2x2x1
jax: 0.10.0
libtpu: 0.0.40
codegen_flags: <defaults>
</compile_context>

<pallas_src>
import jax
import jax.numpy as jnp
from jax.experimental import pallas as pl
from jax.experimental.pallas import tpu as pltpu


# ----------------------------------------------------------------------------
# Padding constants
# ----------------------------------------------------------------------------
K1_PAD, K2_PAD = 128, 256          # conv1 K=75 -> 128, conv2 K=150 -> 256
M1_PAD, M2_PAD = 200, 32           # pooled positions 196 -> 200, 25 -> 32
FC_IN_PAD, FC_WIDTH = M2_PAD * 16, 128   # 512 / fc widths 120/84/10 -> 128


def _conv_batch_tile(n, target=8):
    """Largest divisor of n that is <= target (leading block dim: unconstrained)."""
    bt = min(n, target)
    while n % bt:
        bt -= 1
    return bt


def _fc_batch_tile(n, target=256):
    """Batch tile for the FC kernel: full batch, or a multiple-of-8 divisor."""
    if n <= target:
        return n
    for bt in range(target, 7, -1):
        if n % bt == 0 and bt % 8 == 0:
            return bt
    return n


# ----------------------------------------------------------------------------
# Kernel 1/2: fused conv-as-matmul + running-max pool + bias + ReLU
# ----------------------------------------------------------------------------
def _conv_relu_pool_kernel(p_ref, w_ref, b_ref, o_ref):
    """p_ref: (B, 4, Mp, Kp) bf16 stacked pool-phase patches
       w_ref: (Kp, C) bf16 (zero-padded K rows), b_ref: (1, C) f32
       o_ref: (B, Mp, C) bf16 pooled activations."""
    B, _, Mp, Kp = p_ref.shape
    C = o_ref.shape[-1]
    w = w_ref[...]

    def phase(ph):
        x = p_ref[:, ph].reshape(B * Mp, Kp)           # free: Mp % 8 == 0
        acc = jnp.dot(x, w, preferred_element_type=jnp.float32)
        return acc.reshape(B, Mp, C)

    y = phase(0)
    for ph in range(1, 4):                             # running max: <=2 live accs
        y = jnp.maximum(y, phase(ph))
    y = jnp.maximum(y + b_ref[...], 0.0)               # bias + ReLU after the max
    o_ref[...] = y.astype(o_ref.dtype)


def conv_relu_pool(phases, w, b, *, target_bt=8):
    """phases: (N, 4, Mp, Kp) bf16 -> pooled activations (N, Mp, C) bf16."""
    N, _, Mp, Kp = phases.shape
    Kw, C = w.shape
    assert Kw == Kp and Mp % 8 == 0
    bt = _conv_batch_tile(N, target_bt)
    cost = pl.CostEstimate(
        flops=2 * N * 4 * Mp * Kp * C,
        transcendentals=0,
        bytes_accessed=phases.size * 2 + w.size * 2 + b.size * 4 + N * Mp * C * 2)
    return pl.pallas_call(
        _conv_relu_pool_kernel,
        out_shape=jax.ShapeDtypeStruct((N, Mp, C), jnp.bfloat16),
        grid=(N // bt,),
        in_specs=[pl.BlockSpec((bt, 4, Mp, Kp), lambda i: (i, 0, 0, 0)),
                  pl.BlockSpec((Kp, C), lambda i: (0, 0)),   # resident weight
                  pl.BlockSpec((1, C), lambda i: (0, 0))],   # resident bias
        out_specs=pl.BlockSpec((bt, Mp, C), lambda i: (i, 0, 0)),
        compiler_params=pltpu.CompilerParams(dimension_semantics=("parallel",)),
        cost_estimate=cost,
    )(phases, w, b)


# ----------------------------------------------------------------------------
# Kernel 3: fc1 -> ReLU -> fc2 -> ReLU -> fc3, batch-tiled grid
# ----------------------------------------------------------------------------
def _fc_fused_kernel(x_ref, w1_ref, b1_ref, w2_ref, b2_ref, w3_ref, b3_ref,
                     o_ref):
    h = jnp.dot(x_ref[...], w1_ref[...], preferred_element_type=jnp.float32)
    h = jnp.maximum(h + b1_ref[...], 0.0)
    h = jnp.dot(h.astype(w2_ref.dtype), w2_ref[...],
                preferred_element_type=jnp.float32)
    h = jnp.maximum(h + b2_ref[...], 0.0)
    h = jnp.dot(h.astype(w3_ref.dtype), w3_ref[...],
                preferred_element_type=jnp.float32)
    o_ref[...] = h + b3_ref[...]


def fc_fused(x, w1, b1, w2, b2, w3, b3, *, target_bt=256):
    N, Kin = x.shape
    n_out = w3.shape[1]
    bt = _fc_batch_tile(N, target_bt)
    resident = lambda i: (0, 0)
    flops = 2 * N * (Kin * w1.shape[1] + w2.shape[0] * w2.shape[1]
                     + w3.shape[0] * w3.shape[1])
    bytes_acc = (x.size * 2 + (w1.size + w2.size + w3.size) * 2
                 + (b1.size + b2.size + b3.size) * 4 + N * n_out * 4)
    return pl.pallas_call(
        _fc_fused_kernel,
        out_shape=jax.ShapeDtypeStruct((N, n_out), jnp.float32),
        grid=(N // bt,),
        in_specs=[pl.BlockSpec((bt, Kin), lambda i: (i, 0)),
                  pl.BlockSpec(w1.shape, resident),
                  pl.BlockSpec(b1.shape, resident),
                  pl.BlockSpec(w2.shape, resident),
                  pl.BlockSpec(b2.shape, resident),
                  pl.BlockSpec(w3.shape, resident),
                  pl.BlockSpec(b3.shape, resident)],
        out_specs=pl.BlockSpec((bt, n_out), lambda i: (i, 0)),
        compiler_params=pltpu.CompilerParams(dimension_semantics=("parallel",)),
        cost_estimate=pl.CostEstimate(flops=flops, transcendentals=0,
                                      bytes_accessed=bytes_acc),
    )(x, w1, b1, w2, b2, w3, b3)


# ----------------------------------------------------------------------------
# Glue: stacked per-pool-phase im2col (column order matches torch (cin, kh, kw))
# ----------------------------------------------------------------------------
# TODO(synk): extracting the conv taps inside the kernel (DMA the raw image
# block and build rows with stride-2 pl.ds slices) would remove the im2col HBM
# amplification, but needs reshapes across the tiled dims; kept in XLA glue.
def im2col_pool_phases(x_nhwc, k, m_pad, k_pad):
    """Stacked phase tensor (N, 4, m_pad, k_pad) bf16.

    phase(a,b)[n, po*Pw+pw, c*k*k + i*k + j] = x[n, 2*po+a+i, 2*pw+b+j, c];
    max over the 4 phases of (phase @ w) equals relu-free conv + 2x2/2 max pool.
    """
    N, H, W, C = x_nhwc.shape
    Ho, Wo = H - k + 1, W - k + 1
    Po, Pw = Ho // 2, Wo // 2
    M, K = Po * Pw, C * k * k
    phases = []
    for a in range(2):
        for b in range(2):
            taps = []
            for i in range(k):
                for j in range(k):
                    hs, ws = a + i, b + j
                    taps.append(x_nhwc[:, hs:hs + 2 * Po - 1:2,
                                          ws:ws + 2 * Pw - 1:2, :])
            p = jnp.stack(taps, axis=-1)              # (N, Po, Pw, C, k*k)
            phases.append(p.reshape(N, M, K))         # col = c*k*k + i*k + j
    ph = jnp.stack(phases, axis=1)                    # (N, 4, M, K)
    ph = jnp.pad(ph, ((0, 0), (0, 0), (0, m_pad - M), (0, k_pad - K)))
    return ph.astype(jnp.bfloat16), (Po, Pw)


# ----------------------------------------------------------------------------
# Parameters (torch layouts) + one-time conversion to kernel-ready layouts
# ----------------------------------------------------------------------------
def init_params(key):
    def uniform(k, shape, fan_in):
        bound = 1.0 / jnp.sqrt(fan_in)
        return jax.random.uniform(k, shape, jnp.float32, -bound, bound)

    ks = jax.random.split(key, 10)
    return {
        "conv1_w": uniform(ks[0], (6, 3, 5, 5), 3 * 5 * 5),
        "conv1_b": uniform(ks[1], (6,), 3 * 5 * 5),
        "conv2_w": uniform(ks[2], (16, 6, 5, 5), 6 * 5 * 5),
        "conv2_b": uniform(ks[3], (16,), 6 * 5 * 5),
        "fc1_w": uniform(ks[4], (120, 400), 400),
        "fc1_b": uniform(ks[5], (120,), 400),
        "fc2_w": uniform(ks[6], (84, 120), 120),
        "fc2_b": uniform(ks[7], (84,), 120),
        "fc3_w": uniform(ks[8], (10, 84), 84),
        "fc3_b": uniform(ks[9], (10,), 84),
    }


def _pad2(a, rows, cols, dtype):
    r, c = a.shape
    return jnp.pad(a, ((0, rows - r), (0, cols - c))).astype(dtype)


def prepare_params(p):
    """Hoist all reshapes / transposes / zero-padding / casts out of forward."""
    bf16, f32 = jnp.bfloat16, jnp.float32

    # fc1: torch flatten index is c*25 + m (m = h*5 + w); the kernel's native
    # feature order is m*16 + c with m padded 25->32. Permute the weight rows
    # once here and fold the 400->512 zero-pad in, so forward needs no
    # transpose / pad glue (padded rows m>=25 are zero, killing the junk rows
    # of the conv2 output).
    w1 = p["fc1_w"].reshape(120, 16, 25)               # [j, c, m]
    w1 = jnp.transpose(w1, (2, 1, 0))                  # [m, c, j]
    w1 = jnp.pad(w1, ((0, M2_PAD - 25), (0, 0), (0, 0)))
    w1 = w1.reshape(FC_IN_PAD, 120)

    return {
        "conv1_w": _pad2(p["conv1_w"].reshape(6, 75).T, K1_PAD, 6, bf16),
        "conv1_b": p["conv1_b"].reshape(1, 6).astype(f32),
        "conv2_w": _pad2(p["conv2_w"].reshape(16, 150).T, K2_PAD, 16, bf16),
        "conv2_b": p["conv2_b"].reshape(1, 16).astype(f32),
        "fc1_w": _pad2(w1, FC_IN_PAD, FC_WIDTH, bf16),
        "fc1_b": _pad2(p["fc1_b"].reshape(1, -1), 1, FC_WIDTH, f32),
        "fc2_w": _pad2(p["fc2_w"].T, FC_WIDTH, FC_WIDTH, bf16),
        "fc2_b": _pad2(p["fc2_b"].reshape(1, -1), 1, FC_WIDTH, f32),
        "fc3_w": _pad2(p["fc3_w"].T, FC_WIDTH, FC_WIDTH, bf16),
        "fc3_b": _pad2(p["fc3_b"].reshape(1, -1), 1, FC_WIDTH, f32),
    }


# ----------------------------------------------------------------------------
# Forward pass (mirrors Net.forward; NCHW f32 in, (N, 10) f32 logits out)
# ----------------------------------------------------------------------------
def net_forward(x_nchw, p):
    N = x_nchw.shape[0]
    x = jnp.transpose(x_nchw, (0, 2, 3, 1)).astype(jnp.bfloat16)    # NHWC bf16

    # conv1(3->6, k=5) + ReLU + 2x2 pool, fused, batch-tiled grid.
    ph1, (Po, Pw) = im2col_pool_phases(x, 5, M1_PAD, K1_PAD)        # (N,4,200,128)
    y = conv_relu_pool(ph1, p["conv1_w"], p["conv1_b"])             # (N,200,6)
    y = y[:, :Po * Pw, :].reshape(N, Po, Pw, 6)                     # (N,14,14,6)

    # conv2(6->16, k=5) + ReLU + 2x2 pool, fused, batch-tiled grid.
    ph2, _ = im2col_pool_phases(y, 5, M2_PAD, K2_PAD)               # (N,4,32,256)
    y = conv_relu_pool(ph2, p["conv2_w"], p["conv2_b"])             # (N,32,16)

    # Flatten is a free contiguous reshape: fc1_w rows were pre-permuted to the
    # kernel's (m, c) order with the zero-pad folded in.
    feat = y.reshape(N, FC_IN_PAD)                                  # (N,512) bf16

    out = fc_fused(feat, p["fc1_w"], p["fc1_b"], p["fc2_w"], p["fc2_b"],
                   p["fc3_w"], p["fc3_b"])                          # (N,128) f32
    return out[:, :10]


if __name__ == "__main__":
    key = jax.random.PRNGKey(0)
    kx, kp = jax.random.split(key)
    # Net requires 32x32 spatial input so the flatten is exactly 16*5*5 = 400.
    x = jax.random.normal(kx, (2, 3, 32, 32), dtype=jnp.float32)
    params = prepare_params(init_params(kp))

    out = jax.block_until_ready(jax.jit(net_forward)(x, params))
    assert out.shape == (2, 10) and out.dtype == jnp.float32
    print("KERNEL_OK")
</pallas_src>

<mosaic_0001>
module attributes {stable_mosaic.version = 11 : i64} {
  func.func @_conv_relu_pool_kernel(%arg0: i32, %arg1: memref<2x4x200x128xbf16, #tpu.memory_space<vmem>>, %arg2: memref<128x6xbf16, #tpu.memory_space<vmem>>, %arg3: memref<1x6xf32, #tpu.memory_space<vmem>>, %arg4: memref<2x200x6xbf16, #tpu.memory_space<vmem>>) attributes {dimension_semantics = [#tpu.dimension_semantics<parallel>], iteration_bounds = array<i64: 1>, scalar_prefetch = 0 : i64, scratch_operands = 0 : i64, tpu.core_type = #tpu.core_type<tc>, window_params = [{transform_indices = @transform_0, window_bounds = array<i64: 2, 4, 200, 128>}, {pipeline_mode = #tpu.pipeline_mode<synchronous>, transform_indices = @transform_1, window_bounds = array<i64: 128, 6>}, {pipeline_mode = #tpu.pipeline_mode<synchronous>, transform_indices = @transform_2, window_bounds = array<i64: 1, 6>}, {transform_indices = @transform_3, window_bounds = array<i64: 2, 200, 6>}]} {
    %c0 = arith.constant 0 : index
    %c0_0 = arith.constant 0 : index
    %0 = vector.load %arg2[%c0, %c0_0] : memref<128x6xbf16, #tpu.memory_space<vmem>>, vector<128x6xbf16>
    %c0_1 = arith.constant 0 : index
    %c0_2 = arith.constant 0 : index
    %c0_3 = arith.constant 0 : index
    %c0_4 = arith.constant 0 : index
    %1 = vector.load %arg1[%c0_1, %c0_2, %c0_3, %c0_4] : memref<2x4x200x128xbf16, #tpu.memory_space<vmem>>, vector<2x1x200x128xbf16>
    %2 = vector.shape_cast %1 : vector<2x1x200x128xbf16> to vector<2x200x128xbf16>
    %3 = vector.shape_cast %2 : vector<2x200x128xbf16> to vector<400x128xbf16>
    %cst = arith.constant dense<0.000000e+00> : vector<400x6xf32>
    %4 = tpu.matmul %3, %0, %cst {dimension_numbers = #tpu.dot_dimension_numbers<[1], [0], [0], [1], [0, 0, 1, 1], [], []>} : vector<400x128xbf16>, vector<128x6xbf16>, vector<400x6xf32> -> vector<400x6xf32>
    %5 = vector.shape_cast %4 : vector<400x6xf32> to vector<2x200x6xf32>
    %c0_5 = arith.constant 0 : index
    %c1 = arith.constant 1 : index
    %c0_6 = arith.constant 0 : index
    %c0_7 = arith.constant 0 : index
    %6 = vector.load %arg1[%c0_5, %c1, %c0_6, %c0_7] : memref<2x4x200x128xbf16, #tpu.memory_space<vmem>>, vector<2x1x200x128xbf16>
    %7 = vector.shape_cast %6 : vector<2x1x200x128xbf16> to vector<2x200x128xbf16>
    %8 = vector.shape_cast %7 : vector<2x200x128xbf16> to vector<400x128xbf16>
    %cst_8 = arith.constant dense<0.000000e+00> : vector<400x6xf32>
    %9 = tpu.matmul %8, %0, %cst_8 {dimension_numbers = #tpu.dot_dimension_numbers<[1], [0], [0], [1], [0, 0, 1, 1], [], []>} : vector<400x128xbf16>, vector<128x6xbf16>, vector<400x6xf32> -> vector<400x6xf32>
    %10 = vector.shape_cast %9 : vector<400x6xf32> to vector<2x200x6xf32>
    %11 = arith.maximumf %5, %10 : vector<2x200x6xf32>
    %c0_9 = arith.constant 0 : index
    %c2 = arith.constant 2 : index
    %c0_10 = arith.constant 0 : index
    %c0_11 = arith.constant 0 : index
    %12 = vector.load %arg1[%c0_9, %c2, %c0_10, %c0_11] : memref<2x4x200x128xbf16, #tpu.memory_space<vmem>>, vector<2x1x200x128xbf16>
    %13 = vector.shape_cast %12 : vector<2x1x200x128xbf16> to vector<2x200x128xbf16>
    %14 = vector.shape_cast %13 : vector<2x200x128xbf16> to vector<400x128xbf16>
    %cst_12 = arith.constant dense<0.000000e+00> : vector<400x6xf32>
    %15 = tpu.matmul %14, %0, %cst_12 {dimension_numbers = #tpu.dot_dimension_numbers<[1], [0], [0], [1], [0, 0, 1, 1], [], []>} : vector<400x128xbf16>, vector<128x6xbf16>, vector<400x6xf32> -> vector<400x6xf32>
    %16 = vector.shape_cast %15 : vector<400x6xf32> to vector<2x200x6xf32>
    %17 = arith.maximumf %11, %16 : vector<2x200x6xf32>
    %c0_13 = arith.constant 0 : index
    %c3 = arith.constant 3 : index
    %c0_14 = arith.constant 0 : index
    %c0_15 = arith.constant 0 : index
    %18 = vector.load %arg1[%c0_13, %c3, %c0_14, %c0_15] : memref<2x4x200x128xbf16, #tpu.memory_space<vmem>>, vector<2x1x200x128xbf16>
    %19 = vector.shape_cast %18 : vector<2x1x200x128xbf16> to vector<2x200x128xbf16>
    %20 = vector.shape_cast %19 : vector<2x200x128xbf16> to vector<400x128xbf16>
    %cst_16 = arith.constant dense<0.000000e+00> : vector<400x6xf32>
    %21 = tpu.matmul %20, %0, %cst_16 {dimension_numbers = #tpu.dot_dimension_numbers<[1], [0], [0], [1], [0, 0, 1, 1], [], []>} : vector<400x128xbf16>, vector<128x6xbf16>, vector<400x6xf32> -> vector<400x6xf32>
    %22 = vector.shape_cast %21 : vector<400x6xf32> to vector<2x200x6xf32>
    %23 = arith.maximumf %17, %22 : vector<2x200x6xf32>
    %c0_17 = arith.constant 0 : index
    %c0_18 = arith.constant 0 : index
    %24 = vector.load %arg3[%c0_17, %c0_18] : memref<1x6xf32, #tpu.memory_space<vmem>>, vector<1x6xf32>
    %25 = vector.shape_cast %24 : vector<1x6xf32> to vector<1x1x6xf32>
    %26 = vector.broadcast %25 : vector<1x1x6xf32> to vector<2x200x6xf32>
    %27 = arith.addf %23, %26 : vector<2x200x6xf32>
    %cst_19 = arith.constant 0.000000e+00 : f32
    %28 = vector.broadcast %cst_19 : f32 to vector<2x200x6xf32>
    %29 = arith.maximumf %27, %28 : vector<2x200x6xf32>
    %30 = arith.truncf %29 : vector<2x200x6xf32> to vector<2x200x6xbf16>
    %c0_20 = arith.constant 0 : index
    %c0_21 = arith.constant 0 : index
    %c0_22 = arith.constant 0 : index
    %31 = vector.load %arg4[%c0_20, %c0_21, %c0_22] : memref<2x200x6xbf16, #tpu.memory_space<vmem>>, vector<2x200x6xbf16>
    tpu.vector_store %arg4[%c0_20, %c0_21, %c0_22], %30 {strides = array<i32>} : memref<2x200x6xbf16, #tpu.memory_space<vmem>>, vector<2x200x6xbf16>,
    return
  }
  func.func @transform_0(%arg0: i32) -> (i32, i32, i32, i32) {
    %c0_i32 = arith.constant 0 : i32
    %c0_i32_0 = arith.constant 0 : i32
    %c0_i32_1 = arith.constant 0 : i32
    %c0_i32_2 = arith.constant 0 : i32
    return %arg0, %c0_i32, %c0_i32_0, %c0_i32_1 : i32, i32, i32, i32
  }
  func.func @transform_1(%arg0: i32) -> (i32, i32) {
    %c0_i32 = arith.constant 0 : i32
    %c0_i32_0 = arith.constant 0 : i32
    %c0_i32_1 = arith.constant 0 : i32
    return %c0_i32, %c0_i32_0 : i32, i32
  }
  func.func @transform_2(%arg0: i32) -> (i32, i32) {
    %c0_i32 = arith.constant 0 : i32
    %c0_i32_0 = arith.constant 0 : i32
    %c0_i32_1 = arith.constant 0 : i32
    return %c0_i32, %c0_i32_0 : i32, i32
  }
  func.func @transform_3(%arg0: i32) -> (i32, i32, i32) {
    %c0_i32 = arith.constant 0 : i32
    %c0_i32_0 = arith.constant 0 : i32
    %c0_i32_1 = arith.constant 0 : i32
    return %arg0, %c0_i32, %c0_i32_0 : i32, i32, i32
  }
}

module attributes {stable_mosaic.version = 11 : i64} {
  func.func @_conv_relu_pool_kernel(%arg0: i32, %arg1: memref<2x4x32x256xbf16, #tpu.memory_space<vmem>>, %arg2: memref<256x16xbf16, #tpu.memory_space<vmem>>, %arg3: memref<1x16xf32, #tpu.memory_space<vmem>>, %arg4: memref<2x32x16xbf16, #tpu.memory_space<vmem>>) attributes {dimension_semantics = [#tpu.dimension_semantics<parallel>], iteration_bounds = array<i64: 1>, scalar_prefetch = 0 : i64, scratch_operands = 0 : i64, tpu.core_type = #tpu.core_type<tc>, window_params = [{transform_indices = @transform_0, window_bounds = array<i64: 2, 4, 32, 256>}, {pipeline_mode = #tpu.pipeline_mode<synchronous>, transform_indices = @transform_1, window_bounds = array<i64: 256, 16>}, {pipeline_mode = #tpu.pipeline_mode<synchronous>, transform_indices = @transform_2, window_bounds = array<i64: 1, 16>}, {transform_indices = @transform_3, window_bounds = array<i64: 2, 32, 16>}]} {
    %c0 = arith.constant 0 : index
    %c0_0 = arith.constant 0 : index
    %0 = vector.load %arg2[%c0, %c0_0] : memref<256x16xbf16, #tpu.memory_space<vmem>>, vector<256x16xbf16>
    %c0_1 = arith.constant 0 : index
    %c0_2 = arith.constant 0 : index
    %c0_3 = arith.constant 0 : index
    %c0_4 = arith.constant 0 : index
    %1 = vector.load %arg1[%c0_1, %c0_2, %c0_3, %c0_4] : memref<2x4x32x256xbf16, #tpu.memory_space<vmem>>, vector<2x1x32x256xbf16>
    %2 = vector.shape_cast %1 : vector<2x1x32x256xbf16> to vector<2x32x256xbf16>
    %3 = vector.shape_cast %2 : vector<2x32x256xbf16> to vector<64x256xbf16>
    %cst = arith.constant dense<0.000000e+00> : vector<64x16xf32>
    %4 = tpu.matmul %3, %0, %cst {dimension_numbers = #tpu.dot_dimension_numbers<[1], [0], [0], [1], [0, 0, 1, 1], [], []>} : vector<64x256xbf16>, vector<256x16xbf16>, vector<64x16xf32> -> vector<64x16xf32>
    %5 = vector.shape_cast %4 : vector<64x16xf32> to vector<2x32x16xf32>
    %c0_5 = arith.constant 0 : index
    %c1 = arith.constant 1 : index
    %c0_6 = arith.constant 0 : index
    %c0_7 = arith.constant 0 : index
    %6 = vector.load %arg1[%c0_5, %c1, %c0_6, %c0_7] : memref<2x4x32x256xbf16, #tpu.memory_space<vmem>>, vector<2x1x32x256xbf16>
    %7 = vector.shape_cast %6 : vector<2x1x32x256xbf16> to vector<2x32x256xbf16>
    %8 = vector.shape_cast %7 : vector<2x32x256xbf16> to vector<64x256xbf16>
    %cst_8 = arith.constant dense<0.000000e+00> : vector<64x16xf32>
    %9 = tpu.matmul %8, %0, %cst_8 {dimension_numbers = #tpu.dot_dimension_numbers<[1], [0], [0], [1], [0, 0, 1, 1], [], []>} : vector<64x256xbf16>, vector<256x16xbf16>, vector<64x16xf32> -> vector<64x16xf32>
    %10 = vector.shape_cast %9 : vector<64x16xf32> to vector<2x32x16xf32>
    %11 = arith.maximumf %5, %10 : vector<2x32x16xf32>
    %c0_9 = arith.constant 0 : index
    %c2 = arith.constant 2 : index
    %c0_10 = arith.constant 0 : index
    %c0_11 = arith.constant 0 : index
    %12 = vector.load %arg1[%c0_9, %c2, %c0_10, %c0_11] : memref<2x4x32x256xbf16, #tpu.memory_space<vmem>>, vector<2x1x32x256xbf16>
    %13 = vector.shape_cast %12 : vector<2x1x32x256xbf16> to vector<2x32x256xbf16>
    %14 = vector.shape_cast %13 : vector<2x32x256xbf16> to vector<64x256xbf16>
    %cst_12 = arith.constant dense<0.000000e+00> : vector<64x16xf32>
    %15 = tpu.matmul %14, %0, %cst_12 {dimension_numbers = #tpu.dot_dimension_numbers<[1], [0], [0], [1], [0, 0, 1, 1], [], []>} : vector<64x256xbf16>, vector<256x16xbf16>, vector<64x16xf32> -> vector<64x16xf32>
    %16 = vector.shape_cast %15 : vector<64x16xf32> to vector<2x32x16xf32>
    %17 = arith.maximumf %11, %16 : vector<2x32x16xf32>
    %c0_13 = arith.constant 0 : index
    %c3 = arith.constant 3 : index
    %c0_14 = arith.constant 0 : index
    %c0_15 = arith.constant 0 : index
    %18 = vector.load %arg1[%c0_13, %c3, %c0_14, %c0_15] : memref<2x4x32x256xbf16, #tpu.memory_space<vmem>>, vector<2x1x32x256xbf16>
    %19 = vector.shape_cast %18 : vector<2x1x32x256xbf16> to vector<2x32x256xbf16>
    %20 = vector.shape_cast %19 : vector<2x32x256xbf16> to vector<64x256xbf16>
    %cst_16 = arith.constant dense<0.000000e+00> : vector<64x16xf32>
    %21 = tpu.matmul %20, %0, %cst_16 {dimension_numbers = #tpu.dot_dimension_numbers<[1], [0], [0], [1], [0, 0, 1, 1], [], []>} : vector<64x256xbf16>, vector<256x16xbf16>, vector<64x16xf32> -> vector<64x16xf32>
    %22 = vector.shape_cast %21 : vector<64x16xf32> to vector<2x32x16xf32>
    %23 = arith.maximumf %17, %22 : vector<2x32x16xf32>
    %c0_17 = arith.constant 0 : index
    %c0_18 = arith.constant 0 : index
    %24 = vector.load %arg3[%c0_17, %c0_18] : memref<1x16xf32, #tpu.memory_space<vmem>>, vector<1x16xf32>
    %25 = vector.shape_cast %24 : vector<1x16xf32> to vector<1x1x16xf32>
    %26 = vector.broadcast %25 : vector<1x1x16xf32> to vector<2x32x16xf32>
    %27 = arith.addf %23, %26 : vector<2x32x16xf32>
    %cst_19 = arith.constant 0.000000e+00 : f32
    %28 = vector.broadcast %cst_19 : f32 to vector<2x32x16xf32>
    %29 = arith.maximumf %27, %28 : vector<2x32x16xf32>
    %30 = arith.truncf %29 : vector<2x32x16xf32> to vector<2x32x16xbf16>
    %c0_20 = arith.constant 0 : index
    %c0_21 = arith.constant 0 : index
    %c0_22 = arith.constant 0 : index
    %31 = vector.load %arg4[%c0_20, %c0_21, %c0_22] : memref<2x32x16xbf16, #tpu.memory_space<vmem>>, vector<2x32x16xbf16>
    tpu.vector_store %arg4[%c0_20, %c0_21, %c0_22], %30 {strides = array<i32>} : memref<2x32x16xbf16, #tpu.memory_space<vmem>>, vector<2x32x16xbf16>,
    return
  }
  func.func @transform_0(%arg0: i32) -> (i32, i32, i32, i32) {
    %c0_i32 = arith.constant 0 : i32
    %c0_i32_0 = arith.constant 0 : i32
    %c0_i32_1 = arith.constant 0 : i32
    %c0_i32_2 = arith.constant 0 : i32
    return %arg0, %c0_i32, %c0_i32_0, %c0_i32_1 : i32, i32, i32, i32
  }
  func.func @transform_1(%arg0: i32) -> (i32, i32) {
    %c0_i32 = arith.constant 0 : i32
    %c0_i32_0 = arith.constant 0 : i32
    %c0_i32_1 = arith.constant 0 : i32
    return %c0_i32, %c0_i32_0 : i32, i32
  }
  func.func @transform_2(%arg0: i32) -> (i32, i32) {
    %c0_i32 = arith.constant 0 : i32
    %c0_i32_0 = arith.constant 0 : i32
    %c0_i32_1 = arith.constant 0 : i32
    return %c0_i32, %c0_i32_0 : i32, i32
  }
  func.func @transform_3(%arg0: i32) -> (i32, i32, i32) {
    %c0_i32 = arith.constant 0 : i32
    %c0_i32_0 = arith.constant 0 : i32
    %c0_i32_1 = arith.constant 0 : i32
    return %arg0, %c0_i32, %c0_i32_0 : i32, i32, i32
  }
}

module attributes {stable_mosaic.version = 11 : i64} {
  func.func @_fc_fused_kernel(%arg0: i32, %arg1: memref<2x512xbf16, #tpu.memory_space<vmem>>, %arg2: memref<512x128xbf16, #tpu.memory_space<vmem>>, %arg3: memref<1x128xf32, #tpu.memory_space<vmem>>, %arg4: memref<128x128xbf16, #tpu.memory_space<vmem>>, %arg5: memref<1x128xf32, #tpu.memory_space<vmem>>, %arg6: memref<128x128xbf16, #tpu.memory_space<vmem>>, %arg7: memref<1x128xf32, #tpu.memory_space<vmem>>, %arg8: memref<2x128xf32, #tpu.memory_space<vmem>>) attributes {dimension_semantics = [#tpu.dimension_semantics<parallel>], iteration_bounds = array<i64: 1>, scalar_prefetch = 0 : i64, scratch_operands = 0 : i64, tpu.core_type = #tpu.core_type<tc>, window_params = [{transform_indices = @transform_0, window_bounds = array<i64: 2, 512>}, {pipeline_mode = #tpu.pipeline_mode<synchronous>, transform_indices = @transform_1, window_bounds = array<i64: 512, 128>}, {pipeline_mode = #tpu.pipeline_mode<synchronous>, transform_indices = @transform_2, window_bounds = array<i64: 1, 128>}, {pipeline_mode = #tpu.pipeline_mode<synchronous>, transform_indices = @transform_3, window_bounds = array<i64: 128, 128>}, {pipeline_mode = #tpu.pipeline_mode<synchronous>, transform_indices = @transform_4, window_bounds = array<i64: 1, 128>}, {pipeline_mode = #tpu.pipeline_mode<synchronous>, transform_indices = @transform_5, window_bounds = array<i64: 128, 128>}, {pipeline_mode = #tpu.pipeline_mode<synchronous>, transform_indices = @transform_6, window_bounds = array<i64: 1, 128>}, {transform_indices = @transform_7, window_bounds = array<i64: 2, 128>}]} {
    %c0 = arith.constant 0 : index
    %c0_0 = arith.constant 0 : index
    %0 = vector.load %arg1[%c0, %c0_0] : memref<2x512xbf16, #tpu.memory_space<vmem>>, vector<2x512xbf16>
    %c0_1 = arith.constant 0 : index
    %c0_2 = arith.constant 0 : index
    %1 = vector.load %arg2[%c0_1, %c0_2] : memref<512x128xbf16, #tpu.memory_space<vmem>>, vector<512x128xbf16>
    %cst = arith.constant dense<0.000000e+00> : vector<2x128xf32>
    %2 = tpu.matmul %0, %1, %cst {dimension_numbers = #tpu.dot_dimension_numbers<[1], [0], [0], [1], [0, 0, 1, 1], [], []>} : vector<2x512xbf16>, vector<512x128xbf16>, vector<2x128xf32> -> vector<2x128xf32>
    %c0_3 = arith.constant 0 : index
    %c0_4 = arith.constant 0 : index
    %3 = vector.load %arg3[%c0_3, %c0_4] : memref<1x128xf32, #tpu.memory_space<vmem>>, vector<1x128xf32>
    %4 = vector.broadcast %3 : vector<1x128xf32> to vector<2x128xf32>
    %5 = arith.addf %2, %4 : vector<2x128xf32>
    %cst_5 = arith.constant 0.000000e+00 : f32
    %6 = vector.broadcast %cst_5 : f32 to vector<2x128xf32>
    %7 = arith.maximumf %5, %6 : vector<2x128xf32>
    %8 = arith.truncf %7 : vector<2x128xf32> to vector<2x128xbf16>
    %c0_6 = arith.constant 0 : index
    %c0_7 = arith.constant 0 : index
    %9 = vector.load %arg4[%c0_6, %c0_7] : memref<128x128xbf16, #tpu.memory_space<vmem>>, vector<128x128xbf16>
    %cst_8 = arith.constant dense<0.000000e+00> : vector<2x128xf32>
    %10 = tpu.matmul %8, %9, %cst_8 {dimension_numbers = #tpu.dot_dimension_numbers<[1], [0], [0], [1], [0, 0, 1, 1], [], []>} : vector<2x128xbf16>, vector<128x128xbf16>, vector<2x128xf32> -> vector<2x128xf32>
    %c0_9 = arith.constant 0 : index
    %c0_10 = arith.constant 0 : index
    %11 = vector.load %arg5[%c0_9, %c0_10] : memref<1x128xf32, #tpu.memory_space<vmem>>, vector<1x128xf32>
    %12 = vector.broadcast %11 : vector<1x128xf32> to vector<2x128xf32>
    %13 = arith.addf %10, %12 : vector<2x128xf32>
    %cst_11 = arith.constant 0.000000e+00 : f32
    %14 = vector.broadcast %cst_11 : f32 to vector<2x128xf32>
    %15 = arith.maximumf %13, %14 : vector<2x128xf32>
    %16 = arith.truncf %15 : vector<2x128xf32> to vector<2x128xbf16>
    %c0_12 = arith.constant 0 : index
    %c0_13 = arith.constant 0 : index
    %17 = vector.load %arg6[%c0_12, %c0_13] : memref<128x128xbf16, #tpu.memory_space<vmem>>, vector<128x128xbf16>
    %cst_14 = arith.constant dense<0.000000e+00> : vector<2x128xf32>
    %18 = tpu.matmul %16, %17, %cst_14 {dimension_numbers = #tpu.dot_dimension_numbers<[1], [0], [0], [1], [0, 0, 1, 1], [], []>} : vector<2x128xbf16>, vector<128x128xbf16>, vector<2x128xf32> -> vector<2x128xf32>
    %c0_15 = arith.constant 0 : index
    %c0_16 = arith.constant 0 : index
    %19 = vector.load %arg7[%c0_15, %c0_16] : memref<1x128xf32, #tpu.memory_space<vmem>>, vector<1x128xf32>
    %20 = vector.broadcast %19 : vector<1x128xf32> to vector<2x128xf32>
    %21 = arith.addf %18, %20 : vector<2x128xf32>
    %c0_17 = arith.constant 0 : index
    %c0_18 = arith.constant 0 : index
    %22 = vector.load %arg8[%c0_17, %c0_18] : memref<2x128xf32, #tpu.memory_space<vmem>>, vector<2x128xf32>
    tpu.vector_store %arg8[%c0_17, %c0_18], %21 {strides = array<i32>} : memref<2x128xf32, #tpu.memory_space<vmem>>, vector<2x128xf32>,
    return
  }
  func.func @transform_0(%arg0: i32) -> (i32, i32) {
    %c0_i32 = arith.constant 0 : i32
    %c0_i32_0 = arith.constant 0 : i32
    return %arg0, %c0_i32 : i32, i32
  }
  func.func @transform_1(%arg0: i32) -> (i32, i32) {
    %c0_i32 = arith.constant 0 : i32
    %c0_i32_0 = arith.constant 0 : i32
    %c0_i32_1 = arith.constant 0 : i32
    return %c0_i32, %c0_i32_0 : i32, i32
  }
  func.func @transform_2(%arg0: i32) -> (i32, i32) {
    %c0_i32 = arith.constant 0 : i32
    %c0_i32_0 = arith.constant 0 : i32
    %c0_i32_1 = arith.constant 0 : i32
    return %c0_i32, %c0_i32_0 : i32, i32
  }
  func.func @transform_3(%arg0: i32) -> (i32, i32) {
    %c0_i32 = arith.constant 0 : i32
    %c0_i32_0 = arith.constant 0 : i32
    %c0_i32_1 = arith.constant 0 : i32
    return %c0_i32, %c0_i32_0 : i32, i32
  }
  func.func @transform_4(%arg0: i32) -> (i32, i32) {
    %c0_i32 = arith.constant 0 : i32
    %c0_i32_0 = arith.constant 0 : i32
    %c0_i32_1 = arith.constant 0 : i32
    return %c0_i32, %c0_i32_0 : i32, i32
  }
  func.func @transform_5(%arg0: i32) -> (i32, i32) {
    %c0_i32 = arith.constant 0 : i32
    %c0_i32_0 = arith.constant 0 : i32
    %c0_i32_1 = arith.constant 0 : i32
    return %c0_i32, %c0_i32_0 : i32, i32
  }
  func.func @transform_6(%arg0: i32) -> (i32, i32) {
    %c0_i32 = arith.constant 0 : i32
    %c0_i32_0 = arith.constant 0 : i32
    %c0_i32_1 = arith.constant 0 : i32
    return %c0_i32, %c0_i32_0 : i32, i32
  }
  func.func @transform_7(%arg0: i32) -> (i32, i32) {
    %c0_i32 = arith.constant 0 : i32
    %c0_i32_0 = arith.constant 0 : i32
    return %arg0, %c0_i32 : i32, i32
  }
}

</mosaic_0001>

<bundles_post_ra>
// kernel: net_forward.3
= control target key start
LH: loop header
LB: loop body
LE: loop exit
PB: predicated region body
PF: predicated region fallthrough
CT: control target
= control target key end

     0   :  { %v4680_v0 = vmov 0.0   ;;  %vm3394_vm0 = vmmov 0   ;;  %vm2273_vm1 = vcmask 44032   ;;  %s4676_s1 = inlined_call_operand.vmem [shape: bf16[128,6], index: 1, kind: input, shape index: {}]   ;;  %s4677_s0 = inlined_call_operand.vmem [shape: bf16[2,4,200,128], index: 0, kind: input, shape index: {}]   ;;  %s4678_s2 = inlined_call_operand.vmem [shape: f32[1,6], index: 2, kind: input, shape index: {}]   ;;  %s4679_s3 = inlined_call_operand.vmem [shape: bf16[2,200,6], index: 3, kind: output, shape index: {}]  }
   0x1   :  { %2819 = vmatprep.subr.bf16.mxu0 %v4680_v0  ;;  %2935 = vmatprep.subr.bf16.mxu1 %v4680_v0  ;;  %v3285_v1 = vld [vmem:[%s4676_s1] sm:$0xff]   ;;  %v3286_v2 = vld [vmem:[%s4676_s1 + $0x8] sm:$0xff]   ;;  %v3287_v3 = vld [vmem:[%s4676_s1 + $0x10] sm:$0xff]  }
   0x2   :  { %2835 = vmatprep.mubr.msk.bf16.mxu0 %vm3394_vm0, %v4680_v0  ;;  %2951 = vmatprep.mubr.msk.bf16.mxu1 %vm3394_vm0, %v4680_v0  ;;  %v3288_v4 = vld [vmem:[%s4676_s1 + $0x18] sm:$0xff]   ;;  %v3289_v5 = vld [vmem:[%s4676_s1 + $0x20] sm:$0xff]   ;;  %v3290_v6 = vld [vmem:[%s4676_s1 + $0x28] sm:$0xff]  }
   0x3   :  { %2820 = vmatpush3.bf16.msra.mxu0 %v3285_v1  ;;  %2936 = vmatpush3.bf16.msra.mxu1 %v3285_v1  ;;  %v3291_v7 = vld [vmem:[%s4676_s1 + $0x30] sm:$0xff]   ;;  %v3292_v8 = vld [vmem:[%s4676_s1 + $0x38] sm:$0xff]   ;;  %v3293_v9 = vld [vmem:[%s4677_s0] sm:$0xff]  }
   0x4   :  { %2821 = vmatprep.subr.bf16.mxu0 %v4680_v0  ;;  %2937 = vmatprep.subr.bf16.mxu1 %v4680_v0  ;;  %v3294_v10 = vld [vmem:[%s4677_s0 + $0x64] sm:$0xff]   ;;  %v3296_v12 = vld [vmem:[%s4677_s0 + $0x6c] sm:$0xff]   ;;  %v3298_v14 = vld [vmem:[%s4677_s0 + $0x74] sm:$0xff]  }
   0x5   :  { %v3295_v11 = vld [vmem:[%s4677_s0 + $0x8] sm:$0xff]   ;;  %v3297_v13 = vld [vmem:[%s4677_s0 + $0x10] sm:$0xff]   ;;  %v3299_v15 = vld [vmem:[%s4677_s0 + $0x18] sm:$0xff]  }
   0x6   :  { %v3300_v16 = vld [vmem:[%s4677_s0 + $0x7c] sm:$0xff]   ;;  %v3302_v18 = vld [vmem:[%s4677_s0 + $0x84] sm:$0xff]   ;;  %v3304_v20 = vld [vmem:[%s4677_s0 + $0x8c] sm:$0xff]  }
   0x7   :  { %2822 = vmatpush3.bf16.msra.mxu0 %v3286_v2  ;;  %2938 = vmatpush3.bf16.msra.mxu1 %v3286_v2  ;;  %v3301_v17 = vld [vmem:[%s4677_s0 + $0x20] sm:$0xff]   ;;  %v3303_v19 = vld [vmem:[%s4677_s0 + $0x28] sm:$0xff]   ;;  %v3305_v21 = vld [vmem:[%s4677_s0 + $0x30] sm:$0xff]  }
   0x8   :  { %2823 = vmatprep.subr.bf16.mxu0 %v4680_v0  ;;  %2939 = vmatprep.subr.bf16.mxu1 %v4680_v0  ;;  %v3306_v22 = vld [vmem:[%s4677_s0 + $0x94] sm:$0xff]   ;;  %v3308_v24 = vld [vmem:[%s4677_s0 + $0x9c] sm:$0xff]   ;;  %v3310_v26 = vld [vmem:[%s4677_s0 + $0xa4] sm:$0xff]  }
   0x9   :  { %v3307_v23 = vld [vmem:[%s4677_s0 + $0x38] sm:$0xff]   ;;  %v3309_v25 = vld [vmem:[%s4677_s0 + $0x40] sm:$0xff]   ;;  %v3311_v27 = vld [vmem:[%s4677_s0 + $0x48] sm:$0xff]  }
   0xa   :  { %v3312_v28 = vld [vmem:[%s4677_s0 + $0xac] sm:$0xff]   ;;  %v3314_v30 = vld [vmem:[%s4677_s0 + $0xb4] sm:$0xff]   ;;  %v3316_v32 = vld [vmem:[%s4677_s0 + $0xbc] sm:$0xff]  }
   0xb   :  { %2824 = vmatpush3.bf16.msra.mxu0 %v3287_v3  ;;  %2940 = vmatpush3.bf16.msra.mxu1 %v3287_v3  ;;  %v3313_v29 = vld [vmem:[%s4677_s0 + $0x50] sm:$0xff]   ;;  %v3315_v31 = vld [vmem:[%s4677_s0 + $0x58] sm:$0xff]   ;;  %v3322_v38 = vld [vmem:[%s4677_s0 + $0x200] sm:$0xff]  }
   0xc   :  { %2825 = vmatprep.subr.bf16.mxu0 %v4680_v0  ;;  %2941 = vmatprep.subr.bf16.mxu1 %v4680_v0  ;;  %v3317_v33 = vld [vmem:[%s4677_s0 + $0x60] ss:$304 sps:$4 sm:$0xff]   ;;  %v3318_v34 = vld [vmem:[%s4677_s0 + $0xc4] ss:$304 sps:$4 sm:$0xff]   ;;  %v3320_v36 = vld [vmem:[%s4677_s0 + $0x1f8] sm:$0xff]  }
   0xd   :  { %v3319_v35 = vld [vmem:[%s4677_s0 + $0x194] sm:$0xff]   ;;  %v3321_v37 = vld [vmem:[%s4677_s0 + $0x19c] sm:$0xff]   ;;  %v3323_v39 = vld [vmem:[%s4677_s0 + $0x1a4] sm:$0xff]  }
   0xe   :  { %v3324_v40 = vld [vmem:[%s4677_s0 + $0x208] sm:$0xff]   ;;  %v3326_v42 = vld [vmem:[%s4677_s0 + $0x210] sm:$0xff]   ;;  %v3328_v44 = vld [vmem:[%s4677_s0 + $0x218] sm:$0xff]  }
   0xf   :  { %2826 = vmatpush3.bf16.msra.mxu0 %v3288_v4  ;;  %2942 = vmatpush3.bf16.msra.mxu1 %v3288_v4  ;;  %v3325_v41 = vld [vmem:[%s4677_s0 + $0x1ac] sm:$0xff]   ;;  %v3327_v43 = vld [vmem:[%s4677_s0 + $0x1b4] sm:$0xff]   ;;  %v3329_v45 = vld [vmem:[%s4677_s0 + $0x1bc] sm:$0xff]  }
  0x10   :  { %2827 = vmatprep.subr.bf16.mxu0 %v4680_v0  ;;  %2943 = vmatprep.subr.bf16.mxu1 %v4680_v0  ;;  %v3330_v46 = vld [vmem:[%s4677_s0 + $0x220] sm:$0xff]   ;;  %v3332_v48 = vld [vmem:[%s4677_s0 + $0x228] sm:$0xff]   ;;  %v3334_v50 = vld [vmem:[%s4677_s0 + $0x230] sm:$0xff]  }
  0x11   :  { %v3331_v47 = vld [vmem:[%s4677_s0 + $0x1c4] sm:$0xff]   ;;  %v3333_v49 = vld [vmem:[%s4677_s0 + $0x1cc] sm:$0xff]   ;;  %v3335_v51 = vld [vmem:[%s4677_s0 + $0x1d4] sm:$0xff]  }
  0x12   :  { %v3336_v52 = vld [vmem:[%s4677_s0 + $0x238] sm:$0xff]   ;;  %v3338_v54 = vld [vmem:[%s4677_s0 + $0x240] sm:$0xff]   ;;  %v3340_v56 = vld [vmem:[%s4677_s0 + $0x248] sm:$0xff]  }
  0x13   :  { %2828 = vmatpush3.bf16.msra.mxu0 %v3289_v5  ;;  %2944 = vmatpush3.bf16.msra.mxu1 %v3289_v5  ;;  %v3337_v53 = vld [vmem:[%s4677_s0 + $0x1dc] sm:$0xff]   ;;  %v3339_v55 = vld [vmem:[%s4677_s0 + $0x1e4] sm:$0xff]   ;;  %v3341_v57 = vld [vmem:[%s4677_s0 + $0x1ec] sm:$0xff]  }
  0x14   :  { %2829 = vmatprep.subr.bf16.mxu0 %v4680_v0  ;;  %2945 = vmatprep.subr.bf16.mxu1 %v4680_v0  ;;  %v3342_v58 = vld [vmem:[%s4677_s0 + $0x250] sm:$0xff]   ;;  %v3343_v59 = vld [vmem:[%s4677_s0 + $0xc8] sm:$0xff]  }
  0x15   :  { %v3344_v60 = vld [vmem:[%s4677_s0 + $0x12c] sm:$0xff]   ;;  %v3346_v62 = vld [vmem:[%s4677_s0 + $0x134] sm:$0xff]  }
  0x16   :  { %v3345_v61 = vld [vmem:[%s4677_s0 + $0xd0] sm:$0xff]  }
  0x17   :  { %2830 = vmatpush3.bf16.msra.mxu0 %v3290_v6  ;;  %2946 = vmatpush3.bf16.msra.mxu1 %v3290_v6 }
  0x18   :  { %2831 = vmatprep.subr.bf16.mxu0 %v4680_v0  ;;  %2947 = vmatprep.subr.bf16.mxu1 %v4680_v0 }
  0x1b   :  { %2832 = vmatpush3.bf16.msra.mxu0 %v3291_v7  ;;  %2948 = vmatpush3.bf16.msra.mxu1 %v3291_v7 }
  0x1c   :  { %2833 = vmatprep.subr.bf16.mxu0 %v4680_v0  ;;  %2949 = vmatprep.subr.bf16.mxu1 %v4680_v0 }
  0x1f   :  { %2834 = vmatpush3.bf16.msra.mxu0 %v3292_v8  ;;  %2950 = vmatpush3.bf16.msra.mxu1 %v3292_v8 }
  0x20   :  { %3051 = vmatprep.subr.bf16.mxu0 %v4680_v0  ;;  %3167 = vmatprep.subr.bf16.mxu1 %v4680_v0 }
  0x22   :  { %2836 = vmatmul.mubr.bf16.vlgmr.msra.gmra.mrb[0].mxu0 %v3293_v9  ;;  %2952 = vmatmul.mubr.bf16.vlgmr.msra.gmra.mrb[0].mxu1 %v3294_v10 }
  0x23   :  { %3052 = vmatpush3.bf16.msra.mxu0 %v3285_v1  ;;  %3168 = vmatpush3.bf16.msra.mxu1 %v3285_v1 }
  0x24   :  { %2839 = vmatprep.mubr.msk.bf16.mxu0 %vm3394_vm0, %v4680_v0  ;;  %2955 = vmatprep.mubr.msk.bf16.mxu1 %vm3394_vm0, %v4680_v0 }
  0x25   :  { %3053 = vmatprep.subr.bf16.mxu0 %v4680_v0  ;;  %3169 = vmatprep.subr.bf16.mxu1 %v4680_v0 }
  0x27   :  { %3054 = vmatpush3.bf16.msra.mxu0 %v3286_v2  ;;  %3170 = vmatpush3.bf16.msra.mxu1 %v3286_v2 }
  0x28   :  { %3055 = vmatprep.subr.bf16.mxu0 %v4680_v0  ;;  %3171 = vmatprep.subr.bf16.mxu1 %v4680_v0 }
  0x2a   :  { %2840 = vmatmul.mubr.bf16.gmra.mrb[4].mxu0 %v3295_v11  ;;  %2956 = vmatmul.mubr.bf16.gmra.mrb[4].mxu1 %v3296_v12 }
  0x2b   :  { %2843 = vmatprep.mubr.msk.bf16.mxu0 %vm3394_vm0, %v4680_v0  ;;  %2959 = vmatprep.mubr.msk.bf16.mxu1 %vm3394_vm0, %v4680_v0 }
  0x2c   :  { %3056 = vmatpush3.bf16.msra.mxu0 %v3287_v3  ;;  %3172 = vmatpush3.bf16.msra.mxu1 %v3287_v3 }
  0x2d   :  { %3057 = vmatprep.subr.bf16.mxu0 %v4680_v0  ;;  %3173 = vmatprep.subr.bf16.mxu1 %v4680_v0 }
  0x30   :  { %3058 = vmatpush3.bf16.msra.mxu0 %v3288_v4  ;;  %3174 = vmatpush3.bf16.msra.mxu1 %v3288_v4 }
  0x31   :  { %3059 = vmatprep.subr.bf16.mxu0 %v4680_v0  ;;  %3175 = vmatprep.subr.bf16.mxu1 %v4680_v0 }
  0x32   :  { %2844 = vmatmul.mubr.bf16.gmra.mrb[8].mxu0 %v3297_v13  ;;  %2960 = vmatmul.mubr.bf16.gmra.mrb[8].mxu1 %v3298_v14 }
  0x33   :  { %2847 = vmatprep.mubr.msk.bf16.mxu0 %vm3394_vm0, %v4680_v0  ;;  %2963 = vmatprep.mubr.msk.bf16.mxu1 %vm3394_vm0, %v4680_v0 }
  0x34   :  { %3060 = vmatpush3.bf16.msra.mxu0 %v3289_v5  ;;  %3176 = vmatpush3.bf16.msra.mxu1 %v3289_v5  ;;  %v3347_v5 = vld [vmem:[%s4677_s0 + $0xd8] sm:$0xff]  }
  0x35   :  { %3061 = vmatprep.subr.bf16.mxu0 %v4680_v0  ;;  %3177 = vmatprep.subr.bf16.mxu1 %v4680_v0 }
  0x38   :  { %3062 = vmatpush3.bf16.msra.mxu0 %v3290_v6  ;;  %3178 = vmatpush3.bf16.msra.mxu1 %v3290_v6  ;;  %v3348_v6 = vld [vmem:[%s4677_s0 + $0x13c] sm:$0xff]  }
  0x39   :  { %3063 = vmatprep.subr.bf16.mxu0 %v4680_v0  ;;  %3179 = vmatprep.subr.bf16.mxu1 %v4680_v0 }
  0x3a   :  { %2848 = vmatmul.mubr.bf16.gmra.mrb[12].mxu0 %v3299_v15  ;;  %2964 = vmatmul.mubr.bf16.gmra.mrb[12].mxu1 %v3300_v16 }
  0x3b   :  { %2851 = vmatprep.mubr.msk.bf16.mxu0 %vm3394_vm0, %v4680_v0  ;;  %2967 = vmatprep.mubr.msk.bf16.mxu1 %vm3394_vm0, %v4680_v0 }
  0x3c   :  { %3064 = vmatpush3.bf16.msra.mxu0 %v3291_v7  ;;  %3180 = vmatpush3.bf16.msra.mxu1 %v3291_v7 }
  0x3d   :  { %3065 = vmatprep.subr.bf16.mxu0 %v4680_v0  ;;  %3181 = vmatprep.subr.bf16.mxu1 %v4680_v0 }
  0x40   :  { %3066 = vmatpush3.bf16.msra.mxu0 %v3292_v8  ;;  %3182 = vmatpush3.bf16.msra.mxu1 %v3292_v8 }
  0x42   :  { %2852 = vmatmul.mubr.bf16.gmra.mrb[16].mxu0 %v3301_v17  ;;  %2968 = vmatmul.mubr.bf16.gmra.mrb[16].mxu1 %v3302_v18  ;;  %v3349_v17 = vld [vmem:[%s4677_s0 + $0xe0] sm:$0xff]  }
  0x43   :  { %2855 = vmatprep.mubr.msk.bf16.mxu0 %vm3394_vm0, %v4680_v0  ;;  %2971 = vmatprep.mubr.msk.bf16.mxu1 %vm3394_vm0, %v4680_v0  ;;  %v3350_v18 = vld [vmem:[%s4677_s0 + $0x144] sm:$0xff]  }
  0x4a   :  { %2856 = vmatmul.mubr.bf16.gmra.mrb[20].mxu0 %v3303_v19  ;;  %2972 = vmatmul.mubr.bf16.gmra.mrb[20].mxu1 %v3304_v20 }
  0x4b   :  { %2859 = vmatprep.mubr.msk.bf16.mxu0 %vm3394_vm0, %v4680_v0  ;;  %2975 = vmatprep.mubr.msk.bf16.mxu1 %vm3394_vm0, %v4680_v0 }
  0x52   :  { %2860 = vmatmul.mubr.bf16.gmra.mrb[24].mxu0 %v3305_v21  ;;  %2976 = vmatmul.mubr.bf16.gmra.mrb[24].mxu1 %v3306_v22 }
  0x53   :  { %2863 = vmatprep.mubr.msk.bf16.mxu0 %vm3394_vm0, %v4680_v0  ;;  %2979 = vmatprep.mubr.msk.bf16.mxu1 %vm3394_vm0, %v4680_v0 }
  0x5a   :  { %2864 = vmatmul.mubr.bf16.gmra.mrb[28].mxu0 %v3307_v23  ;;  %2980 = vmatmul.mubr.bf16.gmra.mrb[28].mxu1 %v3308_v24 }
  0x5b   :  { %2867 = vmatprep.mubr.msk.bf16.mxu0 %vm3394_vm0, %v4680_v0  ;;  %2983 = vmatprep.mubr.msk.bf16.mxu1 %vm3394_vm0, %v4680_v0 }
  0x62   :  { %2868 = vmatmul.mubr.bf16.gmra.mrb[32].mxu0 %v3309_v25  ;;  %2984 = vmatmul.mubr.bf16.gmra.mrb[32].mxu1 %v3310_v26 }
  0x63   :  { %2871 = vmatprep.mubr.msk.bf16.mxu0 %vm3394_vm0, %v4680_v0  ;;  %2987 = vmatprep.mubr.msk.bf16.mxu1 %vm3394_vm0, %v4680_v0 }
  0x6a   :  { %2872 = vmatmul.mubr.bf16.gmra.mrb[36].mxu0 %v3311_v27  ;;  %2988 = vmatmul.mubr.bf16.gmra.mrb[36].mxu1 %v3312_v28 }
  0x6b   :  { %2875 = vmatprep.mubr.msk.bf16.mxu0 %vm3394_vm0, %v4680_v0  ;;  %2991 = vmatprep.mubr.msk.bf16.mxu1 %vm3394_vm0, %v4680_v0 }
  0x72   :  { %2876 = vmatmul.mubr.bf16.gmra.mrb[40].mxu0 %v3313_v29  ;;  %2992 = vmatmul.mubr.bf16.gmra.mrb[40].mxu1 %v3314_v30  ;;  %v3351_v29 = vld [vmem:[%s4677_s0 + $0xe8] sm:$0xff]  }
  0x73   :  { %2879 = vmatprep.mubr.msk.bf16.mxu0 %vm3394_vm0, %v4680_v0  ;;  %2995 = vmatprep.mubr.msk.bf16.mxu1 %vm3394_vm0, %v4680_v0  ;;  %v3352_v30 = vld [vmem:[%s4677_s0 + $0x14c] sm:$0xff]  }
  0x7a   :  { %2880 = vmatmul.mubr.bf16.gmra.mrb[44].mxu0 %v3315_v31  ;;  %2996 = vmatmul.mubr.bf16.gmra.mrb[44].mxu1 %v3316_v32 }
  0x7b   :  { %2883 = vmatprep.mubr.msk.bf16.mxu0 %vm3394_vm0, %v4680_v0  ;;  %2999 = vmatprep.mubr.msk.bf16.mxu1 %vm3394_vm0, %v4680_v0 }
  0x82   :  { %2884 = vmatmul.mubr.bf16.gmra.mrb[48].mxu0 %v3317_v33  ;;  %3000 = vmatmul.mubr.bf16.gmra.mrb[48].mxu1 %v3318_v34 }
  0x83   :  { %2887 = vmatprep.mubr.msk.bf16.mxu0 %vm3394_vm0, %v4680_v0  ;;  %3003 = vmatprep.mubr.msk.bf16.mxu1 %vm3394_vm0, %v4680_v0 }
  0x8a   :  { %2888 = vmatmul.mubr.bf16.gmra.mrb[52].mxu0 %v3319_v35  ;;  %3004 = vmatmul.mubr.bf16.gmra.mrb[52].mxu1 %v3320_v36 }
  0x8b   :  { %2891 = vmatprep.mubr.msk.bf16.mxu0 %vm3394_vm0, %v4680_v0  ;;  %3007 = vmatprep.mubr.msk.bf16.mxu1 %vm3394_vm0, %v4680_v0 }
  0x92   :  { %2892 = vmatmul.mubr.bf16.gmra.mrb[56].mxu0 %v3321_v37  ;;  %3008 = vmatmul.mubr.bf16.gmra.mrb[56].mxu1 %v3322_v38 }
  0x93   :  { %2895 = vmatprep.mubr.msk.bf16.mxu0 %vm3394_vm0, %v4680_v0  ;;  %3011 = vmatprep.mubr.msk.bf16.mxu1 %vm3394_vm0, %v4680_v0 }
  0x9a   :  { %2896 = vmatmul.mubr.bf16.gmra.mrb[60].mxu0 %v3323_v39  ;;  %3012 = vmatmul.mubr.bf16.gmra.mrb[60].mxu1 %v3324_v40 }
  0x9b   :  { %2899 = vmatprep.mubr.msk.bf16.mxu0 %vm3394_vm0, %v4680_v0  ;;  %3015 = vmatprep.mubr.msk.bf16.mxu1 %vm3394_vm0, %v4680_v0 }
  0xa2   :  { %2900 = vmatmul.mubr.bf16.gmra.mrb[64].mxu0 %v3325_v41  ;;  %3016 = vmatmul.mubr.bf16.gmra.mrb[64].mxu1 %v3326_v42  ;;  %v3353_v41 = vld [vmem:[%s4677_s0 + $0xf0] sm:$0xff]  }
  0xa3   :  { %2903 = vmatprep.mubr.msk.bf16.mxu0 %vm3394_vm0, %v4680_v0  ;;  %3019 = vmatprep.mubr.msk.bf16.mxu1 %vm3394_vm0, %v4680_v0  ;;  %v3354_v42 = vld [vmem:[%s4677_s0 + $0x154] sm:$0xff]  }
  0xaa   :  { %2904 = vmatmul.mubr.bf16.gmra.mrb[68].mxu0 %v3327_v43  ;;  %3020 = vmatmul.mubr.bf16.gmra.mrb[68].mxu1 %v3328_v44 }
  0xab   :  { %2907 = vmatprep.mubr.msk.bf16.mxu0 %vm3394_vm0, %v4680_v0  ;;  %3023 = vmatprep.mubr.msk.bf16.mxu1 %vm3394_vm0, %v4680_v0 }
  0xb2   :  { %2908 = vmatmul.mubr.bf16.gmra.mrb[72].mxu0 %v3329_v45  ;;  %3024 = vmatmul.mubr.bf16.gmra.mrb[72].mxu1 %v3330_v46 }
  0xb3   :  { %2911 = vmatprep.mubr.msk.bf16.mxu0 %vm3394_vm0, %v4680_v0  ;;  %3027 = vmatprep.mubr.msk.bf16.mxu1 %vm3394_vm0, %v4680_v0 }
  0xba   :  { %2912 = vmatmul.mubr.bf16.gmra.mrb[76].mxu0 %v3331_v47  ;;  %3028 = vmatmul.mubr.bf16.gmra.mrb[76].mxu1 %v3332_v48 }
  0xbb   :  { %2915 = vmatprep.mubr.msk.bf16.mxu0 %vm3394_vm0, %v4680_v0  ;;  %3031 = vmatprep.mubr.msk.bf16.mxu1 %vm3394_vm0, %v4680_v0 }
  0xc2   :  { %2916 = vmatmul.mubr.bf16.gmra.mrb[80].mxu0 %v3333_v49  ;;  %3032 = vmatmul.mubr.bf16.gmra.mrb[80].mxu1 %v3334_v50 }
  0xc3   :  { %2919 = vmatprep.mubr.msk.bf16.mxu0 %vm3394_vm0, %v4680_v0  ;;  %3035 = vmatprep.mubr.msk.bf16.mxu1 %vm3394_vm0, %v4680_v0 }
  0xca   :  { %2920 = vmatmul.mubr.bf16.gmra.mrb[84].mxu0 %v3335_v51  ;;  %3036 = vmatmul.mubr.bf16.gmra.mrb[84].mxu1 %v3336_v52 }
  0xcb   :  { %2923 = vmatprep.mubr.msk.bf16.mxu0 %vm3394_vm0, %v4680_v0  ;;  %3039 = vmatprep.mubr.msk.bf16.mxu1 %vm3394_vm0, %v4680_v0 }
  0xd2   :  { %2924 = vmatmul.mubr.bf16.gmra.mrb[88].mxu0 %v3337_v53  ;;  %3040 = vmatmul.mubr.bf16.gmra.mrb[88].mxu1 %v3338_v54  ;;  %v3355_v53 = vld [vmem:[%s4677_s0 + $0xf8] sm:$0xff]  }
  0xd3   :  { %2927 = vmatprep.mubr.msk.bf16.mxu0 %vm3394_vm0, %v4680_v0  ;;  %3043 = vmatprep.mubr.msk.bf16.mxu1 %vm3394_vm0, %v4680_v0  ;;  %v3356_v54 = vld [vmem:[%s4677_s0 + $0x15c] sm:$0xff]  }
  0xda   :  { %2928 = vmatmul.mubr.bf16.gmra.mrb[92].mxu0 %v3339_v55  ;;  %3044 = vmatmul.mubr.bf16.gmra.mrb[92].mxu1 %v3340_v56 }
  0xdb   :  { %2931 = vmatprep.mubr.msk.bf16.mxu0 %vm3394_vm0, %v4680_v0  ;;  %3047 = vmatprep.mubr.msk.bf16.mxu1 %vm3394_vm0, %v4680_v0 }
  0xe2   :  { %2932 = vmatmul.mubr.bf16.gmra.mrb[96].mxu0 %v3341_v57  ;;  %3048 = vmatmul.mubr.bf16.gmra.mrb[96].mxu1 %v3342_v58 }
  0xe3   :  { %3067 = vmatprep.mubr.msk.bf16.mxu0 %vm3394_vm0, %v4680_v0  ;;  %3183 = vmatprep.mubr.msk.bf16.mxu1 %vm3394_vm0, %v4680_v0 }
  0xea   :  { %3068 = vmatmul.mubr.bf16.vlgmr.msra.gmra.mrb[100].mxu0 %v3343_v59  ;;  %3184 = vmatmul.mubr.bf16.vlgmr.msra.gmra.mrb[100].mxu1 %v3344_v60 }
  0xeb   :  { %3071 = vmatprep.mubr.msk.bf16.mxu0 %vm3394_vm0, %v4680_v0  ;;  %3187 = vmatprep.mubr.msk.bf16.mxu1 %vm3394_vm0, %v4680_v0 }
  0xf2   :  { %3072 = vmatmul.mubr.bf16.gmra.mrb[104].mxu0 %v3345_v61  ;;  %3188 = vmatmul.mubr.bf16.gmra.mrb[104].mxu1 %v3346_v62 }
  0xf3   :  { %3075 = vmatprep.mubr.msk.bf16.mxu0 %vm3394_vm0, %v4680_v0  ;;  %3191 = vmatprep.mubr.msk.bf16.mxu1 %vm3394_vm0, %v4680_v0 }
  0xf5   :  { %v3745_v63 = vpop.f32.mrb[0].mxu0  ;;  %v3747_v1 = vpop.f32.mrb[0].mxu1 }
  0xf6   :  { %v2837_v3 = vpop.f32.mrb[1].mxu0  ;;  %v2953_v4 = vpop.f32.mrb[1].mxu1 }
  0xf7   :  { %v3757_v7 = vpop.f32.mrb[2].mxu0  ;;  %v3759_v8 = vpop.f32.mrb[2].mxu1 }
  0xf8   :  { %v2838_v10 = vpop.f32.mrb[3].mxu0  ;;  %v2954_v11 = vpop.f32.mrb[3].mxu1 }
  0xfa   :  { %3076 = vmatmul.mubr.bf16.gmra.mrb[108].mxu0 %v3347_v5  ;;  %3192 = vmatmul.mubr.bf16.gmra.mrb[108].mxu1 %v3348_v6  ;;  %v3357_v5 = vld [vmem:[%s4677_s0 + $0x100] sm:$0xff]  }
  0xfb   :  { %3079 = vmatprep.mubr.msk.bf16.mxu0 %vm3394_vm0, %v4680_v0  ;;  %3195 = vmatprep.mubr.msk.bf16.mxu1 %vm3394_vm0, %v4680_v0  ;;  %v3358_v6 = vld [vmem:[%s4677_s0 + $0x164] sm:$0xff]  }
  0xfd   :  { %v3767_v12 = vpop.f32.mrb[4].mxu0  ;;  %v3769_v13 = vpop.f32.mrb[4].mxu1 }
  0xfe   :  { %v2841_v15 = vpop.f32.mrb[5].mxu0  ;;  %v2957_v16 = vpop.f32.mrb[5].mxu1 }
  0xff   :  { %v3779_v19 = vpop.f32.mrb[6].mxu0  ;;  %v3781_v20 = vpop.f32.mrb[6].mxu1 }
 0x100   :  { %v2842_v22 = vpop.f32.mrb[7].mxu0  ;;  %v2958_v23 = vpop.f32.mrb[7].mxu1 }
 0x102   :  { %3080 = vmatmul.mubr.bf16.gmra.mrb[112].mxu0 %v3349_v17  ;;  %3196 = vmatmul.mubr.bf16.gmra.mrb[112].mxu1 %v3350_v18 }
 0x103   :  { %3083 = vmatprep.mubr.msk.bf16.mxu0 %vm3394_vm0, %v4680_v0  ;;  %3199 = vmatprep.mubr.msk.bf16.mxu1 %vm3394_vm0, %v4680_v0 }
 0x105   :  { %v3789_v24 = vpop.f32.mrb[8].mxu0  ;;  %v3791_v25 = vpop.f32.mrb[8].mxu1 }
 0x106   :  { %v2845_v27 = vpop.f32.mrb[9].mxu0  ;;  %v2961_v28 = vpop.f32.mrb[9].mxu1 }
 0x107   :  { %v3801_v31 = vpop.f32.mrb[10].mxu0  ;;  %v3803_v32 = vpop.f32.mrb[10].mxu1 }
 0x108   :  { %v2846_v34 = vpop.f32.mrb[11].mxu0  ;;  %v2962_v35 = vpop.f32.mrb[11].mxu1 }
 0x10a   :  { %3084 = vmatmul.mubr.bf16.gmra.mrb[116].mxu0 %v3351_v29  ;;  %3200 = vmatmul.mubr.bf16.gmra.mrb[116].mxu1 %v3352_v30  ;;  %v3359_v29 = vld [vmem:[%s4677_s0 + $0x108] sm:$0xff]  }
 0x10b   :  { %3087 = vmatprep.mubr.msk.bf16.mxu0 %vm3394_vm0, %v4680_v0  ;;  %3203 = vmatprep.mubr.msk.bf16.mxu1 %vm3394_vm0, %v4680_v0  ;;  %v3360_v30 = vld [vmem:[%s4677_s0 + $0x16c] sm:$0xff]  }
 0x10d   :  { %v3811_v36 = vpop.f32.mrb[12].mxu0  ;;  %v3813_v37 = vpop.f32.mrb[12].mxu1 }
 0x10e   :  { %v2849_v39 = vpop.f32.mrb[13].mxu0  ;;  %v2965_v40 = vpop.f32.mrb[13].mxu1 }
 0x10f   :  { %v3823_v43 = vpop.f32.mrb[14].mxu0  ;;  %v3825_v44 = vpop.f32.mrb[14].mxu1 }
 0x110   :  { %v2850_v46 = vpop.f32.mrb[15].mxu0  ;;  %v2966_v47 = vpop.f32.mrb[15].mxu1 }
 0x112   :  { %3088 = vmatmul.mubr.bf16.gmra.mrb[120].mxu0 %v3353_v41  ;;  %3204 = vmatmul.mubr.bf16.gmra.mrb[120].mxu1 %v3354_v42 }
 0x113   :  { %3091 = vmatprep.mubr.msk.bf16.mxu0 %vm3394_vm0, %v4680_v0  ;;  %3207 = vmatprep.mubr.msk.bf16.mxu1 %vm3394_vm0, %v4680_v0 }
 0x115   :  { %v3833_v48 = vpop.f32.mrb[16].mxu0  ;;  %v3835_v49 = vpop.f32.mrb[16].mxu1 }
 0x116   :  { %v2853_v51 = vpop.f32.mrb[17].mxu0  ;;  %v2969_v52 = vpop.f32.mrb[17].mxu1 }
 0x117   :  { %v3845_v55 = vpop.f32.mrb[18].mxu0  ;;  %v3847_v56 = vpop.f32.mrb[18].mxu1 }
 0x118   :  { %v2854_v58 = vpop.f32.mrb[19].mxu0  ;;  %v2970_v59 = vpop.f32.mrb[19].mxu1 }
 0x11a   :  { %3092 = vmatmul.mubr.bf16.gmra.mrb[124].mxu0 %v3355_v53  ;;  %3208 = vmatmul.mubr.bf16.gmra.mrb[124].mxu1 %v3356_v54  ;;  %v3361_v53 = vld [vmem:[%s4677_s0 + $0x110] sm:$0xff]  }
 0x11b   :  { %3095 = vmatprep.mubr.msk.bf16.mxu0 %vm3394_vm0, %v4680_v0  ;;  %3211 = vmatprep.mubr.msk.bf16.mxu1 %vm3394_vm0, %v4680_v0  ;;  %v3362_v54 = vld [vmem:[%s4677_s0 + $0x174] sm:$0xff]  }
 0x11d   :  { %v3855_v60 = vpop.f32.mrb[20].mxu0  ;;  %v3857_v61 = vpop.f32.mrb[20].mxu1 }
 0x11e   :  { %v2857_v3 = vpop.f32.mrb[21].mxu0  ;;  %v2973_v4 = vpop.f32.mrb[21].mxu1 }
 0x11f   :  { %v3867_v10 = vpop.f32.mrb[22].mxu0  ;;  %v3869_v11 = vpop.f32.mrb[22].mxu1 }
 0x120   :  { %v2858_v16 = vpop.f32.mrb[23].mxu0  ;;  %v2974_v17 = vpop.f32.mrb[23].mxu1 }
 0x122   :  { %3096 = vmatmul.mubr.bf16.gmra.mrb[128].mxu0 %v3357_v5  ;;  %3212 = vmatmul.mubr.bf16.gmra.mrb[128].mxu1 %v3358_v6 }
 0x123   :  { %3099 = vmatprep.mubr.msk.bf16.mxu0 %vm3394_vm0, %v4680_v0  ;;  %3215 = vmatprep.mubr.msk.bf16.mxu1 %vm3394_vm0, %v4680_v0 }
 0x125   :  { %v3877_v18 = vpop.f32.mrb[24].mxu0  ;;  %v3879_v22 = vpop.f32.mrb[24].mxu1 }
 0x126   :  { %v2861_v27 = vpop.f32.mrb[25].mxu0  ;;  %v2977_v28 = vpop.f32.mrb[25].mxu1 }
 0x127   :  { %v3889_v34 = vpop.f32.mrb[26].mxu0  ;;  %v3891_v35 = vpop.f32.mrb[26].mxu1 }
 0x128   :  { %v2862_v40 = vpop.f32.mrb[27].mxu0  ;;  %v2978_v41 = vpop.f32.mrb[27].mxu1 }
 0x12a   :  { %3100 = vmatmul.mubr.bf16.gmra.mrb[132].mxu0 %v3359_v29  ;;  %3216 = vmatmul.mubr.bf16.gmra.mrb[132].mxu1 %v3360_v30  ;;  %v3363_v29 = vld [vmem:[%s4677_s0 + $0x118] sm:$0xff]  }
 0x12b   :  { %3103 = vmatprep.mubr.msk.bf16.mxu0 %vm3394_vm0, %v4680_v0  ;;  %3219 = vmatprep.mubr.msk.bf16.mxu1 %vm3394_vm0, %v4680_v0  ;;  %v3364_v30 = vld [vmem:[%s4677_s0 + $0x17c] sm:$0xff]  }
 0x12d   :  { %v3899_v42 = vpop.f32.mrb[28].mxu0  ;;  %v3901_v46 = vpop.f32.mrb[28].mxu1 }
 0x12e   :  { %v2865_v51 = vpop.f32.mrb[29].mxu0  ;;  %v2981_v52 = vpop.f32.mrb[29].mxu1 }
 0x12f   :  { %v3911_v58 = vpop.f32.mrb[30].mxu0  ;;  %v3913_v59 = vpop.f32.mrb[30].mxu1 }
 0x130   :  { %v2866_v4 = vpop.f32.mrb[31].mxu0  ;;  %v2982_v5 = vpop.f32.mrb[31].mxu1 }
 0x132   :  { %3104 = vmatmul.mubr.bf16.gmra.mrb[136].mxu0 %v3361_v53  ;;  %3220 = vmatmul.mubr.bf16.gmra.mrb[136].mxu1 %v3362_v54 }
 0x133   :  { %3107 = vmatprep.mubr.msk.bf16.mxu0 %vm3394_vm0, %v4680_v0  ;;  %3223 = vmatprep.mubr.msk.bf16.mxu1 %vm3394_vm0, %v4680_v0 }
 0x135   :  { %v3921_v6 = vpop.f32.mrb[32].mxu0  ;;  %v3923_v16 = vpop.f32.mrb[32].mxu1 }
 0x136   :  { %v2869_v27 = vpop.f32.mrb[33].mxu0  ;;  %v2985_v28 = vpop.f32.mrb[33].mxu1 }
 0x137   :  { %v3933_v40 = vpop.f32.mrb[34].mxu0  ;;  %v3935_v41 = vpop.f32.mrb[34].mxu1 }
 0x138   :  { %v2870_v52 = vpop.f32.mrb[35].mxu0  ;;  %v2986_v53 = vpop.f32.mrb[35].mxu1 }
 0x13a   :  { %3108 = vmatmul.mubr.bf16.gmra.mrb[140].mxu0 %v3363_v29  ;;  %3224 = vmatmul.mubr.bf16.gmra.mrb[140].mxu1 %v3364_v30  ;;  %v3365_v29 = vld [vmem:[%s4677_s0 + $0x120] sm:$0xff]  }
 0x13b   :  { %3111 = vmatprep.mubr.msk.bf16.mxu0 %vm3394_vm0, %v4680_v0  ;;  %3227 = vmatprep.mubr.msk.bf16.mxu1 %vm3394_vm0, %v4680_v0  ;;  %v3366_v30 = vld [vmem:[%s4677_s0 + $0x184] sm:$0xff]  }
 0x13d   :  { %v3943_v54 = vpop.f32.mrb[36].mxu0  ;;  %v3945_v4 = vpop.f32.mrb[36].mxu1 }
 0x13e   :  { %v2873_v27 = vpop.f32.mrb[37].mxu0  ;;  %v2989_v28 = vpop.f32.mrb[37].mxu1 }
 0x13f   :  { %v3955_v52 = vpop.f32.mrb[38].mxu0  ;;  %v3957_v53 = vpop.f32.mrb[38].mxu1 }
 0x140   :  { %v2874_v17 = vpop.f32.mrb[39].mxu0  ;;  %v2990_v3 = vpop.f32.mrb[39].mxu1 }
 0x141   :  { %v3367_v3 = vld [vmem:[%s4677_s0 + $0x128] ss:$304 sps:$4 sm:$0xff]   ;;  %v3368_v17 = vld [vmem:[%s4677_s0 + $0x18c] ss:$304 sps:$4 sm:$0xff]  }
 0x142   :  { %3112 = vmatmul.mubr.bf16.gmra.mrb[144].mxu0 %v3365_v29  ;;  %3228 = vmatmul.mubr.bf16.gmra.mrb[144].mxu1 %v3366_v30 }
 0x143   :  { %3115 = vmatprep.mubr.msk.bf16.mxu0 %vm3394_vm0, %v4680_v0  ;;  %3231 = vmatprep.mubr.msk.bf16.mxu1 %vm3394_vm0, %v4680_v0 }
 0x145   :  { %v3965_v27 = vpop.f32.mrb[40].mxu0  ;;  %v3967_v28 = vpop.f32.mrb[40].mxu1 }
 0x146   :  { %v2877_v47 = vpop.f32.mrb[41].mxu0  ;;  %v2993_v39 = vpop.f32.mrb[41].mxu1 }
 0x147   :  { %v3977_v29 = vpop.f32.mrb[42].mxu0  ;;  %v3979_v30 = vpop.f32.mrb[42].mxu1 }
 0x148   :  { %v2878_v23 = vpop.f32.mrb[43].mxu0  ;;  %v2994_v15 = vpop.f32.mrb[43].mxu1 }
 0x149   :  { %v3369_v15 = vld [vmem:[%s4677_s0 + $0x25c] sm:$0xff]  }
 0x14a   :  { %3116 = vmatmul.mubr.bf16.gmra.mrb[148].mxu0 %v3367_v3  ;;  %3232 = vmatmul.mubr.bf16.gmra.mrb[148].mxu1 %v3368_v17  ;;  %v3370_v23 = vld [vmem:[%s4677_s0 + $0x2c0] sm:$0xff]  }
 0x14b   :  { %3119 = vmatprep.mubr.msk.bf16.mxu0 %vm3394_vm0, %v4680_v0  ;;  %3235 = vmatprep.mubr.msk.bf16.mxu1 %vm3394_vm0, %v4680_v0 }
 0x14d   :  { %v3987_v39 = vpop.f32.mrb[44].mxu0  ;;  %v3989_v47 = vpop.f32.mrb[44].mxu1 }
 0x14e   :  { %v2881_v62 = vpop.f32.mrb[45].mxu0  ;;  %v2997_v57 = vpop.f32.mrb[45].mxu1 }
 0x14f   :  { %v3999_v3 = vpop.f32.mrb[46].mxu0  ;;  %v4001_v17 = vpop.f32.mrb[46].mxu1 }
 0x150   :  { %4735 = vst [vmem:[#allocation2_spill] sm:$0xff] %v4001_v17  ;;  %v2882_v50 = vpop.f32.mrb[47].mxu0  ;;  %v2998_v45 = vpop.f32.mrb[47].mxu1 }
 0x151   :  { %v3371_v45 = vld [vmem:[%s4677_s0 + $0x264] sm:$0xff]  }
 0x152   :  { %3120 = vmatmul.mubr.bf16.gmra.mrb[152].mxu0 %v3369_v15  ;;  %3236 = vmatmul.mubr.bf16.gmra.mrb[152].mxu1 %v3370_v23  ;;  %v3372_v50 = vld [vmem:[%s4677_s0 + $0x2c8] sm:$0xff]  }
 0x153   :  { %3123 = vmatprep.mubr.msk.bf16.mxu0 %vm3394_vm0, %v4680_v0  ;;  %3239 = vmatprep.mubr.msk.bf16.mxu1 %vm3394_vm0, %v4680_v0 }
 0x155   :  { %v4009_v57 = vpop.f32.mrb[48].mxu0  ;;  %v4011_v62 = vpop.f32.mrb[48].mxu1 }
 0x156   :  { %4736 = vst [vmem:[#allocation3_spill] sm:$0xff] %v4009_v57  ;;  %4737 = vst [vmem:[#allocation4_spill] sm:$0xff] %v4011_v62  ;;  %v2885_v38 = vpop.f32.mrb[49].mxu0  ;;  %v3001_v33 = vpop.f32.mrb[49].mxu1 }
 0x157   :  { %v4021_v15 = vpop.f32.mrb[50].mxu0  ;;  %v4023_v23 = vpop.f32.mrb[50].mxu1 }
 0x158   :  { %4738 = vst [vmem:[#allocation5_spill] sm:$0xff] %v4021_v15  ;;  %4739 = vst [vmem:[#allocation6_spill] sm:$0xff] %v4023_v23  ;;  %v2886_v26 = vpop.f32.mrb[51].mxu0  ;;  %v3002_v21 = vpop.f32.mrb[51].mxu1 }
 0x159   :  { %v3373_v21 = vld [vmem:[%s4677_s0 + $0x26c] sm:$0xff]  }
 0x15a   :  { %3124 = vmatmul.mubr.bf16.gmra.mrb[156].mxu0 %v3371_v45  ;;  %3240 = vmatmul.mubr.bf16.gmra.mrb[156].mxu1 %v3372_v50  ;;  %v3374_v26 = vld [vmem:[%s4677_s0 + $0x2d0] sm:$0xff]  }
 0x15b   :  { %3127 = vmatprep.mubr.msk.bf16.mxu0 %vm3394_vm0, %v4680_v0  ;;  %3243 = vmatprep.mubr.msk.bf16.mxu1 %vm3394_vm0, %v4680_v0 }
 0x15d   :  { %v4031_v33 = vpop.f32.mrb[52].mxu0  ;;  %v4033_v38 = vpop.f32.mrb[52].mxu1 }
 0x15e   :  { %4740 = vst [vmem:[#allocation7_spill] sm:$0xff] %v4031_v33  ;;  %4741 = vst [vmem:[#allocation8_spill] sm:$0xff] %v4033_v38  ;;  %v2889_v14 = vpop.f32.mrb[53].mxu0  ;;  %v3005_v9 = vpop.f32.mrb[53].mxu1 }
 0x15f   :  { %v4043_v45 = vpop.f32.mrb[54].mxu0  ;;  %v4045_v50 = vpop.f32.mrb[54].mxu1  ;;  %v4744_v9 = vmov 0.0  }
 0x160   :  { %4742 = vst [vmem:[#allocation9_spill] sm:$0xff] %v4043_v45  ;;  %4743 = vst [vmem:[#allocation10_spill] sm:$0xff] %v4045_v50  ;;  %v2890_v2 = vpop.f32.mrb[55].mxu0  ;;  %v3006_v0 = vpop.f32.mrb[55].mxu1 }
 0x161   :  { %v3375_v0 = vld [vmem:[%s4677_s0 + $0x274] sm:$0xff]  }
 0x162   :  { %3128 = vmatmul.mubr.bf16.gmra.mrb[160].mxu0 %v3373_v21  ;;  %3244 = vmatmul.mubr.bf16.gmra.mrb[160].mxu1 %v3374_v26  ;;  %v3376_v2 = vld [vmem:[%s4677_s0 + $0x2d8] sm:$0xff]  }
 0x163   :  { %3131 = vmatprep.mubr.msk.bf16.mxu0 %vm3394_vm0, %v4744_v9  ;;  %3247 = vmatprep.mubr.msk.bf16.mxu1 %vm3394_vm0, %v4744_v9 }
 0x165   :  { %v4053_v14 = vpop.f32.mrb[56].mxu0  ;;  %v4055_v5 = vpop.f32.mrb[56].mxu1 }
 0x166   :  { %4745 = vst [vmem:[#allocation11_spill] sm:$0xff] %v4053_v14  ;;  %4746 = vst [vmem:[#allocation12_spill] sm:$0xff] %v4055_v5  ;;  %v2893_v33 = vpop.f32.mrb[57].mxu0  ;;  %v3009_v23 = vpop.f32.mrb[57].mxu1 }
 0x167   :  { %v4065_v21 = vpop.f32.mrb[58].mxu0  ;;  %v4067_v26 = vpop.f32.mrb[58].mxu1 }
 0x168   :  { %4747 = vst [vmem:[#allocation13_spill] sm:$0xff] %v4065_v21  ;;  %4748 = vst [vmem:[#allocation14_spill] sm:$0xff] %v4067_v26  ;;  %v2894_v50 = vpop.f32.mrb[59].mxu0  ;;  %v3010_v45 = vpop.f32.mrb[59].mxu1 }
 0x169   :  { %v3377_v45 = vld [vmem:[%s4677_s0 + $0x27c] sm:$0xff]  }
 0x16a   :  { %3132 = vmatmul.mubr.bf16.gmra.mrb[164].mxu0 %v3375_v0  ;;  %3248 = vmatmul.mubr.bf16.gmra.mrb[164].mxu1 %v3376_v2  ;;  %v3378_v50 = vld [vmem:[%s4677_s0 + $0x2e0] sm:$0xff]  }
 0x16b   :  { %3135 = vmatprep.mubr.msk.bf16.mxu0 %vm3394_vm0, %v4744_v9  ;;  %3251 = vmatprep.mubr.msk.bf16.mxu1 %vm3394_vm0, %v4744_v9 }
 0x16d   :  { %v4075_v23 = vpop.f32.mrb[60].mxu0  ;;  %v4077_v33 = vpop.f32.mrb[60].mxu1 }
 0x16e   :  { %4749 = vst [vmem:[#allocation15_spill] sm:$0xff] %v4075_v23  ;;  %4750 = vst [vmem:[#allocation16_spill] sm:$0xff] %v4077_v33  ;;  %v2897_v5 = vpop.f32.mrb[61].mxu0  ;;  %v3013_v14 = vpop.f32.mrb[61].mxu1 }
 0x16f   :  { %v4087_v0 = vpop.f32.mrb[62].mxu0  ;;  %v4089_v2 = vpop.f32.mrb[62].mxu1 }
 0x170   :  { %4751 = vst [vmem:[#allocation17_spill] sm:$0xff] %v4087_v0  ;;  %4752 = vst [vmem:[#allocation18_spill] sm:$0xff] %v4089_v2  ;;  %v2898_v26 = vpop.f32.mrb[63].mxu0  ;;  %v3014_v21 = vpop.f32.mrb[63].mxu1 }
 0x171   :  { %v3379_v21 = vld [vmem:[%s4677_s0 + $0x284] sm:$0xff]  }
 0x172   :  { %3136 = vmatmul.mubr.bf16.gmra.mrb[168].mxu0 %v3377_v45  ;;  %3252 = vmatmul.mubr.bf16.gmra.mrb[168].mxu1 %v3378_v50  ;;  %v3380_v26 = vld [vmem:[%s4677_s0 + $0x2e8] sm:$0xff]  }
 0x173   :  { %3139 = vmatprep.mubr.msk.bf16.mxu0 %vm3394_vm0, %v4744_v9  ;;  %3255 = vmatprep.mubr.msk.bf16.mxu1 %vm3394_vm0, %v4744_v9 }
 0x175   :  { %v4097_v5 = vpop.f32.mrb[64].mxu0  ;;  %v4099_v14 = vpop.f32.mrb[64].mxu1 }
 0x176   :  { %4753 = vst [vmem:[#allocation19_spill] sm:$0xff] %v4097_v5  ;;  %4754 = vst [vmem:[#allocation20_spill] sm:$0xff] %v4099_v14  ;;  %v2901_v33 = vpop.f32.mrb[65].mxu0  ;;  %v3017_v23 = vpop.f32.mrb[65].mxu1 }
 0x177   :  { %v4109_v45 = vpop.f32.mrb[66].mxu0  ;;  %v4111_v50 = vpop.f32.mrb[66].mxu1 }
 0x178   :  { %4755 = vst [vmem:[#allocation21_spill] sm:$0xff] %v4109_v45  ;;  %4756 = vst [vmem:[#allocation22_spill] sm:$0xff] %v4111_v50  ;;  %v2902_v2 = vpop.f32.mrb[67].mxu0  ;;  %v3018_v0 = vpop.f32.mrb[67].mxu1 }
 0x179   :  { %v3381_v0 = vld [vmem:[%s4677_s0 + $0x28c] sm:$0xff]  }
 0x17a   :  { %3140 = vmatmul.mubr.bf16.gmra.mrb[172].mxu0 %v3379_v21  ;;  %3256 = vmatmul.mubr.bf16.gmra.mrb[172].mxu1 %v3380_v26  ;;  %v3382_v2 = vld [vmem:[%s4677_s0 + $0x2f0] sm:$0xff]  }
 0x17b   :  { %3143 = vmatprep.mubr.msk.bf16.mxu0 %vm3394_vm0, %v4744_v9  ;;  %3259 = vmatprep.mubr.msk.bf16.mxu1 %vm3394_vm0, %v4744_v9 }
 0x17d   :  { %v4119_v23 = vpop.f32.mrb[68].mxu0  ;;  %v4121_v33 = vpop.f32.mrb[68].mxu1 }
 0x17e   :  { %4757 = vst [vmem:[#allocation23_spill] sm:$0xff] %v4119_v23  ;;  %4758 = vst [vmem:[#allocation24_spill] sm:$0xff] %v4121_v33  ;;  %v2905_v14 = vpop.f32.mrb[69].mxu0  ;;  %v3021_v5 = vpop.f32.mrb[69].mxu1 }
 0x17f   :  { %v4131_v21 = vpop.f32.mrb[70].mxu0  ;;  %v4133_v26 = vpop.f32.mrb[70].mxu1 }
 0x180   :  { %4759 = vst [vmem:[#allocation25_spill] sm:$0xff] %v4131_v21  ;;  %4760 = vst [vmem:[#allocation26_spill] sm:$0xff] %v4133_v26  ;;  %v2906_v50 = vpop.f32.mrb[71].mxu0  ;;  %v3022_v45 = vpop.f32.mrb[71].mxu1 }
 0x181   :  { %v3383_v45 = vld [vmem:[%s4677_s0 + $0x294] sm:$0xff]  }
 0x182   :  { %3144 = vmatmul.mubr.bf16.gmra.mrb[176].mxu0 %v3381_v0  ;;  %3260 = vmatmul.mubr.bf16.gmra.mrb[176].mxu1 %v3382_v2  ;;  %v3384_v50 = vld [vmem:[%s4677_s0 + $0x2f8] sm:$0xff]  }
 0x183   :  { %3147 = vmatprep.mubr.msk.bf16.mxu0 %vm3394_vm0, %v4744_v9  ;;  %3263 = vmatprep.mubr.msk.bf16.mxu1 %vm3394_vm0, %v4744_v9 }
 0x185   :  { %v4141_v5 = vpop.f32.mrb[72].mxu0  ;;  %v4143_v14 = vpop.f32.mrb[72].mxu1 }
 0x186   :  { %4761 = vst [vmem:[#allocation27_spill] sm:$0xff] %v4141_v5  ;;  %4762 = vst [vmem:[#allocation28_spill] sm:$0xff] %v4143_v14  ;;  %v2909_v33 = vpop.f32.mrb[73].mxu0  ;;  %v3025_v23 = vpop.f32.mrb[73].mxu1 }
 0x187   :  { %v4153_v0 = vpop.f32.mrb[74].mxu0  ;;  %v4155_v2 = vpop.f32.mrb[74].mxu1 }
 0x188   :  { %4763 = vst [vmem:[#allocation29_spill] sm:$0xff] %v4153_v0  ;;  %4764 = vst [vmem:[#allocation30_spill] sm:$0xff] %v4155_v2  ;;  %v2910_v26 = vpop.f32.mrb[75].mxu0  ;;  %v3026_v21 = vpop.f32.mrb[75].mxu1 }
 0x189   :  { %v3385_v21 = vld [vmem:[%s4677_s0 + $0x29c] sm:$0xff]  }
 0x18a   :  { %3148 = vmatmul.mubr.bf16.gmra.mrb[180].mxu0 %v3383_v45  ;;  %3264 = vmatmul.mubr.bf16.gmra.mrb[180].mxu1 %v3384_v50  ;;  %v3386_v26 = vld [vmem:[%s4677_s0 + $0x300] sm:$0xff]  }
 0x18b   :  { %3151 = vmatprep.mubr.msk.bf16.mxu0 %vm3394_vm0, %v4744_v9  ;;  %3267 = vmatprep.mubr.msk.bf16.mxu1 %vm3394_vm0, %v4744_v9 }
 0x18d   :  { %v4163_v23 = vpop.f32.mrb[76].mxu0  ;;  %v4165_v33 = vpop.f32.mrb[76].mxu1 }
 0x18e   :  { %4765 = vst [vmem:[#allocation31_spill] sm:$0xff] %v4163_v23  ;;  %4766 = vst [vmem:[#allocation32_spill] sm:$0xff] %v4165_v33  ;;  %v2913_v14 = vpop.f32.mrb[77].mxu0  ;;  %v3029_v5 = vpop.f32.mrb[77].mxu1 }
 0x18f   :  { %v4175_v45 = vpop.f32.mrb[78].mxu0  ;;  %v4177_v50 = vpop.f32.mrb[78].mxu1 }
 0x190   :  { %4767 = vst [vmem:[#allocation33_spill] sm:$0xff] %v4175_v45  ;;  %4768 = vst [vmem:[#allocation34_spill] sm:$0xff] %v4177_v50  ;;  %v2914_v2 = vpop.f32.mrb[79].mxu0  ;;  %v3030_v0 = vpop.f32.mrb[79].mxu1 }
 0x191   :  { %v3387_v0 = vld [vmem:[%s4677_s0 + $0x2a4] sm:$0xff]  }
 0x192   :  { %3152 = vmatmul.mubr.bf16.gmra.mrb[184].mxu0 %v3385_v21  ;;  %3268 = vmatmul.mubr.bf16.gmra.mrb[184].mxu1 %v3386_v26  ;;  %v3388_v2 = vld [vmem:[%s4677_s0 + $0x308] sm:$0xff]  }
 0x193   :  { %3155 = vmatprep.mubr.msk.bf16.mxu0 %vm3394_vm0, %v4744_v9  ;;  %3271 = vmatprep.mubr.msk.bf16.mxu1 %vm3394_vm0, %v4744_v9 }
 0x195   :  { %v4185_v5 = vpop.f32.mrb[80].mxu0  ;;  %v4187_v14 = vpop.f32.mrb[80].mxu1 }
 0x196   :  { %4769 = vst [vmem:[#allocation35_spill] sm:$0xff] %v4185_v5  ;;  %4770 = vst [vmem:[#allocation36_spill] sm:$0xff] %v4187_v14  ;;  %v2917_v33 = vpop.f32.mrb[81].mxu0  ;;  %v3033_v23 = vpop.f32.mrb[81].mxu1 }
 0x197   :  { %v4197_v21 = vpop.f32.mrb[82].mxu0  ;;  %v4199_v26 = vpop.f32.mrb[82].mxu1 }
 0x198   :  { %4771 = vst [vmem:[#allocation37_spill] sm:$0xff] %v4197_v21  ;;  %4772 = vst [vmem:[#allocation38_spill] sm:$0xff] %v4199_v26  ;;  %v2918_v50 = vpop.f32.mrb[83].mxu0  ;;  %v3034_v45 = vpop.f32.mrb[83].mxu1 }
 0x199   :  { %v3389_v45 = vld [vmem:[%s4677_s0 + $0x2ac] sm:$0xff]  }
 0x19a   :  { %3156 = vmatmul.mubr.bf16.gmra.mrb[188].mxu0 %v3387_v0  ;;  %3272 = vmatmul.mubr.bf16.gmra.mrb[188].mxu1 %v3388_v2  ;;  %v3390_v50 = vld [vmem:[%s4677_s0 + $0x310] sm:$0xff]  }
 0x19b   :  { %3159 = vmatprep.mubr.msk.bf16.mxu0 %vm3394_vm0, %v4744_v9  ;;  %3275 = vmatprep.mubr.msk.bf16.mxu1 %vm3394_vm0, %v4744_v9 }
 0x19d   :  { %v4207_v23 = vpop.f32.mrb[84].mxu0  ;;  %v4209_v33 = vpop.f32.mrb[84].mxu1 }
 0x19e   :  { %4773 = vst [vmem:[#allocation39_spill] sm:$0xff] %v4207_v23  ;;  %4774 = vst [vmem:[#allocation40_spill] sm:$0xff] %v4209_v33  ;;  %v2921_v14 = vpop.f32.mrb[85].mxu0  ;;  %v3037_v5 = vpop.f32.mrb[85].mxu1 }
 0x19f   :  { %v4219_v0 = vpop.f32.mrb[86].mxu0  ;;  %v4221_v2 = vpop.f32.mrb[86].mxu1 }
 0x1a0   :  { %4775 = vst [vmem:[#allocation41_spill] sm:$0xff] %v4219_v0  ;;  %4776 = vst [vmem:[#allocation42_spill] sm:$0xff] %v4221_v2  ;;  %v2922_v26 = vpop.f32.mrb[87].mxu0  ;;  %v3038_v21 = vpop.f32.mrb[87].mxu1 }
 0x1a1   :  { %v3391_v21 = vld [vmem:[%s4677_s0 + $0x2b4] sm:$0xff]  }
 0x1a2   :  { %3160 = vmatmul.mubr.bf16.gmra.mrb[192].mxu0 %v3389_v45  ;;  %3276 = vmatmul.mubr.bf16.gmra.mrb[192].mxu1 %v3390_v50  ;;  %v3392_v26 = vld [vmem:[%s4677_s0 + $0x318] sm:$0xff]  }
 0x1a3   :  { %3163 = vmatprep.mubr.msk.bf16.mxu0 %vm3394_vm0, %v4744_v9  ;;  %3279 = vmatprep.mubr.msk.bf16.mxu1 %vm3394_vm0, %v4744_v9 }
 0x1a5   :  { %v4229_v5 = vpop.f32.mrb[88].mxu0  ;;  %v4231_v14 = vpop.f32.mrb[88].mxu1 }
 0x1a6   :  { %4777 = vst [vmem:[#allocation43_spill] sm:$0xff] %v4229_v5  ;;  %4778 = vst [vmem:[#allocation44_spill] sm:$0xff] %v4231_v14  ;;  %v2925_v33 = vpop.f32.mrb[89].mxu0  ;;  %v3041_v23 = vpop.f32.mrb[89].mxu1 }
 0x1a7   :  { %v4241_v45 = vpop.f32.mrb[90].mxu0  ;;  %v4243_v9 = vpop.f32.mrb[90].mxu1 }
 0x1a8   :  { %4779 = vst [vmem:[#allocation45_spill] sm:$0xff] %v4241_v45  ;;  %4780 = vst [vmem:[#allocation46_spill] sm:$0xff] %v4243_v9  ;;  %v2926_v51 = vpop.f32.mrb[91].mxu0  ;;  %v3042_v2 = vpop.f32.mrb[91].mxu1 }
 0x1aa   :  { %3164 = vmatmul.mubr.bf16.gmra.mrb[196].mxu0 %v3391_v21  ;;  %3280 = vmatmul.mubr.bf16.gmra.mrb[196].mxu1 %v3392_v26 }
 0x1ad   :  { %v4247_v23 = vpop.f32.mrb[92].mxu0  ;;  %v4249_v33 = vpop.f32.mrb[92].mxu1 }
 0x1ae   :  { %4781 = vst [vmem:[#allocation47_spill] sm:$0xff] %v4247_v23  ;;  %4782 = vst [vmem:[#allocation48_spill] sm:$0xff] %v4249_v33  ;;  %v2929_v14 = vpop.f32.mrb[93].mxu0  ;;  %v3045_v5 = vpop.f32.mrb[93].mxu1 }
 0x1af   :  { %v4253_v0 = vpop.f32.mrb[94].mxu0  ;;  %v4255_v15 = vpop.f32.mrb[94].mxu1 }
 0x1b0   :  { %4783 = vst [vmem:[#allocation49_spill] sm:$0xff] %v4253_v0  ;;  %4784 = vst [vmem:[#allocation50_spill] sm:$0xff] %v4255_v15  ;;  %v2930_v51 = vpop.f32.mrb[95].mxu0  ;;  %v3046_v2 = vpop.f32.mrb[95].mxu1  ;;  %v4789_v15 = vmax.f32 %v3745_v63, %v3747_v1 }
 0x1b5   :  { %v4259_v21 = vpop.f32.mrb[96].mxu0  ;;  %v4261_v26 = vpop.f32.mrb[96].mxu1 }
 0x1b6   :  { %4785 = vst [vmem:[#allocation51_spill] sm:$0xff] %v4259_v21  ;;  %4786 = vst [vmem:[#allocation52_spill] sm:$0xff] %v4261_v26  ;;  %v2933_v45 = vpop.f32.mrb[97].mxu0  ;;  %v3049_v38 = vpop.f32.mrb[97].mxu1 }
 0x1b7   :  { %v4265_v14 = vpop.f32.mrb[98].mxu0  ;;  %v4267_v5 = vpop.f32.mrb[98].mxu1  ;;  %v4277_v38 = vld [vmem:[%s4678_s2] ss:$0 sm:$0xff] }
 0x1b8   :  { %4787 = vst [vmem:[#allocation53_spill] sm:$0xff] %v4265_v14  ;;  %4788 = vst [vmem:[#allocation54_spill] sm:$0xff] %v4267_v5  ;;  %v2934_v23 = vpop.f32.mrb[99].mxu0  ;;  %v3050_v50 = vpop.f32.mrb[99].mxu1 }
 0x1b9   :  { %v4790_v23 = vmax.f32 %v3757_v7, %v3759_v8 }
 0x1bd   :  { %v1231_v51 = vpop.f32.mrb[100].mxu0  ;;  %v1715_v2 = vpop.f32.mrb[100].mxu1 }
 0x1be   :  { %v1430_v0 = vmax.f32 %v4789_v15, %v1231_v51  ;;  %v3069_v62 = vpop.f32.mrb[101].mxu0  ;;  %v3185_v57 = vpop.f32.mrb[101].mxu1 }
 0x1bf   :  { %v1234_v45 = vpop.f32.mrb[102].mxu0  ;;  %v1718_v9 = vpop.f32.mrb[102].mxu1 }
 0x1c0   :  { %v1914_v26 = vmax.f32 %v1430_v0, %v1715_v2  ;;  %v1431_v50 = vmax.f32 %v4790_v23, %v1234_v45  ;;  %v3070_v33 = vpop.f32.mrb[103].mxu0  ;;  %v3186_v5 = vpop.f32.mrb[103].mxu1  ;;  %v4791_v0 = vmax.f32 %v3767_v12, %v3769_v13 }
 0x1c2   :  { %v1971_v14 = vadd.f32 %v4277_v38, %v1914_v26  ;;  %v1915_v63 = vmax.f32 %v1431_v50, %v1718_v9 }
 0x1c4   :  { %v2021_v1 = vmax.f32 %v1971_v14, 0.0  ;;  %v1972_v57 = vadd.f32 %v4277_v38, %v1915_v63  ;;  %v4792_v14 = vmax.f32 %v3779_v19, %v3781_v20  ;;  %v4793_v19 = vmax.f32 %v3789_v24, %v3791_v25 }
 0x1c5   :  { %v1239_v62 = vpop.f32.mrb[104].mxu0  ;;  %v1723_v15 = vpop.f32.mrb[104].mxu1 }
 0x1c6   :  { %v2637_v51 = vpack.c.bf16 %v2021_v1, %v2021_v1  ;;  %v2022_v21 = vmax.f32 %v1972_v57, 0.0  ;;  %v1432_v2 = vmax.f32 %v4791_v0, %v1239_v62  ;;  %v3073_v17 = vpop.f32.mrb[105].mxu0  ;;  %v3189_v7 = vpop.f32.mrb[105].mxu1 }
 0x1c7   :  { %v1242_v8 = vpop.f32.mrb[106].mxu0  ;;  %v1726_v33 = vpop.f32.mrb[106].mxu1 }
 0x1c8   :  { %2274 = vst.msk [vmem:[%s4679_s3] sm:$0xf] %vm2273_vm1, %v2637_v51  ;;  %v2638_v9 = vpack.c.bf16 %v2022_v21, %v2022_v21  ;;  %v1916_v26 = vmax.f32 %v1432_v2, %v1723_v15  ;;  %v1433_v5 = vmax.f32 %v4792_v14, %v1242_v8  ;;  %v3074_v45 = vpop.f32.mrb[107].mxu0  ;;  %v3190_v23 = vpop.f32.mrb[107].mxu1  ;;  %v4794_v8 = vmax.f32 %v3801_v31, %v3803_v32 }
 0x1c9   :  { %v4795_v31 = vmax.f32 %v3811_v36, %v3813_v37 }
 0x1ca   :  { %2275 = vst.msk [vmem:[%s4679_s3 + $0x4] sm:$0xf] %vm2273_vm1, %v2638_v9  ;;  %v1973_v12 = vadd.f32 %v4277_v38, %v1916_v26  ;;  %v1917_v13 = vmax.f32 %v1433_v5, %v1726_v33 }
 0x1cc   :  { %v2023_v17 = vmax.f32 %v1973_v12, 0.0  ;;  %v1974_v50 = vadd.f32 %v4277_v38, %v1917_v13 }
 0x1cd   :  { %v1247_v63 = vpop.f32.mrb[108].mxu0  ;;  %v1731_v21 = vpop.f32.mrb[108].mxu1 }
 0x1ce   :  { %v2639_v1 = vpack.c.bf16 %v2023_v17, %v2023_v17  ;;  %v2024_v57 = vmax.f32 %v1974_v50, 0.0  ;;  %v1434_v20 = vmax.f32 %v4793_v19, %v1247_v63  ;;  %v3077_v62 = vpop.f32.mrb[109].mxu0  ;;  %v3193_v15 = vpop.f32.mrb[109].mxu1  ;;  %v4796_v19 = vmax.f32 %v3823_v43, %v3825_v44 }
 0x1cf   :  { %v1250_v51 = vpop.f32.mrb[110].mxu0  ;;  %v1734_v0 = vpop.f32.mrb[110].mxu1  ;;  %v4797_v43 = vmax.f32 %v3833_v48, %v3835_v49 }
 0x1d0   :  { %2276 = vst.msk [vmem:[%s4679_s3 + $0x8] sm:$0xf] %vm2273_vm1, %v2639_v1  ;;  %v2640_v2 = vpack.c.bf16 %v2024_v57, %v2024_v57  ;;  %v1918_v7 = vmax.f32 %v1434_v20, %v1731_v21  ;;  %v1435_v33 = vmax.f32 %v4794_v8, %v1250_v51  ;;  %v3078_v9 = vpop.f32.mrb[111].mxu0  ;;  %v3194_v26 = vpop.f32.mrb[111].mxu1 }
 0x1d2   :  { %2277 = vst.msk [vmem:[%s4679_s3 + $0xc] sm:$0xf] %vm2273_vm1, %v2640_v2  ;;  %v1975_v24 = vadd.f32 %v4277_v38, %v1918_v7  ;;  %v1919_v25 = vmax.f32 %v1435_v33, %v1734_v0 }
 0x1d4   :  { %v2025_v14 = vmax.f32 %v1975_v24, 0.0  ;;  %v1976_v5 = vadd.f32 %v4277_v38, %v1919_v25 }
 0x1d5   :  { %v1255_v45 = vpop.f32.mrb[112].mxu0  ;;  %v1739_v23 = vpop.f32.mrb[112].mxu1 }
 0x1d6   :  { %v2641_v12 = vpack.c.bf16 %v2025_v14, %v2025_v14  ;;  %v2026_v13 = vmax.f32 %v1976_v5, 0.0  ;;  %v1436_v32 = vmax.f32 %v4795_v31, %v1255_v45  ;;  %v3081_v17 = vpop.f32.mrb[113].mxu0  ;;  %v3197_v50 = vpop.f32.mrb[113].mxu1  ;;  %v4798_v45 = vmax.f32 %v3845_v55, %v3847_v56 }
 0x1d7   :  { %v1258_v63 = vpop.f32.mrb[114].mxu0  ;;  %v1742_v21 = vpop.f32.mrb[114].mxu1  ;;  %v4799_v55 = vmax.f32 %v3855_v60, %v3857_v61 }
 0x1d8   :  { %2278 = vst.msk [vmem:[%s4679_s3 + $0x10] sm:$0xf] %vm2273_vm1, %v2641_v12  ;;  %v2642_v1 = vpack.c.bf16 %v2026_v13, %v2026_v13  ;;  %v1920_v57 = vmax.f32 %v1436_v32, %v1739_v23  ;;  %v1437_v20 = vmax.f32 %v4796_v19, %v1258_v63  ;;  %v3082_v62 = vpop.f32.mrb[115].mxu0  ;;  %v3198_v15 = vpop.f32.mrb[115].mxu1 }
 0x1da   :  { %2279 = vst.msk [vmem:[%s4679_s3 + $0x14] sm:$0xf] %vm2273_vm1, %v2642_v1  ;;  %v1977_v36 = vadd.f32 %v4277_v38, %v1920_v57  ;;  %v1921_v37 = vmax.f32 %v1437_v20, %v1742_v21 }
 0x1dc   :  { %v2027_v51 = vmax.f32 %v1977_v36, 0.0  ;;  %v1978_v0 = vadd.f32 %v4277_v38, %v1921_v37  ;;  %v4800_v36 = vmax.f32 %v3867_v10, %v3869_v11  ;;  %v4801_v10 = vmax.f32 %v3877_v18, %v3879_v22 }
 0x1dd   :  { %v1263_v2 = vpop.f32.mrb[116].mxu0  ;;  %v1747_v7 = vpop.f32.mrb[116].mxu1 }
 0x1de   :  { %v2643_v8 = vpack.c.bf16 %v2027_v51, %v2027_v51  ;;  %v2028_v33 = vmax.f32 %v1978_v0, 0.0  ;;  %v1438_v44 = vmax.f32 %v4797_v43, %v1263_v2  ;;  %v3085_v9 = vpop.f32.mrb[117].mxu0  ;;  %v3201_v26 = vpop.f32.mrb[117].mxu1 }
 0x1df   :  { %v1266_v24 = vpop.f32.mrb[118].mxu0  ;;  %v1750_v25 = vpop.f32.mrb[118].mxu1 }
 0x1e0   :  { %2280 = vst.msk [vmem:[%s4679_s3 + $0x18] sm:$0xf] %vm2273_vm1, %v2643_v8  ;;  %v2644_v14 = vpack.c.bf16 %v2028_v33, %v2028_v33  ;;  %v1922_v5 = vmax.f32 %v1438_v44, %v1747_v7  ;;  %v1439_v23 = vmax.f32 %v4798_v45, %v1266_v24  ;;  %v3086_v12 = vpop.f32.mrb[119].mxu0  ;;  %v3202_v13 = vpop.f32.mrb[119].mxu1  ;;  %v4802_v45 = vmax.f32 %v3889_v34, %v3891_v35 }
 0x1e1   :  { %v4803_v34 = vmax.f32 %v3899_v42, %v3901_v46 }
 0x1e2   :  { %2281 = vst.msk [vmem:[%s4679_s3 + $0x1c] sm:$0xf] %vm2273_vm1, %v2644_v14  ;;  %v1979_v48 = vadd.f32 %v4277_v38, %v1922_v5  ;;  %v1923_v49 = vmax.f32 %v1439_v23, %v1750_v25 }
 0x1e4   :  { %v2029_v31 = vmax.f32 %v1979_v48, 0.0  ;;  %v1980_v32 = vadd.f32 %v4277_v38, %v1923_v49 }
 0x1e5   :  { %v1271_v17 = vpop.f32.mrb[120].mxu0  ;;  %v1755_v50 = vpop.f32.mrb[120].mxu1 }
 0x1e6   :  { %v2645_v63 = vpack.c.bf16 %v2029_v31, %v2029_v31  ;;  %v2030_v21 = vmax.f32 %v1980_v32, 0.0  ;;  %v1440_v56 = vmax.f32 %v4799_v55, %v1271_v17  ;;  %v3089_v1 = vpop.f32.mrb[121].mxu0  ;;  %v3205_v57 = vpop.f32.mrb[121].mxu1 }
 0x1e7   :  { %v1274_v19 = vpop.f32.mrb[122].mxu0  ;;  %v1758_v20 = vpop.f32.mrb[122].mxu1 }
 0x1e8   :  { %2282 = vst.msk [vmem:[%s4679_s3 + $0x20] sm:$0xf] %vm2273_vm1, %v2645_v63  ;;  %v2646_v62 = vpack.c.bf16 %v2030_v21, %v2030_v21  ;;  %v1924_v15 = vmax.f32 %v1440_v56, %v1755_v50  ;;  %v1441_v37 = vmax.f32 %v4800_v36, %v1274_v19  ;;  %v3090_v51 = vpop.f32.mrb[123].mxu0  ;;  %v3206_v0 = vpop.f32.mrb[123].mxu1  ;;  %v4804_v19 = vmax.f32 %v3911_v58, %v3913_v59 }
 0x1e9   :  { %v4805_v58 = vmax.f32 %v3921_v6, %v3923_v16 }
 0x1ea   :  { %2283 = vst.msk [vmem:[%s4679_s3 + $0x24] sm:$0xf] %vm2273_vm1, %v2646_v62  ;;  %v1981_v60 = vadd.f32 %v4277_v38, %v1924_v15  ;;  %v1925_v61 = vmax.f32 %v1441_v37, %v1758_v20 }
 0x1ec   :  { %v2031_v2 = vmax.f32 %v1981_v60, 0.0  ;;  %v1982_v7 = vadd.f32 %v4277_v38, %v1925_v61 }
 0x1ed   :  { %v1279_v8 = vpop.f32.mrb[124].mxu0  ;;  %v1763_v33 = vpop.f32.mrb[124].mxu1 }
 0x1ee   :  { %v2647_v43 = vpack.c.bf16 %v2031_v2, %v2031_v2  ;;  %v2032_v44 = vmax.f32 %v1982_v7, 0.0  ;;  %v1442_v11 = vmax.f32 %v4801_v10, %v1279_v8  ;;  %v3093_v9 = vpop.f32.mrb[125].mxu0  ;;  %v3209_v26 = vpop.f32.mrb[125].mxu1  ;;  %v4806_v10 = vmax.f32 %v3933_v40, %v3935_v41 }
 0x1ef   :  { %v1282_v24 = vpop.f32.mrb[126].mxu0  ;;  %v1766_v25 = vpop.f32.mrb[126].mxu1  ;;  %v4807_v40 = vmax.f32 %v3943_v54, %v3945_v4 }
 0x1f0   :  { %2284 = vst.msk [vmem:[%s4679_s3 + $0x28] sm:$0xf] %vm2273_vm1, %v2647_v43  ;;  %v2648_v14 = vpack.c.bf16 %v2032_v44, %v2032_v44  ;;  %v1926_v5 = vmax.f32 %v1442_v11, %v1763_v33  ;;  %v1443_v23 = vmax.f32 %v4802_v45, %v1282_v24  ;;  %v3094_v12 = vpop.f32.mrb[127].mxu0  ;;  %v3210_v13 = vpop.f32.mrb[127].mxu1 }
 0x1f2   :  { %2285 = vst.msk [vmem:[%s4679_s3 + $0x2c] sm:$0xf] %vm2273_vm1, %v2648_v14  ;;  %v1983_v18 = vadd.f32 %v4277_v38, %v1926_v5  ;;  %v1927_v22 = vmax.f32 %v1443_v23, %v1766_v25 }
 0x1f4   :  { %v2033_v48 = vmax.f32 %v1983_v18, 0.0  ;;  %v1984_v49 = vadd.f32 %v4277_v38, %v1927_v22 }
 0x1f5   :  { %v1287_v31 = vpop.f32.mrb[128].mxu0  ;;  %v1771_v32 = vpop.f32.mrb[128].mxu1 }
 0x1f6   :  { %v2649_v17 = vpack.c.bf16 %v2033_v48, %v2033_v48  ;;  %v2034_v50 = vmax.f32 %v1984_v49, 0.0  ;;  %v1444_v35 = vmax.f32 %v4803_v34, %v1287_v31  ;;  %v3097_v63 = vpop.f32.mrb[129].mxu0  ;;  %v3213_v21 = vpop.f32.mrb[129].mxu1  ;;  %v4808_v31 = vmax.f32 %v3955_v52, %v3957_v53 }
 0x1f7   :  { %v1290_v55 = vpop.f32.mrb[130].mxu0  ;;  %v1774_v56 = vpop.f32.mrb[130].mxu1  ;;  %v4809_v52 = vmax.f32 %v3965_v27, %v3967_v28 }
 0x1f8   :  { %2286 = vst.msk [vmem:[%s4679_s3 + $0x30] sm:$0xf] %vm2273_vm1, %v2649_v17  ;;  %v2650_v1 = vpack.c.bf16 %v2034_v50, %v2034_v50  ;;  %v1928_v57 = vmax.f32 %v1444_v35, %v1771_v32  ;;  %v1445_v20 = vmax.f32 %v4804_v19, %v1290_v55  ;;  %v3098_v62 = vpop.f32.mrb[131].mxu0  ;;  %v3214_v15 = vpop.f32.mrb[131].mxu1 }
 0x1fa   :  { %2287 = vst.msk [vmem:[%s4679_s3 + $0x34] sm:$0xf] %vm2273_vm1, %v2650_v1  ;;  %v1985_v42 = vadd.f32 %v4277_v38, %v1928_v57  ;;  %v1929_v46 = vmax.f32 %v1445_v20, %v1774_v56 }
 0x1fc   :  { %v2035_v36 = vmax.f32 %v1985_v42, 0.0  ;;  %v1986_v37 = vadd.f32 %v4277_v38, %v1929_v46  ;;  %v4810_v42 = vmax.f32 %v3977_v29, %v3979_v30  ;;  %v4811_v29 = vmax.f32 %v3987_v39, %v3989_v47 }
 0x1fd   :  { %v1295_v51 = vpop.f32.mrb[132].mxu0  ;;  %v1779_v0 = vpop.f32.mrb[132].mxu1 }
 0x1fe   :  { %v2651_v60 = vpack.c.bf16 %v2035_v36, %v2035_v36  ;;  %v2036_v61 = vmax.f32 %v1986_v37, 0.0  ;;  %v1446_v59 = vmax.f32 %v4805_v58, %v1295_v51  ;;  %v3101_v2 = vpop.f32.mrb[133].mxu0  ;;  %v3217_v7 = vpop.f32.mrb[133].mxu1 }
 0x1ff   :  { %v1298_v8 = vpop.f32.mrb[134].mxu0  ;;  %v1782_v33 = vpop.f32.mrb[134].mxu1 }
 0x200   :  { %2288 = vst.msk [vmem:[%s4679_s3 + $0x38] sm:$0xf] %vm2273_vm1, %v2651_v60  ;;  %v2652_v43 = vpack.c.bf16 %v2036_v61, %v2036_v61  ;;  %v1930_v44 = vmax.f32 %v1446_v59, %v1779_v0  ;;  %v1447_v11 = vmax.f32 %v4806_v10, %v1298_v8  ;;  %v3102_v9 = vpop.f32.mrb[135].mxu0  ;;  %v3218_v26 = vpop.f32.mrb[135].mxu1  ;;  %v4812_v10 = vld [vmem:[#allocation2_spill] sm:$0xff] }
 0x202   :  { %2289 = vst.msk [vmem:[%s4679_s3 + $0x3c] sm:$0xf] %vm2273_vm1, %v2652_v43  ;;  %v1987_v6 = vadd.f32 %v4277_v38, %v1930_v44  ;;  %v1931_v16 = vmax.f32 %v1447_v11, %v1782_v33  ;;  %v4813_v11 = vmax.f32 %v3999_v3, %v4812_v10  ;;  %v4815_v3 = vld [vmem:[#allocation4_spill] sm:$0xff] }
 0x204   :  { %v2037_v24 = vmax.f32 %v1987_v6, 0.0  ;;  %v1988_v25 = vadd.f32 %v4277_v38, %v1931_v16 }
 0x205   :  { %v1303_v14 = vpop.f32.mrb[136].mxu0  ;;  %v1787_v5 = vpop.f32.mrb[136].mxu1 }
 0x206   :  { %v2653_v45 = vpack.c.bf16 %v2037_v24, %v2037_v24  ;;  %v2038_v23 = vmax.f32 %v1988_v25, 0.0  ;;  %v1448_v41 = vmax.f32 %v4807_v40, %v1303_v14  ;;  %v3105_v12 = vpop.f32.mrb[137].mxu0  ;;  %v3221_v13 = vpop.f32.mrb[137].mxu1 }
 0x207   :  { %v1306_v18 = vpop.f32.mrb[138].mxu0  ;;  %v1790_v22 = vpop.f32.mrb[138].mxu1 }
 0x208   :  { %2290 = vst.msk [vmem:[%s4679_s3 + $0x40] sm:$0xf] %vm2273_vm1, %v2653_v45  ;;  %v2654_v48 = vpack.c.bf16 %v2038_v23, %v2038_v23  ;;  %v1932_v49 = vmax.f32 %v1448_v41, %v1787_v5  ;;  %v1449_v32 = vmax.f32 %v4808_v31, %v1306_v18  ;;  %v3106_v17 = vpop.f32.mrb[139].mxu0  ;;  %v3222_v50 = vpop.f32.mrb[139].mxu1  ;;  %v4814_v23 = vld [vmem:[#allocation3_spill] sm:$0xff]  ;;  %v4817_v31 = vld [vmem:[#allocation5_spill] sm:$0xff] }
 0x209   :  { %v4816_v40 = vmax.f32 %v4814_v23, %v4815_v3 }
 0x20a   :  { %2291 = vst.msk [vmem:[%s4679_s3 + $0x44] sm:$0xf] %vm2273_vm1, %v2654_v48  ;;  %v1989_v54 = vadd.f32 %v4277_v38, %v1932_v49  ;;  %v1933_v4 = vmax.f32 %v1449_v32, %v1790_v22  ;;  %v4818_v32 = vld [vmem:[#allocation6_spill] sm:$0xff] }
 0x20b   :  { %v4819_v17 = vmax.f32 %v4817_v31, %v4818_v32  ;;  %v4833_v31 = vld [vmem:[#allocation16_spill] sm:$0xff] }
 0x20c   :  { %v2039_v34 = vmax.f32 %v1989_v54, 0.0  ;;  %v1990_v35 = vadd.f32 %v4277_v38, %v1933_v4 }
 0x20d   :  { %v1311_v63 = vpop.f32.mrb[140].mxu0  ;;  %v1795_v21 = vpop.f32.mrb[140].mxu1 }
 0x20e   :  { %v2655_v55 = vpack.c.bf16 %v2039_v34, %v2039_v34  ;;  %v2040_v56 = vmax.f32 %v1990_v35, 0.0  ;;  %v1450_v53 = vmax.f32 %v4809_v52, %v1311_v63  ;;  %v3109_v1 = vpop.f32.mrb[141].mxu0  ;;  %v3225_v57 = vpop.f32.mrb[141].mxu1 }
 0x20f   :  { %v1314_v19 = vpop.f32.mrb[142].mxu0  ;;  %v1798_v20 = vpop.f32.mrb[142].mxu1  ;;  %v4820_v1 = vld [vmem:[#allocation7_spill] sm:$0xff]  ;;  %v4821_v57 = vld [vmem:[#allocation8_spill] sm:$0xff] }
 0x210   :  { %2292 = vst.msk [vmem:[%s4679_s3 + $0x48] sm:$0xf] %vm2273_vm1, %v2655_v55  ;;  %v2656_v62 = vpack.c.bf16 %v2040_v56, %v2040_v56  ;;  %v1934_v15 = vmax.f32 %v1450_v53, %v1795_v21  ;;  %v1451_v46 = vmax.f32 %v4810_v42, %v1314_v19  ;;  %v3110_v36 = vpop.f32.mrb[143].mxu0  ;;  %v3226_v37 = vpop.f32.mrb[143].mxu1  ;;  %v4822_v19 = vmax.f32 %v4820_v1, %v4821_v57 }
 0x212   :  { %2293 = vst.msk [vmem:[%s4679_s3 + $0x4c] sm:$0xf] %vm2273_vm1, %v2656_v62  ;;  %v1991_v27 = vadd.f32 %v4277_v38, %v1934_v15  ;;  %v1935_v28 = vmax.f32 %v1451_v46, %v1798_v20 }
 0x214   :  { %v2041_v51 = vmax.f32 %v1991_v27, 0.0  ;;  %v1992_v0 = vadd.f32 %v4277_v38, %v1935_v28  ;;  %v4823_v27 = vld [vmem:[#allocation9_spill] sm:$0xff]  ;;  %v4824_v28 = vld [vmem:[#allocation10_spill] sm:$0xff] }
 0x215   :  { %v1319_v60 = vpop.f32.mrb[144].mxu0  ;;  %v1803_v61 = vpop.f32.mrb[144].mxu1 }
 0x216   :  { %v2657_v58 = vpack.c.bf16 %v2041_v51, %v2041_v51  ;;  %v2042_v59 = vmax.f32 %v1992_v0, 0.0  ;;  %v1452_v30 = vmax.f32 %v4811_v29, %v1319_v60  ;;  %v3113_v2 = vpop.f32.mrb[145].mxu0  ;;  %v3229_v7 = vpop.f32.mrb[145].mxu1  ;;  %v4825_v51 = vmax.f32 %v4823_v27, %v4824_v28  ;;  %v4839_v27 = vld [vmem:[#allocation20_spill] sm:$0xff] }
 0x217   :  { %v1322_v8 = vpop.f32.mrb[146].mxu0  ;;  %v1806_v33 = vpop.f32.mrb[146].mxu1 }
 0x218   :  { %2294 = vst.msk [vmem:[%s4679_s3 + $0x50] sm:$0xf] %vm2273_vm1, %v2657_v58  ;;  %v2658_v43 = vpack.c.bf16 %v2042_v59, %v2042_v59  ;;  %v1936_v44 = vmax.f32 %v1452_v30, %v1803_v61  ;;  %v1453_v9 = vmax.f32 %v4813_v11, %v1322_v8  ;;  %v3114_v26 = vpop.f32.mrb[147].mxu0  ;;  %v3230_v6 = vpop.f32.mrb[147].mxu1 }
 0x21a   :  { %2295 = vst.msk [vmem:[%s4679_s3 + $0x54] sm:$0xf] %vm2273_vm1, %v2658_v43  ;;  %v1993_v39 = vadd.f32 %v4277_v38, %v1936_v44  ;;  %v1937_v47 = vmax.f32 %v1453_v9, %v1806_v33  ;;  %v4826_v43 = vld [vmem:[#allocation11_spill] sm:$0xff]  ;;  %v4827_v44 = vld [vmem:[#allocation12_spill] sm:$0xff] }
 0x21b   :  { %v4828_v10 = vmax.f32 %v4826_v43, %v4827_v44 }
 0x21c   :  { %v2043_v16 = vmax.f32 %v1993_v39, 0.0  ;;  %v1994_v24 = vadd.f32 %v4277_v38, %v1937_v47 }
 0x21d   :  { %v1327_v25 = vpop.f32.mrb[148].mxu0  ;;  %v1811_v14 = vpop.f32.mrb[148].mxu1 }
 0x21e   :  { %v2659_v5 = vpack.c.bf16 %v2043_v16, %v2043_v16  ;;  %v2044_v45 = vmax.f32 %v1994_v24, 0.0  ;;  %v1454_v41 = vmax.f32 %v4816_v40, %v1327_v25  ;;  %v3117_v12 = vpop.f32.mrb[149].mxu0  ;;  %v3233_v13 = vpop.f32.mrb[149].mxu1  ;;  %v4829_v24 = vld [vmem:[#allocation13_spill] sm:$0xff]  ;;  %v4830_v25 = vld [vmem:[#allocation14_spill] sm:$0xff] }
 0x21f   :  { %v1330_v18 = vpop.f32.mrb[150].mxu0  ;;  %v1814_v22 = vpop.f32.mrb[150].mxu1 }
 0x220   :  { %2296 = vst.msk [vmem:[%s4679_s3 + $0x58] sm:$0xf] %vm2273_vm1, %v2659_v5  ;;  %v2660_v48 = vpack.c.bf16 %v2044_v45, %v2044_v45  ;;  %v1938_v49 = vmax.f32 %v1454_v41, %v1811_v14  ;;  %v1455_v50 = vmax.f32 %v4819_v17, %v1330_v18  ;;  %v3118_v54 = vpop.f32.mrb[151].mxu0  ;;  %v3234_v4 = vpop.f32.mrb[151].mxu1  ;;  %v4831_v14 = vmax.f32 %v4829_v24, %v4830_v25  ;;  %v4845_v24 = vld [vmem:[#allocation24_spill] sm:$0xff] }
 0x222   :  { %2297 = vst.msk [vmem:[%s4679_s3 + $0x5c] sm:$0xf] %vm2273_vm1, %v2660_v48  ;;  %v1995_v34 = vadd.f32 %v4277_v38, %v1938_v49  ;;  %v1939_v35 = vmax.f32 %v1455_v50, %v1814_v22  ;;  %v4832_v49 = vld [vmem:[#allocation15_spill] sm:$0xff] }
 0x223   :  { %v4834_v32 = vmax.f32 %v4832_v49, %v4833_v31 }
 0x224   :  { %v2045_v63 = vmax.f32 %v1995_v34, 0.0  ;;  %v1996_v21 = vadd.f32 %v4277_v38, %v1939_v35 }
 0x225   :  { %v1335_v55 = vpop.f32.mrb[152].mxu0  ;;  %v1819_v56 = vpop.f32.mrb[152].mxu1 }
 0x226   :  { %v2661_v52 = vpack.c.bf16 %v2045_v63, %v2045_v63  ;;  %v2046_v53 = vmax.f32 %v1996_v21, 0.0  ;;  %v1456_v20 = vmax.f32 %v4822_v19, %v1335_v55  ;;  %v3121_v62 = vpop.f32.mrb[153].mxu0  ;;  %v3237_v15 = vpop.f32.mrb[153].mxu1  ;;  %v4835_v21 = vld [vmem:[#allocation17_spill] sm:$0xff]  ;;  %v4836_v55 = vld [vmem:[#allocation18_spill] sm:$0xff] }
 0x227   :  { %v1338_v42 = vpop.f32.mrb[154].mxu0  ;;  %v1822_v46 = vpop.f32.mrb[154].mxu1 }
 0x228   :  { %2298 = vst.msk [vmem:[%s4679_s3 + $0x60] sm:$0xf] %vm2273_vm1, %v2661_v52  ;;  %v2662_v36 = vpack.c.bf16 %v2046_v53, %v2046_v53  ;;  %v1940_v37 = vmax.f32 %v1456_v20, %v1819_v56  ;;  %v1457_v0 = vmax.f32 %v4825_v51, %v1338_v42  ;;  %v3122_v60 = vpop.f32.mrb[155].mxu0  ;;  %v3238_v61 = vpop.f32.mrb[155].mxu1  ;;  %v4837_v56 = vmax.f32 %v4835_v21, %v4836_v55  ;;  %v4851_v21 = vld [vmem:[#allocation28_spill] sm:$0xff] }
 0x22a   :  { %2299 = vst.msk [vmem:[%s4679_s3 + $0x64] sm:$0xf] %vm2273_vm1, %v2662_v36  ;;  %v1997_v58 = vadd.f32 %v4277_v38, %v1940_v37  ;;  %v1941_v59 = vmax.f32 %v1457_v0, %v1822_v46  ;;  %v4838_v37 = vld [vmem:[#allocation19_spill] sm:$0xff] }
 0x22b   :  { %v4840_v28 = vmax.f32 %v4838_v37, %v4839_v27 }
 0x22c   :  { %v2047_v29 = vmax.f32 %v1997_v58, 0.0  ;;  %v1998_v30 = vadd.f32 %v4277_v38, %v1941_v59 }
 0x22d   :  { %v1343_v2 = vpop.f32.mrb[156].mxu0  ;;  %v1827_v7 = vpop.f32.mrb[156].mxu1 }
 0x22e   :  { %v2663_v8 = vpack.c.bf16 %v2047_v29, %v2047_v29  ;;  %v2048_v33 = vmax.f32 %v1998_v30, 0.0  ;;  %v1458_v11 = vmax.f32 %v4828_v10, %v1343_v2  ;;  %v3125_v9 = vpop.f32.mrb[157].mxu0  ;;  %v3241_v26 = vpop.f32.mrb[157].mxu1  ;;  %v4841_v30 = vld [vmem:[#allocation21_spill] sm:$0xff]  ;;  %v4842_v2 = vld [vmem:[#allocation22_spill] sm:$0xff] }
 0x22f   :  { %v1346_v6 = vpop.f32.mrb[158].mxu0  ;;  %v1830_v39 = vpop.f32.mrb[158].mxu1 }
 0x230   :  { %2300 = vst.msk [vmem:[%s4679_s3 + $0x68] sm:$0xf] %vm2273_vm1, %v2663_v8  ;;  %v2664_v47 = vpack.c.bf16 %v2048_v33, %v2048_v33  ;;  %v1942_v16 = vmax.f32 %v1458_v11, %v1827_v7  ;;  %v1459_v5 = vmax.f32 %v4831_v14, %v1346_v6  ;;  %v3126_v45 = vpop.f32.mrb[159].mxu0  ;;  %v3242_v23 = vpop.f32.mrb[159].mxu1  ;;  %v4843_v7 = vmax.f32 %v4841_v30, %v4842_v2  ;;  %v4857_v30 = vld [vmem:[#allocation32_spill] sm:$0xff] }
 0x232   :  { %2301 = vst.msk [vmem:[%s4679_s3 + $0x6c] sm:$0xf] %vm2273_vm1, %v2664_v47  ;;  %v1999_v3 = vadd.f32 %v4277_v38, %v1942_v16  ;;  %v1943_v40 = vmax.f32 %v1459_v5, %v1830_v39  ;;  %v4844_v16 = vld [vmem:[#allocation23_spill] sm:$0xff] }
 0x233   :  { %v4846_v25 = vmax.f32 %v4844_v16, %v4845_v24 }
 0x234   :  { %v2049_v41 = vmax.f32 %v1999_v3, 0.0  ;;  %v2000_v12 = vadd.f32 %v4277_v38, %v1943_v40 }
 0x235   :  { %v1351_v13 = vpop.f32.mrb[160].mxu0  ;;  %v1835_v18 = vpop.f32.mrb[160].mxu1 }
 0x236   :  { %v2665_v22 = vpack.c.bf16 %v2049_v41, %v2049_v41  ;;  %v2050_v48 = vmax.f32 %v2000_v12, 0.0  ;;  %v1460_v17 = vmax.f32 %v4834_v32, %v1351_v13  ;;  %v3129_v50 = vpop.f32.mrb[161].mxu0  ;;  %v3245_v54 = vpop.f32.mrb[161].mxu1  ;;  %v4847_v12 = vld [vmem:[#allocation25_spill] sm:$0xff]  ;;  %v4848_v13 = vld [vmem:[#allocation26_spill] sm:$0xff] }
 0x237   :  { %v1354_v4 = vpop.f32.mrb[162].mxu0  ;;  %v1838_v34 = vpop.f32.mrb[162].mxu1 }
 0x238   :  { %2302 = vst.msk [vmem:[%s4679_s3 + $0x70] sm:$0xf] %vm2273_vm1, %v2665_v22  ;;  %v2666_v35 = vpack.c.bf16 %v2050_v48, %v2050_v48  ;;  %v1944_v63 = vmax.f32 %v1460_v17, %v1835_v18  ;;  %v1461_v52 = vmax.f32 %v4837_v56, %v1354_v4  ;;  %v3130_v53 = vpop.f32.mrb[163].mxu0  ;;  %v3246_v1 = vpop.f32.mrb[163].mxu1  ;;  %v4849_v18 = vmax.f32 %v4847_v12, %v4848_v13  ;;  %v4863_v12 = vld [vmem:[#allocation36_spill] sm:$0xff] }
 0x23a   :  { %2303 = vst.msk [vmem:[%s4679_s3 + $0x74] sm:$0xf] %vm2273_vm1, %v2666_v35  ;;  %v2001_v57 = vadd.f32 %v4277_v38, %v1944_v63  ;;  %v1945_v19 = vmax.f32 %v1461_v52, %v1838_v34  ;;  %v4850_v63 = vld [vmem:[#allocation27_spill] sm:$0xff] }
 0x23b   :  { %v4852_v55 = vmax.f32 %v4850_v63, %v4851_v21 }
 0x23c   :  { %v2051_v20 = vmax.f32 %v2001_v57, 0.0  ;;  %v2002_v62 = vadd.f32 %v4277_v38, %v1945_v19 }
 0x23d   :  { %v1359_v15 = vpop.f32.mrb[164].mxu0  ;;  %v1843_v42 = vpop.f32.mrb[164].mxu1 }
 0x23e   :  { %v2667_v46 = vpack.c.bf16 %v2051_v20, %v2051_v20  ;;  %v2052_v36 = vmax.f32 %v2002_v62, 0.0  ;;  %v1462_v51 = vmax.f32 %v4840_v28, %v1359_v15  ;;  %v3133_v0 = vpop.f32.mrb[165].mxu0  ;;  %v3249_v60 = vpop.f32.mrb[165].mxu1  ;;  %v4853_v62 = vld [vmem:[#allocation29_spill] sm:$0xff]  ;;  %v4854_v15 = vld [vmem:[#allocation30_spill] sm:$0xff] }
 0x23f   :  { %v1362_v61 = vpop.f32.mrb[166].mxu0  ;;  %v1846_v58 = vpop.f32.mrb[166].mxu1 }
 0x240   :  { %2304 = vst.msk [vmem:[%s4679_s3 + $0x78] sm:$0xf] %vm2273_vm1, %v2667_v46  ;;  %v2668_v59 = vpack.c.bf16 %v2052_v36, %v2052_v36  ;;  %v1946_v29 = vmax.f32 %v1462_v51, %v1843_v42  ;;  %v1463_v8 = vmax.f32 %v4843_v7, %v1362_v61  ;;  %v3134_v33 = vpop.f32.mrb[167].mxu0  ;;  %v3250_v43 = vpop.f32.mrb[167].mxu1  ;;  %v4855_v42 = vmax.f32 %v4853_v62, %v4854_v15  ;;  %v4869_v62 = vld [vmem:[#allocation40_spill] sm:$0xff] }
 0x242   :  { %2305 = vst.msk [vmem:[%s4679_s3 + $0x7c] sm:$0xf] %vm2273_vm1, %v2668_v59  ;;  %v2003_v44 = vadd.f32 %v4277_v38, %v1946_v29  ;;  %v1947_v10 = vmax.f32 %v1463_v8, %v1846_v58  ;;  %v4856_v29 = vld [vmem:[#allocation31_spill] sm:$0xff] }
 0x243   :  { %v4858_v2 = vmax.f32 %v4856_v29, %v4857_v30 }
 0x244   :  { %v2053_v11 = vmax.f32 %v2003_v44, 0.0  ;;  %v2004_v9 = vadd.f32 %v4277_v38, %v1947_v10 }
 0x245   :  { %v1367_v26 = vpop.f32.mrb[168].mxu0  ;;  %v1851_v6 = vpop.f32.mrb[168].mxu1 }
 0x246   :  { %v2669_v39 = vpack.c.bf16 %v2053_v11, %v2053_v11  ;;  %v2054_v47 = vmax.f32 %v2004_v9, 0.0  ;;  %v1464_v14 = vmax.f32 %v4846_v25, %v1367_v26  ;;  %v3137_v5 = vpop.f32.mrb[169].mxu0  ;;  %v3253_v45 = vpop.f32.mrb[169].mxu1  ;;  %v4859_v9 = vld [vmem:[#allocation33_spill] sm:$0xff]  ;;  %v4860_v26 = vld [vmem:[#allocation34_spill] sm:$0xff] }
 0x247   :  { %v1370_v23 = vpop.f32.mrb[170].mxu0  ;;  %v1854_v3 = vpop.f32.mrb[170].mxu1 }
 0x248   :  { %2306 = vst.msk [vmem:[%s4679_s3 + $0x80] sm:$0xf] %vm2273_vm1, %v2669_v39  ;;  %v2670_v40 = vpack.c.bf16 %v2054_v47, %v2054_v47  ;;  %v1948_v41 = vmax.f32 %v1464_v14, %v1851_v6  ;;  %v1465_v22 = vmax.f32 %v4849_v18, %v1370_v23  ;;  %v3138_v48 = vpop.f32.mrb[171].mxu0  ;;  %v3254_v49 = vpop.f32.mrb[171].mxu1  ;;  %v4861_v6 = vmax.f32 %v4859_v9, %v4860_v26  ;;  %v4875_v9 = vld [vmem:[#allocation44_spill] sm:$0xff] }
 0x24a   :  { %2307 = vst.msk [vmem:[%s4679_s3 + $0x84] sm:$0xf] %vm2273_vm1, %v2670_v40  ;;  %v2005_v31 = vadd.f32 %v4277_v38, %v1948_v41  ;;  %v1949_v32 = vmax.f32 %v1465_v22, %v1854_v3  ;;  %v4862_v41 = vld [vmem:[#allocation35_spill] sm:$0xff] }
 0x24b   :  { %v4864_v13 = vmax.f32 %v4862_v41, %v4863_v12 }
 0x24c   :  { %v2055_v17 = vmax.f32 %v2005_v31, 0.0  ;;  %v2006_v50 = vadd.f32 %v4277_v38, %v1949_v32 }
 0x24d   :  { %v1375_v54 = vpop.f32.mrb[172].mxu0  ;;  %v1859_v4 = vpop.f32.mrb[172].mxu1 }
 0x24e   :  { %v2671_v34 = vpack.c.bf16 %v2055_v17, %v2055_v17  ;;  %v2056_v35 = vmax.f32 %v2006_v50, 0.0  ;;  %v1466_v56 = vmax.f32 %v4852_v55, %v1375_v54  ;;  %v3141_v52 = vpop.f32.mrb[173].mxu0  ;;  %v3257_v53 = vpop.f32.mrb[173].mxu1  ;;  %v4865_v50 = vld [vmem:[#allocation37_spill] sm:$0xff]  ;;  %v4866_v54 = vld [vmem:[#allocation38_spill] sm:$0xff] }
 0x24f   :  { %v1378_v1 = vpop.f32.mrb[174].mxu0  ;;  %v1862_v57 = vpop.f32.mrb[174].mxu1 }
 0x250   :  { %2308 = vst.msk [vmem:[%s4679_s3 + $0x88] sm:$0xf] %vm2273_vm1, %v2671_v34  ;;  %v2672_v19 = vpack.c.bf16 %v2056_v35, %v2056_v35  ;;  %v1950_v20 = vmax.f32 %v1466_v56, %v1859_v4  ;;  %v1467_v46 = vmax.f32 %v4855_v42, %v1378_v1  ;;  %v3142_v36 = vpop.f32.mrb[175].mxu0  ;;  %v3258_v37 = vpop.f32.mrb[175].mxu1  ;;  %v4867_v4 = vmax.f32 %v4865_v50, %v4866_v54  ;;  %v4881_v50 = vld [vmem:[#allocation48_spill] sm:$0xff] }
 0x252   :  { %2309 = vst.msk [vmem:[%s4679_s3 + $0x8c] sm:$0xf] %vm2273_vm1, %v2672_v19  ;;  %v2007_v27 = vadd.f32 %v4277_v38, %v1950_v20  ;;  %v1951_v28 = vmax.f32 %v1467_v46, %v1862_v57  ;;  %v4868_v20 = vld [vmem:[#allocation39_spill] sm:$0xff] }
 0x253   :  { %v4870_v15 = vmax.f32 %v4868_v20, %v4869_v62 }
 0x254   :  { %v2057_v51 = vmax.f32 %v2007_v27, 0.0  ;;  %v2008_v0 = vadd.f32 %v4277_v38, %v1951_v28 }
 0x255   :  { %v1383_v60 = vpop.f32.mrb[176].mxu0  ;;  %v1867_v61 = vpop.f32.mrb[176].mxu1 }
 0x256   :  { %v2673_v58 = vpack.c.bf16 %v2057_v51, %v2057_v51  ;;  %v2058_v59 = vmax.f32 %v2008_v0, 0.0  ;;  %v1468_v7 = vmax.f32 %v4858_v2, %v1383_v60  ;;  %v3145_v8 = vpop.f32.mrb[177].mxu0  ;;  %v3261_v33 = vpop.f32.mrb[177].mxu1  ;;  %v4871_v0 = vld [vmem:[#allocation41_spill] sm:$0xff]  ;;  %v4872_v60 = vld [vmem:[#allocation42_spill] sm:$0xff] }
 0x257   :  { %v1386_v43 = vpop.f32.mrb[178].mxu0  ;;  %v1870_v44 = vpop.f32.mrb[178].mxu1 }
 0x258   :  { %2310 = vst.msk [vmem:[%s4679_s3 + $0x90] sm:$0xf] %vm2273_vm1, %v2673_v58  ;;  %v2674_v10 = vpack.c.bf16 %v2058_v59, %v2058_v59  ;;  %v1952_v11 = vmax.f32 %v1468_v7, %v1867_v61  ;;  %v1469_v39 = vmax.f32 %v4861_v6, %v1386_v43  ;;  %v3146_v47 = vpop.f32.mrb[179].mxu0  ;;  %v3262_v16 = vpop.f32.mrb[179].mxu1  ;;  %v4873_v61 = vmax.f32 %v4871_v0, %v4872_v60  ;;  %v4887_v0 = vld [vmem:[#allocation52_spill] sm:$0xff] }
 0x25a   :  { %2311 = vst.msk [vmem:[%s4679_s3 + $0x94] sm:$0xf] %vm2273_vm1, %v2674_v10  ;;  %v2009_v24 = vadd.f32 %v4277_v38, %v1952_v11  ;;  %v1953_v25 = vmax.f32 %v1469_v39, %v1870_v44  ;;  %v4874_v11 = vld [vmem:[#allocation43_spill] sm:$0xff] }
 0x25b   :  { %v4876_v26 = vmax.f32 %v4874_v11, %v4875_v9 }
 0x25c   :  { %v2059_v14 = vmax.f32 %v2009_v24, 0.0  ;;  %v2010_v5 = vadd.f32 %v4277_v38, %v1953_v25 }
 0x25d   :  { %v1391_v45 = vpop.f32.mrb[180].mxu0  ;;  %v1875_v23 = vpop.f32.mrb[180].mxu1 }
 0x25e   :  { %v2675_v3 = vpack.c.bf16 %v2059_v14, %v2059_v14  ;;  %v2060_v40 = vmax.f32 %v2010_v5, 0.0  ;;  %v1470_v18 = vmax.f32 %v4864_v13, %v1391_v45  ;;  %v3149_v22 = vpop.f32.mrb[181].mxu0  ;;  %v3265_v48 = vpop.f32.mrb[181].mxu1  ;;  %v4877_v5 = vld [vmem:[#allocation45_spill] sm:$0xff]  ;;  %v4878_v45 = vld [vmem:[#allocation46_spill] sm:$0xff] }
 0x25f   :  { %v1394_v49 = vpop.f32.mrb[182].mxu0  ;;  %v1878_v31 = vpop.f32.mrb[182].mxu1 }
 0x260   :  { %2312 = vst.msk [vmem:[%s4679_s3 + $0x98] sm:$0xf] %vm2273_vm1, %v2675_v3  ;;  %v2676_v32 = vpack.c.bf16 %v2060_v40, %v2060_v40  ;;  %v1954_v17 = vmax.f32 %v1470_v18, %v1875_v23  ;;  %v1471_v34 = vmax.f32 %v4867_v4, %v1394_v49  ;;  %v3150_v35 = vpop.f32.mrb[183].mxu0  ;;  %v3266_v63 = vpop.f32.mrb[183].mxu1  ;;  %v4879_v23 = vmax.f32 %v4877_v5, %v4878_v45 }
 0x262   :  { %2313 = vst.msk [vmem:[%s4679_s3 + $0x9c] sm:$0xf] %vm2273_vm1, %v2676_v32  ;;  %v2011_v21 = vadd.f32 %v4277_v38, %v1954_v17  ;;  %v1955_v55 = vmax.f32 %v1471_v34, %v1878_v31  ;;  %v4880_v17 = vld [vmem:[#allocation47_spill] sm:$0xff] }
 0x263   :  { %v4882_v54 = vmax.f32 %v4880_v17, %v4881_v50 }
 0x264   :  { %v2061_v56 = vmax.f32 %v2011_v21, 0.0  ;;  %v2012_v52 = vadd.f32 %v4277_v38, %v1955_v55 }
 0x265   :  { %v1399_v53 = vpop.f32.mrb[184].mxu0  ;;  %v1883_v1 = vpop.f32.mrb[184].mxu1 }
 0x266   :  { %v2677_v57 = vpack.c.bf16 %v2061_v56, %v2061_v56  ;;  %v2062_v19 = vmax.f32 %v2012_v52, 0.0  ;;  %v1472_v42 = vmax.f32 %v4870_v15, %v1399_v53  ;;  %v3153_v46 = vpop.f32.mrb[185].mxu0  ;;  %v3269_v36 = vpop.f32.mrb[185].mxu1  ;;  %v4883_v52 = vld [vmem:[#allocation49_spill] sm:$0xff]  ;;  %v4884_v53 = vld [vmem:[#allocation50_spill] sm:$0xff] }
 0x267   :  { %v1402_v37 = vpop.f32.mrb[186].mxu0  ;;  %v1886_v27 = vpop.f32.mrb[186].mxu1 }
 0x268   :  { %2314 = vst.msk [vmem:[%s4679_s3 + $0xa0] sm:$0xf] %vm2273_vm1, %v2677_v57  ;;  %v2678_v28 = vpack.c.bf16 %v2062_v19, %v2062_v19  ;;  %v1956_v51 = vmax.f32 %v1472_v42, %v1883_v1  ;;  %v1473_v58 = vmax.f32 %v4873_v61, %v1402_v37  ;;  %v3154_v59 = vpop.f32.mrb[187].mxu0  ;;  %v3270_v29 = vpop.f32.mrb[187].mxu1  ;;  %v4885_v1 = vmax.f32 %v4883_v52, %v4884_v53 }
 0x26a   :  { %2315 = vst.msk [vmem:[%s4679_s3 + $0xa4] sm:$0xf] %vm2273_vm1, %v2678_v28  ;;  %v2013_v30 = vadd.f32 %v4277_v38, %v1956_v51  ;;  %v1957_v2 = vmax.f32 %v1473_v58, %v1886_v27  ;;  %v4886_v51 = vld [vmem:[#allocation51_spill] sm:$0xff] }
 0x26b   :  { %v4888_v60 = vmax.f32 %v4886_v51, %v4887_v0 }
 0x26c   :  { %v2063_v7 = vmax.f32 %v2013_v30, 0.0  ;;  %v2014_v8 = vadd.f32 %v4277_v38, %v1957_v2 }
 0x26d   :  { %v1407_v33 = vpop.f32.mrb[188].mxu0  ;;  %v1891_v43 = vpop.f32.mrb[188].mxu1 }
 0x26e   :  { %v2679_v44 = vpack.c.bf16 %v2063_v7, %v2063_v7  ;;  %v2064_v10 = vmax.f32 %v2014_v8, 0.0  ;;  %v1474_v6 = vmax.f32 %v4876_v26, %v1407_v33  ;;  %v3157_v39 = vpop.f32.mrb[189].mxu0  ;;  %v3273_v47 = vpop.f32.mrb[189].mxu1  ;;  %v4889_v8 = vld [vmem:[#allocation53_spill] sm:$0xff]  ;;  %v4890_v33 = vld [vmem:[#allocation54_spill] sm:$0xff] }
 0x26f   :  { %v1410_v16 = vpop.f32.mrb[190].mxu0  ;;  %v1894_v24 = vpop.f32.mrb[190].mxu1 }
 0x270   :  { %2316 = vst.msk [vmem:[%s4679_s3 + $0xa8] sm:$0xf] %vm2273_vm1, %v2679_v44  ;;  %v2680_v25 = vpack.c.bf16 %v2064_v10, %v2064_v10  ;;  %v1958_v14 = vmax.f32 %v1474_v6, %v1891_v43  ;;  %v1475_v3 = vmax.f32 %v4879_v23, %v1410_v16  ;;  %v3158_v40 = vpop.f32.mrb[191].mxu0  ;;  %v3274_v41 = vpop.f32.mrb[191].mxu1  ;;  %v4891_v43 = vmax.f32 %v4889_v8, %v4890_v33 }
 0x272   :  { %2317 = vst.msk [vmem:[%s4679_s3 + $0xac] sm:$0xf] %vm2273_vm1, %v2680_v25  ;;  %v2015_v12 = vadd.f32 %v4277_v38, %v1958_v14  ;;  %v1959_v13 = vmax.f32 %v1475_v3, %v1894_v24 }
 0x274   :  { %v2065_v18 = vmax.f32 %v2015_v12, 0.0  ;;  %v2016_v22 = vadd.f32 %v4277_v38, %v1959_v13 }
 0x275   :  { %v1415_v48 = vpop.f32.mrb[192].mxu0  ;;  %v1899_v49 = vpop.f32.mrb[192].mxu1 }
 0x276   :  { %v2681_v31 = vpack.c.bf16 %v2065_v18, %v2065_v18  ;;  %v2066_v32 = vmax.f32 %v2016_v22, 0.0  ;;  %v1476_v4 = vmax.f32 %v4882_v54, %v1415_v48  ;;  %v3161_v34 = vpop.f32.mrb[193].mxu0  ;;  %v3277_v35 = vpop.f32.mrb[193].mxu1 }
 0x277   :  { %v1418_v63 = vpop.f32.mrb[194].mxu0  ;;  %v1902_v21 = vpop.f32.mrb[194].mxu1 }
 0x278   :  { %2318 = vst.msk [vmem:[%s4679_s3 + $0xb0] sm:$0xf] %vm2273_vm1, %v2681_v31  ;;  %v2682_v55 = vpack.c.bf16 %v2066_v32, %v2066_v32  ;;  %v1960_v56 = vmax.f32 %v1476_v4, %v1899_v49  ;;  %v1477_v57 = vmax.f32 %v4885_v1, %v1418_v63  ;;  %v3162_v19 = vpop.f32.mrb[195].mxu0  ;;  %v3278_v20 = vpop.f32.mrb[195].mxu1 }
 0x27a   :  { %2319 = vst.msk [vmem:[%s4679_s3 + $0xb4] sm:$0xf] %vm2273_vm1, %v2682_v55  ;;  %v2017_v62 = vadd.f32 %v4277_v38, %v1960_v56  ;;  %v1961_v15 = vmax.f32 %v1477_v57, %v1902_v21 }
 0x27c   :  { %v2067_v42 = vmax.f32 %v2017_v62, 0.0  ;;  %v2018_v46 = vadd.f32 %v4277_v38, %v1961_v15 }
 0x27d   :  { %v1423_v36 = vpop.f32.mrb[196].mxu0  ;;  %v1907_v37 = vpop.f32.mrb[196].mxu1 }
 0x27e   :  { %v2683_v27 = vpack.c.bf16 %v2067_v42, %v2067_v42  ;;  %v2068_v28 = vmax.f32 %v2018_v46, 0.0  ;;  %v1478_v61 = vmax.f32 %v4888_v60, %v1423_v36  ;;  %v3165_v58 = vpop.f32.mrb[197].mxu0  ;;  %v3281_v59 = vpop.f32.mrb[197].mxu1 }
 0x27f   :  { %v1426_v29 = vpop.f32.mrb[198].mxu0  ;;  %v1910_v30 = vpop.f32.mrb[198].mxu1 }
 0x280   :  { %2320 = vst.msk [vmem:[%s4679_s3 + $0xb8] sm:$0xf] %vm2273_vm1, %v2683_v27  ;;  %v2684_v2 = vpack.c.bf16 %v2068_v28, %v2068_v28  ;;  %v1962_v7 = vmax.f32 %v1478_v61, %v1907_v37  ;;  %v1479_v44 = vmax.f32 %v4891_v43, %v1426_v29  ;;  %v3166_v10 = vpop.f32.mrb[199].mxu0  ;;  %v3282_v11 = vpop.f32.mrb[199].mxu1 }
 0x282   :  { %2321 = vst.msk [vmem:[%s4679_s3 + $0xbc] sm:$0xf] %vm2273_vm1, %v2684_v2  ;;  %v2019_v9 = vadd.f32 %v4277_v38, %v1962_v7  ;;  %v1963_v26 = vmax.f32 %v1479_v44, %v1910_v30 }
 0x284   :  { %v2069_v6 = vmax.f32 %v2019_v9, 0.0  ;;  %v2020_v39 = vadd.f32 %v4277_v38, %v1963_v26 }
 0x286   :  { %v2685_v47 = vpack.c.bf16 %v2069_v6, %v2069_v6  ;;  %v2070_v16 = vmax.f32 %v2020_v39, 0.0 }
 0x288   :  { %2322 = vst.msk [vmem:[%s4679_s3 + $0xc0] sm:$0xf] %vm2273_vm1, %v2685_v47  ;;  %v2686_v24 = vpack.c.bf16 %v2070_v16, %v2070_v16 }
 0x28a   :  { %2323 = vst.msk [vmem:[%s4679_s3 + $0xc4] sm:$0xf] %vm2273_vm1, %v2686_v24 }

// kernel: net_forward.4
= control target key start
LH: loop header
LB: loop body
LE: loop exit
PB: predicated region body
PF: predicated region fallthrough
CT: control target
= control target key end

     0   :  { %vm677_vm0 = vcmask 125952   ;;  %s1338_s1 = inlined_call_operand.vmem [shape: bf16[256,16], index: 1, kind: input, shape index: {}]   ;;  %s1339_s0 = inlined_call_operand.vmem [shape: bf16[2,4,32,256], index: 0, kind: input, shape index: {}]   ;;  %s1340_s2 = inlined_call_operand.vmem [shape: f32[1,16], index: 2, kind: input, shape index: {}]   ;;  %s1341_s3 = inlined_call_operand.vmem [shape: bf16[2,32,16], index: 3, kind: output, shape index: {}]  }
   0x1   :  { %v939_v0 = vld [vmem:[%s1338_s1 + $0x40] sm:$0xff]   ;;  %v941_v2 = vld [vmem:[%s1338_s1 + $0x48] sm:$0xff]   ;;  %v943_v4 = vld [vmem:[%s1338_s1 + $0x50] sm:$0xff]  }
   0x2   :  { %v940_v1 = vld [vmem:[%s1338_s1] sm:$0xff]   ;;  %779 = vmatprep.subr.bf16.mxu0 %v939_v0  ;;  %819 = vmatprep.subr.bf16.mxu1 %v939_v0  ;;  %v942_v3 = vld [vmem:[%s1338_s1 + $0x8] sm:$0xff]   ;;  %v1041_v5 = vld [vmem:[%s1338_s1 + $0x10] sm:$0xff]  }
   0x3   :  { %780 = vmatpush3.bf16.msra.mxu0 %v940_v1  ;;  %820 = vmatpush3.bf16.msra.mxu1 %v940_v1  ;;  %v1046_v6 = vld [vmem:[%s1338_s1 + $0x58] sm:$0xff]   ;;  %v1060_v8 = vld [vmem:[%s1338_s1 + $0x60] sm:$0xff]   ;;  %v1074_v10 = vld [vmem:[%s1338_s1 + $0x68] sm:$0xff]  }
   0x4   :  { %781 = vmatprep.subr.bf16.mxu0 %v941_v2  ;;  %821 = vmatprep.subr.bf16.mxu1 %v941_v2  ;;  %v1053_v7 = vld [vmem:[%s1338_s1 + $0x18] sm:$0xff]   ;;  %v1067_v9 = vld [vmem:[%s1338_s1 + $0x20] sm:$0xff]   ;;  %v1087_v13 = vld [vmem:[%s1338_s1 + $0x28] sm:$0xff]  }
   0x5   :  { %v957_v11 = vld [vmem:[%s1339_s0 + $0x4] ss:$8 sps:$4 sm:$0xff]   ;;  %v1094_v14 = vld [vmem:[%s1338_s1 + $0x70] sm:$0xff]   ;;  %v1108_v16 = vld [vmem:[%s1338_s1 + $0x78] sm:$0xff]  }
   0x6   :  { %v960_v12 = vld [vmem:[%s1339_s0 + $0x24] ss:$8 sps:$4 sm:$0xff]   ;;  %223 = vmatprep.mubr.bf16.mxu0 %v957_v11  ;;  %v1101_v15 = vld [vmem:[%s1338_s1 + $0x30] sm:$0xff]   ;;  %v1115_v17 = vld [vmem:[%s1338_s1 + $0x38] sm:$0xff]  }
   0x7   :  { %782 = vmatpush3.bf16.msra.mxu0 %v942_v3  ;;  %822 = vmatpush3.bf16.msra.mxu1 %v942_v3  ;;  %v955_v18 = vld [vmem:[%s1339_s0] ss:$8 sps:$4 sm:$0xff]   ;;  %v961_v20 = vld [vmem:[%s1339_s0 + $0x14] ss:$8 sps:$4 sm:$0xff]   ;;  %v965_v22 = vld [vmem:[%s1339_s0 + $0x10] ss:$8 sps:$4 sm:$0xff]  }
   0x8   :  { %783 = vmatprep.subr.bf16.mxu0 %v943_v4  ;;  %823 = vmatprep.subr.bf16.mxu1 %v943_v4  ;;  %v958_v19 = vld [vmem:[%s1339_s0 + $0x20] ss:$8 sps:$4 sm:$0xff]   ;;  %v963_v21 = vld [vmem:[%s1339_s0 + $0x34] ss:$8 sps:$4 sm:$0xff]   ;;  %v966_v23 = vld [vmem:[%s1339_s0 + $0x30] ss:$8 sps:$4 sm:$0xff]  }
   0x9   :  { %337 = vmatprep.mubr.bf16.mxu1 %v960_v12  ;;  %v967_v24 = vld [vmem:[%s1339_s0 + $0x84] ss:$8 sps:$4 sm:$0xff]   ;;  %v971_v26 = vld [vmem:[%s1339_s0 + $0x80] ss:$8 sps:$4 sm:$0xff]   ;;  %v973_v28 = vld [vmem:[%s1339_s0 + $0x94] ss:$8 sps:$4 sm:$0xff]  }
   0xa   :  { %v969_v25 = vld [vmem:[%s1339_s0 + $0xa4] ss:$8 sps:$4 sm:$0xff]   ;;  %v972_v27 = vld [vmem:[%s1339_s0 + $0xa0] ss:$8 sps:$4 sm:$0xff]   ;;  %v975_v29 = vld [vmem:[%s1339_s0 + $0xb4] ss:$8 sps:$4 sm:$0xff]  }
   0xb   :  { %784 = vmatpush3.bf16.msra.mxu0 %v1041_v5  ;;  %824 = vmatpush3.bf16.msra.mxu1 %v1041_v5  ;;  %v977_v30 = vld [vmem:[%s1339_s0 + $0x90] ss:$8 sps:$4 sm:$0xff]   ;;  %v981_v32 = vld [vmem:[%s1339_s0 + $0x44] ss:$8 sps:$4 sm:$0xff]   ;;  %v979_v34 = vld [vmem:[%s1339_s0 + $0x40] ss:$8 sps:$4 sm:$0xff]  }
   0xc   :  { %785 = vmatprep.subr.bf16.mxu0 %v1046_v6  ;;  %825 = vmatprep.subr.bf16.mxu1 %v1046_v6  ;;  %v978_v31 = vld [vmem:[%s1339_s0 + $0xb0] ss:$8 sps:$4 sm:$0xff]   ;;  %v984_v33 = vld [vmem:[%s1339_s0 + $0x64] ss:$8 sps:$4 sm:$0xff]   ;;  %v982_v35 = vld [vmem:[%s1339_s0 + $0x60] ss:$8 sps:$4 sm:$0xff]  }
   0xd   :  { %v985_v36 = vld [vmem:[%s1339_s0 + $0x54] ss:$8 sps:$4 sm:$0xff]   ;;  %v989_v38 = vld [vmem:[%s1339_s0 + $0x50] ss:$8 sps:$4 sm:$0xff]   ;;  %v991_v40 = vld [vmem:[%s1339_s0 + $0xc4] ss:$8 sps:$4 sm:$0xff]  }
   0xe   :  { %v987_v37 = vld [vmem:[%s1339_s0 + $0x74] ss:$8 sps:$4 sm:$0xff]   ;;  %v990_v39 = vld [vmem:[%s1339_s0 + $0x70] ss:$8 sps:$4 sm:$0xff]   ;;  %v993_v41 = vld [vmem:[%s1339_s0 + $0xe4] ss:$8 sps:$4 sm:$0xff]  }
   0xf   :  { %786 = vmatpush3.bf16.msra.mxu0 %v1053_v7  ;;  %826 = vmatpush3.bf16.msra.mxu1 %v1053_v7  ;;  %v995_v42 = vld [vmem:[%s1339_s0 + $0xc0] ss:$8 sps:$4 sm:$0xff]   ;;  %v997_v44 = vld [vmem:[%s1339_s0 + $0xd4] ss:$8 sps:$4 sm:$0xff]   ;;  %v1001_v46 = vld [vmem:[%s1339_s0 + $0xd0] ss:$8 sps:$4 sm:$0xff]  }
  0x10   :  { %787 = vmatprep.subr.bf16.mxu0 %v1060_v8  ;;  %827 = vmatprep.subr.bf16.mxu1 %v1060_v8  ;;  %v996_v43 = vld [vmem:[%s1339_s0 + $0xe0] ss:$8 sps:$4 sm:$0xff]   ;;  %v999_v45 = vld [vmem:[%s1339_s0 + $0xf4] ss:$8 sps:$4 sm:$0xff]   ;;  %v1002_v47 = vld [vmem:[%s1339_s0 + $0xf0] ss:$8 sps:$4 sm:$0xff]  }
  0x13   :  { %788 = vmatpush3.bf16.msra.mxu0 %v1067_v9  ;;  %828 = vmatpush3.bf16.msra.mxu1 %v1067_v9 }
  0x14   :  { %789 = vmatprep.subr.bf16.mxu0 %v1074_v10  ;;  %829 = vmatprep.subr.bf16.mxu1 %v1074_v10 }
  0x17   :  { %790 = vmatpush3.bf16.msra.mxu0 %v1087_v13  ;;  %830 = vmatpush3.bf16.msra.mxu1 %v1087_v13 }
  0x18   :  { %791 = vmatprep.subr.bf16.mxu0 %v1094_v14  ;;  %831 = vmatprep.subr.bf16.mxu1 %v1094_v14 }
  0x1b   :  { %792 = vmatpush3.bf16.msra.mxu0 %v1101_v15  ;;  %832 = vmatpush3.bf16.msra.mxu1 %v1101_v15 }
  0x1c   :  { %793 = vmatprep.subr.bf16.mxu0 %v1108_v16  ;;  %833 = vmatprep.subr.bf16.mxu1 %v1108_v16 }
  0x1f   :  { %794 = vmatpush3.bf16.msra.mxu0 %v1115_v17  ;;  %834 = vmatpush3.bf16.msra.mxu1 %v1115_v17 }
  0x20   :  { %859 = vmatprep.subr.bf16.mxu0 %v939_v0  ;;  %899 = vmatprep.subr.bf16.mxu1 %v939_v0 }
  0x22   :  { %224 = vmatmul.mubr.bf16.vlgmr.msra.gmra.mrb[0].mxu0 %v955_v18  ;;  %338 = vmatmul.mubr.bf16.vlgmr.msra.gmra.mrb[0].mxu1 %v958_v19 }
  0x23   :  { %860 = vmatpush3.bf16.msra.mxu0 %v940_v1  ;;  %900 = vmatpush3.bf16.msra.mxu1 %v940_v1 }
  0x24   :  { %861 = vmatprep.subr.bf16.mxu0 %v941_v2  ;;  %901 = vmatprep.subr.bf16.mxu1 %v941_v2 }
  0x25   :  { %231 = vmatprep.mubr.bf16.mxu0 %v961_v20  ;;  %345 = vmatprep.mubr.bf16.mxu1 %v963_v21 }
  0x27   :  { %862 = vmatpush3.bf16.msra.mxu0 %v942_v3  ;;  %902 = vmatpush3.bf16.msra.mxu1 %v942_v3 }
  0x28   :  { %863 = vmatprep.subr.bf16.mxu0 %v943_v4  ;;  %903 = vmatprep.subr.bf16.mxu1 %v943_v4 }
  0x2a   :  { %232 = vmatmul.mubr.bf16.gmra.mrb[4].mxu0 %v965_v22  ;;  %346 = vmatmul.mubr.bf16.gmra.mrb[4].mxu1 %v966_v23 }
  0x2b   :  { %864 = vmatpush3.bf16.msra.mxu0 %v1041_v5  ;;  %904 = vmatpush3.bf16.msra.mxu1 %v1041_v5 }
  0x2c   :  { %865 = vmatprep.subr.bf16.mxu0 %v1046_v6  ;;  %905 = vmatprep.subr.bf16.mxu1 %v1046_v6 }
  0x2d   :  { %239 = vmatprep.mubr.bf16.mxu0 %v967_v24  ;;  %353 = vmatprep.mubr.bf16.mxu1 %v969_v25 }
  0x2f   :  { %866 = vmatpush3.bf16.msra.mxu0 %v1053_v7  ;;  %906 = vmatpush3.bf16.msra.mxu1 %v1053_v7 }
  0x30   :  { %867 = vmatprep.subr.bf16.mxu0 %v1060_v8  ;;  %907 = vmatprep.subr.bf16.mxu1 %v1060_v8 }
  0x32   :  { %240 = vmatmul.mubr.bf16.gmra.mrb[8].mxu0 %v971_v26  ;;  %354 = vmatmul.mubr.bf16.gmra.mrb[8].mxu1 %v972_v27 }
  0x33   :  { %868 = vmatpush3.bf16.msra.mxu0 %v1067_v9  ;;  %908 = vmatpush3.bf16.msra.mxu1 %v1067_v9 }
  0x34   :  { %869 = vmatprep.subr.bf16.mxu0 %v1074_v10  ;;  %909 = vmatprep.subr.bf16.mxu1 %v1074_v10 }
  0x35   :  { %247 = vmatprep.mubr.bf16.mxu0 %v973_v28  ;;  %361 = vmatprep.mubr.bf16.mxu1 %v975_v29 }
  0x37   :  { %870 = vmatpush3.bf16.msra.mxu0 %v1087_v13  ;;  %910 = vmatpush3.bf16.msra.mxu1 %v1087_v13 }
  0x38   :  { %871 = vmatprep.subr.bf16.mxu0 %v1094_v14  ;;  %911 = vmatprep.subr.bf16.mxu1 %v1094_v14 }
  0x3a   :  { %248 = vmatmul.mubr.bf16.gmra.mrb[12].mxu0 %v977_v30  ;;  %362 = vmatmul.mubr.bf16.gmra.mrb[12].mxu1 %v978_v31 }
  0x3b   :  { %872 = vmatpush3.bf16.msra.mxu0 %v1101_v15  ;;  %912 = vmatpush3.bf16.msra.mxu1 %v1101_v15 }
  0x3c   :  { %873 = vmatprep.subr.bf16.mxu0 %v1108_v16  ;;  %913 = vmatprep.subr.bf16.mxu1 %v1108_v16 }
  0x3d   :  { %459 = vmatprep.mubr.bf16.mxu0 %v981_v32  ;;  %581 = vmatprep.mubr.bf16.mxu1 %v984_v33 }
  0x3f   :  { %874 = vmatpush3.bf16.msra.mxu0 %v1115_v17  ;;  %914 = vmatpush3.bf16.msra.mxu1 %v1115_v17 }
  0x42   :  { %460 = vmatmul.mubr.bf16.vlgmr.msra.gmra.mrb[16].mxu0 %v979_v34  ;;  %582 = vmatmul.mubr.bf16.vlgmr.msra.gmra.mrb[16].mxu1 %v982_v35 }
  0x43   :  { %467 = vmatprep.mubr.bf16.mxu0 %v985_v36  ;;  %589 = vmatprep.mubr.bf16.mxu1 %v987_v37 }
  0x4a   :  { %468 = vmatmul.mubr.bf16.gmra.mrb[20].mxu0 %v989_v38  ;;  %590 = vmatmul.mubr.bf16.gmra.mrb[20].mxu1 %v990_v39 }
  0x4b   :  { %475 = vmatprep.mubr.bf16.mxu0 %v991_v40  ;;  %597 = vmatprep.mubr.bf16.mxu1 %v993_v41 }
  0x52   :  { %476 = vmatmul.mubr.bf16.gmra.mrb[24].mxu0 %v995_v42  ;;  %598 = vmatmul.mubr.bf16.gmra.mrb[24].mxu1 %v996_v43 }
  0x53   :  { %483 = vmatprep.mubr.bf16.mxu0 %v997_v44  ;;  %605 = vmatprep.mubr.bf16.mxu1 %v999_v45 }
  0x5a   :  { %484 = vmatmul.mubr.bf16.gmra.mrb[28].mxu0 %v1001_v46  ;;  %606 = vmatmul.mubr.bf16.gmra.mrb[28].mxu1 %v1002_v47 }
  0xf5   :  { %v795_v48 = vpop.f32.mrb[0].mxu0  ;;  %v835_v49 = vpop.f32.mrb[0].mxu1 }
  0xf6   :  { %v796_v50 = vpop.f32.mrb[1].mxu0  ;;  %v836_v51 = vpop.f32.mrb[1].mxu1 }
  0xf7   :  { %v1233_v52 = vadd.f32 %v796_v50, %v795_v48  ;;  %v1235_v53 = vadd.f32 %v836_v51, %v835_v49  ;;  %v798_v54 = vpop.f32.mrb[2].mxu0  ;;  %v838_v55 = vpop.f32.mrb[2].mxu1 }
  0xf8   :  { %v799_v56 = vpop.f32.mrb[3].mxu0  ;;  %v839_v57 = vpop.f32.mrb[3].mxu1 }
  0xf9   :  { %v370_v58 = vmax.f32 %v1233_v52, %v1235_v53  ;;  %v800_v59 = vadd.f32 %v799_v56, %v798_v54  ;;  %v840_v60 = vadd.f32 %v839_v57, %v838_v55  ;;  %v1278_v53 = vld [vmem:[%s1340_s2] ss:$0 sm:$0xff] }
  0xfb   :  { %v371_v61 = vmax.f32 %v800_v59, %v840_v60 }
  0xfd   :  { %v801_v62 = vpop.f32.mrb[4].mxu0  ;;  %v841_v63 = vpop.f32.mrb[4].mxu1 }
  0xfe   :  { %v802_v0 = vpop.f32.mrb[5].mxu0  ;;  %v842_v1 = vpop.f32.mrb[5].mxu1 }
  0xff   :  { %v1239_v2 = vadd.f32 %v802_v0, %v801_v62  ;;  %v1241_v3 = vadd.f32 %v842_v1, %v841_v63  ;;  %v804_v4 = vpop.f32.mrb[6].mxu0  ;;  %v844_v5 = vpop.f32.mrb[6].mxu1 }
 0x100   :  { %v805_v6 = vpop.f32.mrb[7].mxu0  ;;  %v845_v7 = vpop.f32.mrb[7].mxu1 }
 0x101   :  { %v372_v8 = vmax.f32 %v1239_v2, %v1241_v3  ;;  %v1245_v9 = vadd.f32 %v805_v6, %v804_v4  ;;  %v1247_v10 = vadd.f32 %v845_v7, %v844_v5 }
 0x103   :  { %v373_v11 = vmax.f32 %v1245_v9, %v1247_v10 }
 0x105   :  { %v807_v12 = vpop.f32.mrb[8].mxu0  ;;  %v847_v13 = vpop.f32.mrb[8].mxu1 }
 0x106   :  { %v808_v14 = vpop.f32.mrb[9].mxu0  ;;  %v848_v15 = vpop.f32.mrb[9].mxu1 }
 0x107   :  { %v1251_v16 = vadd.f32 %v808_v14, %v807_v12  ;;  %v1253_v17 = vadd.f32 %v848_v15, %v847_v13  ;;  %v810_v18 = vpop.f32.mrb[10].mxu0  ;;  %v850_v19 = vpop.f32.mrb[10].mxu1 }
 0x108   :  { %v811_v20 = vpop.f32.mrb[11].mxu0  ;;  %v851_v21 = vpop.f32.mrb[11].mxu1 }
 0x109   :  { %v374_v22 = vmax.f32 %v1251_v16, %v1253_v17  ;;  %v1257_v23 = vadd.f32 %v811_v20, %v810_v18  ;;  %v1259_v24 = vadd.f32 %v851_v21, %v850_v19 }
 0x10b   :  { %v375_v25 = vmax.f32 %v1257_v23, %v1259_v24 }
 0x10d   :  { %v813_v26 = vpop.f32.mrb[12].mxu0  ;;  %v853_v27 = vpop.f32.mrb[12].mxu1 }
 0x10e   :  { %v814_v28 = vpop.f32.mrb[13].mxu0  ;;  %v854_v29 = vpop.f32.mrb[13].mxu1 }
 0x10f   :  { %v1263_v30 = vadd.f32 %v814_v28, %v813_v26  ;;  %v1265_v31 = vadd.f32 %v854_v29, %v853_v27  ;;  %v816_v32 = vpop.f32.mrb[14].mxu0  ;;  %v856_v33 = vpop.f32.mrb[14].mxu1 }
 0x110   :  { %v817_v34 = vpop.f32.mrb[15].mxu0  ;;  %v857_v35 = vpop.f32.mrb[15].mxu1 }
 0x111   :  { %v376_v36 = vmax.f32 %v1263_v30, %v1265_v31  ;;  %v1269_v37 = vadd.f32 %v817_v34, %v816_v32  ;;  %v1271_v38 = vadd.f32 %v857_v35, %v856_v33 }
 0x113   :  { %v377_v39 = vmax.f32 %v1269_v37, %v1271_v38 }
 0x115   :  { %v875_v40 = vpop.f32.mrb[16].mxu0  ;;  %v915_v41 = vpop.f32.mrb[16].mxu1 }
 0x116   :  { %v876_v42 = vpop.f32.mrb[17].mxu0  ;;  %v916_v43 = vpop.f32.mrb[17].mxu1 }
 0x117   :  { %v877_v44 = vadd.f32 %v876_v42, %v875_v40  ;;  %v917_v45 = vadd.f32 %v916_v43, %v915_v41  ;;  %v878_v46 = vpop.f32.mrb[18].mxu0  ;;  %v918_v47 = vpop.f32.mrb[18].mxu1 }
 0x118   :  { %v879_v48 = vpop.f32.mrb[19].mxu0  ;;  %v919_v49 = vpop.f32.mrb[19].mxu1 }
 0x119   :  { %v492_v50 = vmax.f32 %v370_v58, %v877_v44  ;;  %v880_v51 = vadd.f32 %v879_v48, %v878_v46  ;;  %v920_v52 = vadd.f32 %v919_v49, %v918_v47 }
 0x11b   :  { %v614_v54 = vmax.f32 %v492_v50, %v917_v45  ;;  %v493_v55 = vmax.f32 %v371_v61, %v880_v51 }
 0x11d   :  { %v629_v56 = vadd.f32 %v1278_v53, %v614_v54  ;;  %v615_v57 = vmax.f32 %v493_v55, %v920_v52  ;;  %v881_v59 = vpop.f32.mrb[20].mxu0  ;;  %v921_v60 = vpop.f32.mrb[20].mxu1 }
 0x11e   :  { %v882_v62 = vpop.f32.mrb[21].mxu0  ;;  %v922_v63 = vpop.f32.mrb[21].mxu1 }
 0x11f   :  { %v637_v0 = vmax.f32 %v629_v56, 0.0  ;;  %v630_v1 = vadd.f32 %v1278_v53, %v615_v57  ;;  %v883_v58 = vadd.f32 %v882_v62, %v881_v59  ;;  %v923_v4 = vadd.f32 %v922_v63, %v921_v60  ;;  %v884_v5 = vpop.f32.mrb[22].mxu0  ;;  %v924_v6 = vpop.f32.mrb[22].mxu1 }
 0x120   :  { %v885_v7 = vpop.f32.mrb[23].mxu0  ;;  %v925_v12 = vpop.f32.mrb[23].mxu1 }
 0x121   :  { %v771_v13 = vpack.c.bf16 %v637_v0, %v637_v0  ;;  %v638_v14 = vmax.f32 %v630_v1, 0.0  ;;  %v494_v61 = vmax.f32 %v372_v8, %v883_v58  ;;  %v886_v15 = vadd.f32 %v885_v7, %v884_v5 }
 0x122   :  { %v926_v18 = vadd.f32 %v925_v12, %v924_v6 }
 0x123   :  { %678 = vst.msk [vmem:[%s1341_s3] sm:$0xf] %vm677_vm0, %v771_v13  ;;  %v772_v19 = vpack.c.bf16 %v638_v14, %v638_v14  ;;  %v616_v20 = vmax.f32 %v494_v61, %v923_v4  ;;  %v495_v21 = vmax.f32 %v373_v11, %v886_v15 }
 0x125   :  { %679 = vst.msk [vmem:[%s1341_s3 + $0x4] sm:$0xf] %vm677_vm0, %v772_v19  ;;  %v631_v2 = vadd.f32 %v1278_v53, %v616_v20  ;;  %v617_v3 = vmax.f32 %v495_v21, %v926_v18  ;;  %v887_v8 = vpop.f32.mrb[24].mxu0  ;;  %v927_v26 = vpop.f32.mrb[24].mxu1 }
 0x126   :  { %v888_v27 = vpop.f32.mrb[25].mxu0  ;;  %v928_v28 = vpop.f32.mrb[25].mxu1 }
 0x127   :  { %v639_v29 = vmax.f32 %v631_v2, 0.0  ;;  %v632_v32 = vadd.f32 %v1278_v53, %v617_v3  ;;  %v889_v33 = vadd.f32 %v888_v27, %v887_v8  ;;  %v929_v34 = vadd.f32 %v928_v28, %v927_v26  ;;  %v890_v35 = vpop.f32.mrb[26].mxu0  ;;  %v930_v9 = vpop.f32.mrb[26].mxu1 }
 0x128   :  { %v891_v10 = vpop.f32.mrb[27].mxu0  ;;  %v931_v11 = vpop.f32.mrb[27].mxu1 }
 0x129   :  { %v773_v40 = vpack.c.bf16 %v639_v29, %v639_v29  ;;  %v640_v41 = vmax.f32 %v632_v32, 0.0  ;;  %v496_v42 = vmax.f32 %v374_v22, %v889_v33  ;;  %v892_v43 = vadd.f32 %v891_v10, %v890_v35 }
 0x12a   :  { %v932_v44 = vadd.f32 %v931_v11, %v930_v9 }
 0x12b   :  { %680 = vst.msk [vmem:[%s1341_s3 + $0x8] sm:$0xf] %vm677_vm0, %v773_v40  ;;  %v774_v45 = vpack.c.bf16 %v640_v41, %v640_v41  ;;  %v618_v46 = vmax.f32 %v496_v42, %v929_v34  ;;  %v497_v47 = vmax.f32 %v375_v25, %v892_v43 }
 0x12d   :  { %681 = vst.msk [vmem:[%s1341_s3 + $0xc] sm:$0xf] %vm677_vm0, %v774_v45  ;;  %v633_v16 = vadd.f32 %v1278_v53, %v618_v46  ;;  %v619_v17 = vmax.f32 %v497_v47, %v932_v44  ;;  %v893_v22 = vpop.f32.mrb[28].mxu0  ;;  %v933_v48 = vpop.f32.mrb[28].mxu1 }
 0x12e   :  { %v894_v49 = vpop.f32.mrb[29].mxu0  ;;  %v934_v50 = vpop.f32.mrb[29].mxu1 }
 0x12f   :  { %v641_v51 = vmax.f32 %v633_v16, 0.0  ;;  %v634_v52 = vadd.f32 %v1278_v53, %v619_v17  ;;  %v895_v54 = vadd.f32 %v894_v49, %v893_v22  ;;  %v935_v55 = vadd.f32 %v934_v50, %v933_v48  ;;  %v896_v56 = vpop.f32.mrb[30].mxu0  ;;  %v936_v23 = vpop.f32.mrb[30].mxu1 }
 0x130   :  { %v897_v24 = vpop.f32.mrb[31].mxu0  ;;  %v937_v25 = vpop.f32.mrb[31].mxu1 }
 0x131   :  { %v775_v57 = vpack.c.bf16 %v641_v51, %v641_v51  ;;  %v642_v59 = vmax.f32 %v634_v52, 0.0  ;;  %v498_v60 = vmax.f32 %v376_v36, %v895_v54  ;;  %v898_v62 = vadd.f32 %v897_v24, %v896_v56 }
 0x132   :  { %v938_v63 = vadd.f32 %v937_v25, %v936_v23 }
 0x133   :  { %682 = vst.msk [vmem:[%s1341_s3 + $0x10] sm:$0xf] %vm677_vm0, %v775_v57  ;;  %v776_v0 = vpack.c.bf16 %v642_v59, %v642_v59  ;;  %v620_v1 = vmax.f32 %v498_v60, %v935_v55  ;;  %v499_v58 = vmax.f32 %v377_v39, %v898_v62 }
 0x135   :  { %683 = vst.msk [vmem:[%s1341_s3 + $0x14] sm:$0xf] %vm677_vm0, %v776_v0  ;;  %v635_v30 = vadd.f32 %v1278_v53, %v620_v1  ;;  %v621_v31 = vmax.f32 %v499_v58, %v938_v63 }
 0x137   :  { %v643_v36 = vmax.f32 %v635_v30, 0.0  ;;  %v636_v4 = vadd.f32 %v1278_v53, %v621_v31 }
 0x139   :  { %v777_v5 = vpack.c.bf16 %v643_v36, %v643_v36  ;;  %v644_v6 = vmax.f32 %v636_v4, 0.0 }
 0x13b   :  { %684 = vst.msk [vmem:[%s1341_s3 + $0x18] sm:$0xf] %vm677_vm0, %v777_v5  ;;  %v778_v37 = vpack.c.bf16 %v644_v6, %v644_v6 }
 0x13d   :  { %685 = vst.msk [vmem:[%s1341_s3 + $0x1c] sm:$0xf] %vm677_vm0, %v778_v37 }

// kernel: net_forward.5
= control target key start
LH: loop header
LB: loop body
LE: loop exit
PB: predicated region body
PF: predicated region fallthrough
CT: control target
= control target key end

     0   :  { %v112_v30 = vlaneseq  ;;  %v872_v34 = vmov 1966171168   ;;  %v873_v37 = vmov 0.0   ;;  %s1102_s0 = inlined_call_operand.vmem [shape: bf16[2,512], index: 0, kind: input, shape index: {}]   ;;  %s1103_s1 = inlined_call_operand.vmem [shape: bf16[512,128], index: 1, kind: input, shape index: {}]   ;;  %s1104_s2 = inlined_call_operand.vmem [shape: f32[1,128], index: 2, kind: input, shape index: {}]   ;;  %s1105_s3 = inlined_call_operand.vmem [shape: bf16[128,128], index: 3, kind: input, shape index: {}]   ;;  %s1106_s4 = inlined_call_operand.vmem [shape: f32[1,128], index: 4, kind: input, shape index: {}]   ;;  %s1107_s5 = inlined_call_operand.vmem [shape: bf16[128,128], index: 5, kind: input, shape index: {}]   ;;  %s1108_s6 = inlined_call_operand.vmem [shape: f32[1,128], index: 6, kind: input, shape index: {}]   ;;  %s1109_s7 = inlined_call_operand.hbm [shape: f32[2,128], index: 7, kind: output, shape index: {}]  }
   0x1   :  { %v800_v0 = vld [vmem:[%s1103_s1 + $0x40] sm:$0xff]   ;;  %v804_v4 = vld [vmem:[%s1103_s1 + $0x48] sm:$0xff]   ;;  %v808_v8 = vld [vmem:[%s1103_s1 + $0x50] sm:$0xff]   ;;  %v110_v35 = vunpack.c.l.s4 %v872_v34 }
   0x2   :  { %v801_v1 = vld [vmem:[%s1103_s1 + $0xc0] sm:$0xff]   ;;  %694 = vmatprep.subr.bf16.mxu0 %v800_v0  ;;  %v805_v5 = vld [vmem:[%s1103_s1 + $0xc8] sm:$0xff]   ;;  %v809_v9 = vld [vmem:[%s1103_s1 + $0xd0] sm:$0xff]   ;;  %v113_v36 = vshrl.u32 %v112_v30, 7 }
   0x3   :  { %v802_v2 = vld [vmem:[%s1103_s1] sm:$0xff]   ;;  %716 = vmatprep.subr.bf16.mxu1 %v801_v1  ;;  %v806_v6 = vld [vmem:[%s1103_s1 + $0x8] sm:$0xff]   ;;  %v810_v10 = vld [vmem:[%s1103_s1 + $0x10] sm:$0xff]   ;;  %v111_v39 = vunpack.c.0.s8 %v110_v35 }
   0x4   :  { %v803_v3 = vld [vmem:[%s1103_s1 + $0x80] sm:$0xff]   ;;  %695 = vmatpush3.bf16.msra.mxu0 %v802_v2  ;;  %v807_v7 = vld [vmem:[%s1103_s1 + $0x88] sm:$0xff]   ;;  %v811_v11 = vld [vmem:[%s1103_s1 + $0x90] sm:$0xff]  }
   0x5   :  { %717 = vmatpush3.bf16.msra.mxu1 %v803_v3  ;;  %696 = vmatprep.subr.bf16.mxu0 %v804_v4  ;;  %v812_v12 = vld [vmem:[%s1103_s1 + $0x58] sm:$0xff]   ;;  %v816_v16 = vld [vmem:[%s1103_s1 + $0x60] sm:$0xff]   ;;  %v820_v20 = vld [vmem:[%s1103_s1 + $0x68] sm:$0xff]   ;;  %v114_v40 = vsub.s32 %v111_v39, %v113_v36 }
   0x6   :  { %718 = vmatprep.subr.bf16.mxu1 %v805_v5  ;;  %v813_v13 = vld [vmem:[%s1103_s1 + $0xd8] sm:$0xff]   ;;  %v817_v17 = vld [vmem:[%s1103_s1 + $0xe0] sm:$0xff]   ;;  %v821_v21 = vld [vmem:[%s1103_s1 + $0xe8] sm:$0xff]  }
   0x7   :  { %v814_v14 = vld [vmem:[%s1103_s1 + $0x18] sm:$0xff]   ;;  %v818_v18 = vld [vmem:[%s1103_s1 + $0x20] sm:$0xff]   ;;  %v822_v22 = vld [vmem:[%s1103_s1 + $0x28] sm:$0xff]  }
   0x8   :  { %697 = vmatpush3.bf16.msra.mxu0 %v806_v6  ;;  %v815_v15 = vld [vmem:[%s1103_s1 + $0x98] sm:$0xff]   ;;  %v819_v19 = vld [vmem:[%s1103_s1 + $0xa0] sm:$0xff]   ;;  %v823_v23 = vld [vmem:[%s1103_s1 + $0xa8] sm:$0xff]  }
   0x9   :  { %719 = vmatpush3.bf16.msra.mxu1 %v807_v7  ;;  %698 = vmatprep.subr.bf16.mxu0 %v808_v8  ;;  %v824_v24 = vld [vmem:[%s1103_s1 + $0x70] sm:$0xff]   ;;  %v828_v28 = vld [vmem:[%s1103_s1 + $0x78] sm:$0xff]   ;;  %v643_v33 = vld.sshfl [vmem:[%s1102_s0] sm:$0x33 pattern:$0x75316420] }
   0xa   :  { %720 = vmatprep.subr.bf16.mxu1 %v809_v9  ;;  %v825_v25 = vld [vmem:[%s1103_s1 + $0xf0] sm:$0xff]   ;;  %v829_v29 = vld [vmem:[%s1103_s1 + $0xf8] sm:$0xff]   ;;  %v108_v38 = vcombine.high %v643_v33, %v643_v33  ;;  %v832_v41 = vld [vmem:[%s1105_s3] sm:$0xff]   ;;  %v115_v43 = vrot.slane %v643_v33, %v114_v40 }
   0xb   :  { %v826_v26 = vld [vmem:[%s1103_s1 + $0x30] sm:$0xff]   ;;  %v830_v31 = vld [vmem:[%s1103_s1 + $0x38] sm:$0xff]   ;;  %v833_v46 = vld [vmem:[%s1105_s3 + $0x8] sm:$0xff]  }
   0xc   :  { %699 = vmatpush3.bf16.msra.mxu0 %v810_v10  ;;  %v827_v27 = vld [vmem:[%s1103_s1 + $0xb0] sm:$0xff]   ;;  %v831_v32 = vld [vmem:[%s1103_s1 + $0xb8] sm:$0xff]   ;;  %v122_v42 = vrot.slane %v108_v38, %v114_v40  ;;  %v123_v45 = vcombine.high %v115_v43, %v115_v43 }
   0xd   :  { %721 = vmatpush3.bf16.msra.mxu1 %v811_v11  ;;  %700 = vmatprep.subr.bf16.mxu0 %v812_v12 }
   0xe   :  { %722 = vmatprep.subr.bf16.mxu1 %v813_v13  ;;  %353 = vmatprep.mubr.bf16.mxu0 %v122_v42  ;;  %v124_v44 = vcombine.high %v122_v42, %v122_v42 }
  0x10   :  { %701 = vmatpush3.bf16.msra.mxu0 %v814_v14  ;;  %393 = vmatprep.mubr.bf16.mxu1 %v124_v44 }
  0x11   :  { %723 = vmatpush3.bf16.msra.mxu1 %v815_v15  ;;  %702 = vmatprep.subr.bf16.mxu0 %v816_v16 }
  0x12   :  { %724 = vmatprep.subr.bf16.mxu1 %v817_v17 }
  0x14   :  { %703 = vmatpush3.bf16.msra.mxu0 %v818_v18 }
  0x15   :  { %725 = vmatpush3.bf16.msra.mxu1 %v819_v19  ;;  %704 = vmatprep.subr.bf16.mxu0 %v820_v20 }
  0x16   :  { %726 = vmatprep.subr.bf16.mxu1 %v821_v21 }
  0x18   :  { %705 = vmatpush3.bf16.msra.mxu0 %v822_v22 }
  0x19   :  { %727 = vmatpush3.bf16.msra.mxu1 %v823_v23  ;;  %706 = vmatprep.subr.bf16.mxu0 %v824_v24 }
  0x1a   :  { %728 = vmatprep.subr.bf16.mxu1 %v825_v25 }
  0x1c   :  { %707 = vmatpush3.bf16.msra.mxu0 %v826_v26 }
  0x1d   :  { %729 = vmatpush3.bf16.msra.mxu1 %v827_v27  ;;  %708 = vmatprep.subr.bf16.mxu0 %v828_v28 }
  0x1e   :  { %730 = vmatprep.subr.bf16.mxu1 %v829_v29 }
  0x20   :  { %709 = vmatpush3.bf16.msra.mxu0 %v830_v31 }
  0x21   :  { %731 = vmatpush3.bf16.msra.mxu1 %v831_v32  ;;  %756 = vmatprep.subr.bf16.mxu0 %v873_v37 }
  0x22   :  { %776 = vmatprep.subr.bf16.mxu1 %v873_v37 }
  0x23   :  { %354 = vmatmul.mubr.bf16.vlgmr.msra.gmra.mrb[0].mxu0 %v115_v43 }
  0x24   :  { %757 = vmatpush3.bf16.msra.mxu0 %v832_v41  ;;  %394 = vmatmul.mubr.bf16.vlgmr.msra.gmra.mrb[0].mxu1 %v123_v45 }
  0x25   :  { %758 = vmatprep.subr.bf16.mxu0 %v873_v37 }
  0x26   :  { %12 = vsyncpa [#allocation3], 0  ;;  %v834_v47 = vld [vmem:[%s1105_s3 + $0x10] sm:$0xff]   ;;  %v835_v48 = vld [vmem:[%s1105_s3 + $0x18] sm:$0xff]   ;;  %vm874_vm0 = vmmov 0   ;;  %s875_s30 = smov [#allocation2]  }
  0x27   :  { %v836_v49 = vld [vmem:[%s1105_s3 + $0x20] sm:$0xff]   ;;  %v837_v50 = vld [vmem:[%s1105_s3 + $0x28] sm:$0xff]   ;;  %v838_v51 = vld [vmem:[%s1105_s3 + $0x30] sm:$0xff]   ;;  %772 = vmatprep.mubr.msk.bf16.mxu0 %vm874_vm0, %v873_v37  ;;  %792 = vmatprep.mubr.msk.bf16.mxu1 %vm874_vm0, %v873_v37  ;;  %s634_s8 = sshll.u32 %s875_s30, 4  ;;  %s635_s8 = int_to_ptr.vmem [resolvable:$true] %s634_s8 }
  0x28   :  { %759 = vmatpush3.bf16.msra.mxu0 %v833_v46  ;;  %v839_v52 = vld [vmem:[%s1105_s3 + $0x38] sm:$0xff]   ;;  %v840_v53 = vld [vmem:[%s1107_s5] sm:$0xff]   ;;  %v841_v54 = vld [vmem:[%s1107_s5 + $0x8] sm:$0xff]   ;;  %p853_p1 = scmp.lt.s32.totalorder %s635_s8, %s635_s8 }
  0x29   :  { %760 = vmatprep.subr.bf16.mxu0 %v873_v37  ;;  %777 = vmatpush3.bf16.msra.mxu1 %v840_v53  ;;  %v842_v55 = vld [vmem:[%s1107_s5 + $0x10] sm:$0xff]   ;;  %v843_v56 = vld [vmem:[%s1107_s5 + $0x18] sm:$0xff]   ;;  %v844_v57 = vld [vmem:[%s1107_s5 + $0x20] sm:$0xff]  }
  0x2a   :  { %778 = vmatprep.subr.bf16.mxu1 %v873_v37  ;;  %v845_v58 = vld [vmem:[%s1107_s5 + $0x28] sm:$0xff]   ;;  %v642_v60 = vld [vmem:[%s1104_s2] ss:$0 sm:$0xff]  ;;  %v846_v10 = vld [vmem:[%s1107_s5 + $0x30] sm:$0xff]  }
  0x2b   :  { %v847_v11 = vld [vmem:[%s1107_s5 + $0x38] sm:$0xff]   ;;  %v676_v12 = vld [vmem:[%s1106_s4] ss:$0 sm:$0xff]  ;;  %s848_s4 = scalar_lea.vmem %s635_s8, 32 }
  0x2c   :  { %761 = vmatpush3.bf16.msra.mxu0 %v834_v47  ;;  %v685_v20 = vld [vmem:[%s1108_s6] ss:$0 sm:$0xff]  ;;  %p849_p0 = scmp.ne.s32.totalorder %s635_s8, %s848_s4  ;;  %p854_p2 = scmp.lt.s32.totalorder %s848_s4, %s848_s4 }
  0x2d   :  { %762 = vmatprep.subr.bf16.mxu0 %v873_v37  ;;  %779 = vmatpush3.bf16.msra.mxu1 %v841_v54 }
  0x2e   :  { %780 = vmatprep.subr.bf16.mxu1 %v873_v37  ;;  %p855_p3 = por %p854_p2, %p853_p1 }
  0x30   :  { %763 = vmatpush3.bf16.msra.mxu0 %v835_v48  ;;  %p856_p4 = pnand %p855_p3, %p849_p0 }
  0x31   :  { %764 = vmatprep.subr.bf16.mxu0 %v873_v37  ;;  %781 = vmatpush3.bf16.msra.mxu1 %v842_v55 }
  0x32   :  { %782 = vmatprep.subr.bf16.mxu1 %v873_v37 }
  0x34   :  { %765 = vmatpush3.bf16.msra.mxu0 %v836_v49 }
  0x35   :  { %766 = vmatprep.subr.bf16.mxu0 %v873_v37  ;;  %783 = vmatpush3.bf16.msra.mxu1 %v843_v56 }
  0x36   :  { %784 = vmatprep.subr.bf16.mxu1 %v873_v37 }
  0x38   :  { %767 = vmatpush3.bf16.msra.mxu0 %v837_v50 }
  0x39   :  { %768 = vmatprep.subr.bf16.mxu0 %v873_v37  ;;  %785 = vmatpush3.bf16.msra.mxu1 %v844_v57 }
  0x3a   :  { %786 = vmatprep.subr.bf16.mxu1 %v873_v37 }
  0x3c   :  { %769 = vmatpush3.bf16.msra.mxu0 %v838_v51 }
  0x3d   :  { %770 = vmatprep.subr.bf16.mxu0 %v873_v37  ;;  %787 = vmatpush3.bf16.msra.mxu1 %v845_v58 }
  0x3e   :  { %788 = vmatprep.subr.bf16.mxu1 %v873_v37 }
  0x40   :  { %771 = vmatpush3.bf16.msra.mxu0 %v839_v52 }
  0x41   :  { %789 = vmatpush3.bf16.msra.mxu1 %v846_v10 }
  0x42   :  { %790 = vmatprep.subr.bf16.mxu1 %v873_v37 }
  0x45   :  { %791 = vmatpush3.bf16.msra.mxu1 %v847_v11 }
  0xf6   :  { %v710_v59 = vpop.f32.mrb[0].mxu0 }
  0xf7   :  { %v711_v61 = vpop.f32.mrb[1].mxu0  ;;  %v732_v62 = vpop.f32.mrb[0].mxu1 }
  0xf8   :  { %v712_v63 = vadd.f32 %v711_v61, %v710_v59  ;;  %v713_v0 = vpop.f32.mrb[2].mxu0  ;;  %v733_v1 = vpop.f32.mrb[1].mxu1 }
  0xf9   :  { %v714_v2 = vpop.f32.mrb[3].mxu0  ;;  %v734_v4 = vadd.f32 %v733_v1, %v732_v62  ;;  %v735_v5 = vpop.f32.mrb[2].mxu1 }
  0xfa   :  { %v356_v3 = vadd.f32 %v712_v63, %v642_v60  ;;  %v736_v6 = vpop.f32.mrb[3].mxu1 }
  0xfc   :  { %v396_v7 = vadd.f32 %v734_v4, %v356_v3 }
  0xfe   :  { %v401_v8 = vmax.f32 %v396_v7, 0.0 }
 0x100   :  { %v402_v9 = vpack.c.bf16 %v401_v8, %v401_v8 }
 0x102   :  { %773 = vmatmul.mubr.bf16.vlgmr.msra.gmra.mrb[4].mxu0 %v402_v9 }
 0x1d5   :  { %v508_v13 = vpop.f32.mrb[4].mxu0 }
 0x1d6   :  { %v509_v14 = vadd.f32 %v676_v12, %v508_v13  ;;  %v774_v15 = vpop.f32.mrb[5].mxu0 }
 0x1d7   :  { %v511_v16 = vpop.f32.mrb[6].mxu0 }
 0x1d8   :  { %v514_v17 = vmax.f32 %v509_v14, 0.0  ;;  %v775_v18 = vpop.f32.mrb[7].mxu0 }
 0x1da   :  { %v515_v19 = vpack.c.bf16 %v514_v17, %v514_v17 }
 0x1dc   :  { %793 = vmatmul.mubr.bf16.vlgmr.msra.gmra.mrb[4].mxu1 %v515_v19 }
 0x2af   :  { %v621_v21 = vpop.f32.mrb[4].mxu1 }
 0x2b0   :  { %v622_v22 = vadd.f32 %v685_v20, %v621_v21  ;;  %v794_v23 = vpop.f32.mrb[5].mxu1 }
 0x2b1   :  { %v624_v24 = vpop.f32.mrb[6].mxu1 }
 0x2b2   :  { %627 = vst [vmem:[#allocation2] sm:$0x3] %v622_v22  ;;  %v795_v25 = vpop.f32.mrb[7].mxu1 }
 0x2b3   :  { %859 = shalt.err (!%p856_p4)
}
 0x2b4   :  { %s860_s6 = scalar_lea.hbm %s1109_s7, 32 }
 0x2b5   :  { %p861_p5 = scmp.ne.s32.totalorder %s1109_s7, %s860_s6  ;;  %p864_p6 = scmp.lt.u32.totalorder %s860_s6, %s1109_s7 }
 0x2b7   :  { %p866_p7 = pnand %p864_p6, %p861_p5 }
 0x2b9   :  { %869 = shalt.err (!%p866_p7)
}
 0x2ba   :  { %637 = dma.vmem_to_hbm [thread:$0]  %s635_s8, 32, %s1109_s7, [#allocation3]  }
 0x2bb   :  { %870 = dma.done.wait [#allocation3], 32  }
 0x2bc   :  { %871 = vsyncadd [#allocation3], 4294967264 }
 0x2bd   :  { %641 = vsyncpa [#allocation3], 1 }

</bundles_post_ra>
